<compile_context>
chip_gen: v6e
topology: v6e:2x2x1
jax: 0.10.0
libtpu: 0.0.40
codegen_flags: <defaults>
</compile_context>

<pallas_src>
import jax
import jax.numpy as jnp
from jax.experimental import pallas as pl
from jax.experimental.pallas import tpu as pltpu

HIDDEN = 128
INPUT_FEATURES = 3
NUM_LAYERS = 2
FC1_OUT = 60
FC1_PAD = 128  # zero-padded head width (lane-dense, mathematically exact)


def make_rnn_kernel(B, Tc, T_total, needs_mask, unroll):
    """Build the chunked-recurrence kernel (all sizes static)."""
    H = HIDDEN

    def kernel(xw_ref,        # (Tc, B, 4H) precomputed x @ Wih0 + b0, this chunk
               whh0_ref,      # (H, 4H)  bf16  layer-0 recurrent weights (W^T)
               wih1_ref,      # (H, 4H)  bf16  layer-1 input weights (W^T)
               whh1_ref,      # (H, 4H)  bf16  layer-1 recurrent weights (W^T)
               b1_ref,        # (1, 4H)  f32   layer-1 folded bias
               fc1w_ref,      # (H, FC1_PAD) bf16
               fc1b_ref,      # (1, FC1_PAD) f32
               fc2w_ref,      # (1, FC1_PAD) f32  (row vector; fc2 done on VPU)
               fc2b_ref,      # (1, 1) f32
               out_ref,       # (B, 1)
               h0_ref, c0_ref, h1_ref, c1_ref):  # VMEM scratch, persists over grid
        chunk = pl.program_id(0)

        @pl.when(chunk == 0)
        def _init():
            h0_ref[...] = jnp.zeros_like(h0_ref)
            c0_ref[...] = jnp.zeros_like(c0_ref)
            h1_ref[...] = jnp.zeros_like(h1_ref)
            c1_ref[...] = jnp.zeros_like(c1_ref)

        # Hoisted out of the time loop: JAX does not CSE broadcast_in_dim.
        b1_b = jnp.broadcast_to(b1_ref[...], (B, 4 * H))

        def lstm_gates(g, c_prev):
            # PyTorch gate order i, f, g, o — slices land on 128-lane boundaries.
            i = jax.nn.sigmoid(g[:, 0 * H:1 * H])
            f = jax.nn.sigmoid(g[:, 1 * H:2 * H])
            gg = jnp.tanh(g[:, 2 * H:3 * H])
            o = jax.nn.sigmoid(g[:, 3 * H:4 * H])
            c_new = f * c_prev + i * gg
            return o * jnp.tanh(c_new), c_new

        def step(t, carry):
            h0, c0, h1, c1 = carry
            # Split layer-1 matmul: the Whh1 term depends only on h1_prev, so it
            # is independent of layer 0 and overlaps layer-0's EUP work.
            p1 = jnp.dot(h1.astype(jnp.bfloat16), whh1_ref[...],
                         preferred_element_type=jnp.float32) + b1_b
            # Layer 0: only the recurrent matmul is on the serial path.
            g0 = xw_ref[t] + jnp.dot(h0.astype(jnp.bfloat16), whh0_ref[...],
                                     preferred_element_type=jnp.float32)
            h0n, c0n = lstm_gates(g0, c0)
            # Layer 1: remaining (h0n-dependent) term.
            g1 = p1 + jnp.dot(h0n.astype(jnp.bfloat16), wih1_ref[...],
                              preferred_element_type=jnp.float32)
            h1n, c1n = lstm_gates(g1, c1)
            if needs_mask:
                valid = (chunk * Tc + t) < T_total
                h0n = jnp.where(valid, h0n, h0)
                c0n = jnp.where(valid, c0n, c0)
                h1n = jnp.where(valid, h1n, h1)
                c1n = jnp.where(valid, c1n, c1)
            return h0n, c0n, h1n, c1n

        carry = (h0_ref[...], c0_ref[...], h1_ref[...], c1_ref[...])
        h0, c0, h1, c1 = jax.lax.fori_loop(0, Tc, step, carry, unroll=unroll)
        h0_ref[...], c0_ref[...], h1_ref[...], c1_ref[...] = h0, c0, h1, c1

        @pl.when(chunk == pl.num_programs(0) - 1)
        def _head():
            # fc1 -> ReLU (head weights zero-padded to 128 lanes; exact).
            a = jnp.dot(h1_ref[...].astype(jnp.bfloat16), fc1w_ref[...],
                        preferred_element_type=jnp.float32) + fc1b_ref[...]
            a = jnp.maximum(a, 0.0)
            # fc2 as VPU multiply + lane reduction (avoids an N=1 MXU matmul).
            y = jnp.sum(a * fc2w_ref[...], axis=-1, keepdims=True) + fc2b_ref[...]
            out_ref[...] = y.astype(out_ref.dtype)

    return kernel


@jax.jit
def rnn_forward(x, params):
    """x: (B, T, F) float32, batch_first like the PyTorch module."""
    B, T, F = x.shape
    (wih0_t, b0, whh0_t, wih1_t, whh1_t, b1,
     fc1w_p, fc1b_p, fc2w_row, fc2b) = params
    H = HIDDEN

    # Pad batch to the f32 sublane tile (8) so every matmul M-dim is clean.
    B_pad = max(8, ((B + 7) // 8) * 8)
    x_tbf = jnp.transpose(x, (1, 0, 2))                      # (T, B, F)
    if B_pad != B:
        x_tbf = jnp.pad(x_tbf, ((0, 0), (0, B_pad - B), (0, 0)))

    # Hoist the layer-0 input projection out of the recurrence: one batched matmul.
    xw = jnp.einsum('tbf,fg->tbg', x_tbf, wih0_t) + b0       # (T, B_pad, 4H) f32

    # Stream xw over T in chunks (bounded VMEM, DMA overlapped with recurrence).
    Tc = T if T <= 32 else 32
    num_chunks = -(-T // Tc)
    T_pad = num_chunks * Tc
    needs_mask = T_pad != T
    if needs_mask:
        xw = jnp.pad(xw, ((0, T_pad - T), (0, 0), (0, 0)))
    unroll = True if Tc <= 16 else 8

    bf = jnp.bfloat16
    kernel = make_rnn_kernel(B_pad, Tc, T, needs_mask, unroll)

    out = pl.pallas_call(
        kernel,
        grid=(num_chunks,),
        in_specs=[
            pl.BlockSpec((Tc, B_pad, 4 * H), lambda t: (t, 0, 0)),   # xw (streamed)
            pl.BlockSpec((H, 4 * H), lambda t: (0, 0)),              # Whh0^T
            pl.BlockSpec((H, 4 * H), lambda t: (0, 0)),              # Wih1^T
            pl.BlockSpec((H, 4 * H), lambda t: (0, 0)),              # Whh1^T
            pl.BlockSpec((1, 4 * H), lambda t: (0, 0)),              # b1
            pl.BlockSpec((H, FC1_PAD), lambda t: (0, 0)),            # fc1 W^T
            pl.BlockSpec((1, FC1_PAD), lambda t: (0, 0)),            # fc1 b
            pl.BlockSpec((1, FC1_PAD), lambda t: (0, 0)),            # fc2 W row
            pl.BlockSpec((1, 1), lambda t: (0, 0)),                  # fc2 b
        ],
        out_specs=pl.BlockSpec((B_pad, 1), lambda t: (0, 0)),
        out_shape=jax.ShapeDtypeStruct((B_pad, 1), jnp.float32),
        scratch_shapes=[pltpu.VMEM((B_pad, H), jnp.float32)] * 4,     # h0, c0, h1, c1
        compiler_params=pltpu.CompilerParams(
            dimension_semantics=("arbitrary",)),
    )(xw, whh0_t.astype(bf), wih1_t.astype(bf), whh1_t.astype(bf), b1,
      fc1w_p.astype(bf), fc1b_p, fc2w_row, fc2b)
    return out[:B]


def init_params(key):
    """Deterministic init matching PyTorch shapes, pre-packed for the kernel."""
    H, F = HIDDEN, INPUT_FEATURES
    keys = jax.random.split(key, 12)
    k = 1.0 / jnp.sqrt(H)
    u = lambda kk, shape, s: jax.random.uniform(kk, shape, jnp.float32, -s, s)

    # nn.LSTM layer 0: weight_ih_l0 (4H, F), weight_hh_l0 (4H, H), biases (4H,)
    wih0 = u(keys[0], (4 * H, F), k)
    whh0 = u(keys[1], (4 * H, H), k)
    b0 = u(keys[2], (4 * H,), k) + u(keys[3], (4 * H,), k)   # b_ih + b_hh folded
    # nn.LSTM layer 1: weight_ih_l1 (4H, H), weight_hh_l1 (4H, H)
    wih1 = u(keys[4], (4 * H, H), k)
    whh1 = u(keys[5], (4 * H, H), k)
    b1 = u(keys[6], (4 * H,), k) + u(keys[7], (4 * H,), k)

    # fc1: Linear(H, 60), fc2: Linear(60, 1)
    k1 = 1.0 / jnp.sqrt(H)
    fc1w = u(keys[8], (FC1_OUT, H), k1)
    fc1b = u(keys[9], (FC1_OUT,), k1)
    k2 = 1.0 / jnp.sqrt(FC1_OUT)
    fc2w = u(keys[10], (1, FC1_OUT), k2)
    fc2b = u(keys[11], (1,), k2)

    # Zero-pad the head to 128 lanes (padded cols/rows contribute exactly 0).
    P = FC1_PAD
    fc1w_p = jnp.zeros((H, P), jnp.float32).at[:, :FC1_OUT].set(fc1w.T)
    fc1b_p = jnp.zeros((1, P), jnp.float32).at[:, :FC1_OUT].set(fc1b)
    fc2w_row = jnp.zeros((1, P), jnp.float32).at[:, :FC1_OUT].set(fc2w)
    fc2b_r = fc2b[None, :]

    return (wih0.T, b0[None, :], whh0.T, wih1.T, whh1.T, b1[None, :],
            fc1w_p, fc1b_p, fc2w_row, fc2b_r)


def rnn_reference(x, params):
    """Pure-JAX f32 reference (lax.scan) for verification."""
    (wih0_t, b0, whh0_t, wih1_t, whh1_t, b1,
     fc1w_p, fc1b_p, fc2w_row, fc2b) = params
    B = x.shape[0]
    H = HIDDEN

    def cell(pre, h, c, whh_t):
        g = pre + h @ whh_t
        i = jax.nn.sigmoid(g[:, :H])
        f = jax.nn.sigmoid(g[:, H:2 * H])
        gg = jnp.tanh(g[:, 2 * H:3 * H])
        o = jax.nn.sigmoid(g[:, 3 * H:])
        c_new = f * c + i * gg
        return o * jnp.tanh(c_new), c_new

    def step(carry, x_t):
        h0, c0, h1, c1 = carry
        h0n, c0n = cell(x_t @ wih0_t + b0, h0, c0, whh0_t)
        h1n, c1n = cell(h0n @ wih1_t + b1, h1, c1, whh1_t)
        return (h0n, c0n, h1n, c1n), None

    init = tuple(jnp.zeros((B, H), jnp.float32) for _ in range(4))
    (h0, c0, h1, c1), _ = jax.lax.scan(step, init, jnp.transpose(x, (1, 0, 2)))
    z = jnp.maximum(h1 @ fc1w_p + fc1b_p, 0.0)
    return jnp.sum(z * fc2w_row, axis=-1, keepdims=True) + fc2b


if __name__ == "__main__":
    B, T, F = 2, 8, INPUT_FEATURES
    key = jax.random.PRNGKey(0)
    kx, kp = jax.random.split(key)
    x = jax.random.normal(kx, (B, T, F), jnp.float32)
    params = init_params(kp)

    out = jax.block_until_ready(rnn_forward(x, params))
    ref = rnn_reference(x, params)

    assert out.shape == (B, 1), out.shape
    # bf16 MXU inputs (f32 accumulation) -> tiny drift vs. the pure-f32 reference.
    assert jnp.allclose(out, ref, atol=1e-2, rtol=1e-2), (out, ref)

    print("KERNEL_OK")
</pallas_src>

<mosaic_0001>
module attributes {stable_mosaic.version = 11 : i64} {
  func.func @kernel(%arg0: i32, %arg1: memref<8x8x512xf32, #tpu.memory_space<vmem>>, %arg2: memref<128x512xbf16, #tpu.memory_space<vmem>>, %arg3: memref<128x512xbf16, #tpu.memory_space<vmem>>, %arg4: memref<128x512xbf16, #tpu.memory_space<vmem>>, %arg5: memref<1x512xf32, #tpu.memory_space<vmem>>, %arg6: memref<128x128xbf16, #tpu.memory_space<vmem>>, %arg7: memref<1x128xf32, #tpu.memory_space<vmem>>, %arg8: memref<1x128xf32, #tpu.memory_space<vmem>>, %arg9: memref<1x1xf32, #tpu.memory_space<vmem>>, %arg10: memref<8x1xf32, #tpu.memory_space<vmem>>, %arg11: memref<8x128xf32, #tpu.memory_space<vmem>>, %arg12: memref<8x128xf32, #tpu.memory_space<vmem>>, %arg13: memref<8x128xf32, #tpu.memory_space<vmem>>, %arg14: memref<8x128xf32, #tpu.memory_space<vmem>>) attributes {dimension_semantics = [#tpu.dimension_semantics<arbitrary>], iteration_bounds = array<i64: 1>, scalar_prefetch = 0 : i64, scratch_operands = 4 : i64, tpu.core_type = #tpu.core_type<tc>, window_params = [{transform_indices = @transform_0, window_bounds = array<i64: 8, 8, 512>}, {pipeline_mode = #tpu.pipeline_mode<synchronous>, transform_indices = @transform_1, window_bounds = array<i64: 128, 512>}, {pipeline_mode = #tpu.pipeline_mode<synchronous>, transform_indices = @transform_2, window_bounds = array<i64: 128, 512>}, {pipeline_mode = #tpu.pipeline_mode<synchronous>, transform_indices = @transform_3, window_bounds = array<i64: 128, 512>}, {pipeline_mode = #tpu.pipeline_mode<synchronous>, transform_indices = @transform_4, window_bounds = array<i64: 1, 512>}, {pipeline_mode = #tpu.pipeline_mode<synchronous>, transform_indices = @transform_5, window_bounds = array<i64: 128, 128>}, {pipeline_mode = #tpu.pipeline_mode<synchronous>, transform_indices = @transform_6, window_bounds = array<i64: 1, 128>}, {pipeline_mode = #tpu.pipeline_mode<synchronous>, transform_indices = @transform_7, window_bounds = array<i64: 1, 128>}, {pipeline_mode = #tpu.pipeline_mode<synchronous>, transform_indices = @transform_8, window_bounds = array<i64: 1, 1>}, {pipeline_mode = #tpu.pipeline_mode<synchronous>, transform_indices = @transform_9, window_bounds = array<i64: 8, 1>}]} {
    %c0_i32 = arith.constant 0 : i32
    %0 = arith.cmpi eq, %arg0, %c0_i32 : i32
    %1 = arith.extui %0 : i1 to i32
    %c0_i32_0 = arith.constant 0 : i32
    %2 = arith.cmpi ne, %1, %c0_i32_0 : i32
    scf.if %2 {
      %cst_156 = arith.constant 0.000000e+00 : f32
      %537 = vector.broadcast %cst_156 : f32 to vector<8x128xf32>
      %c0_157 = arith.constant 0 : index
      %c0_158 = arith.constant 0 : index
      %538 = vector.load %arg11[%c0_157, %c0_158] : memref<8x128xf32, #tpu.memory_space<vmem>>, vector<8x128xf32>
      tpu.vector_store %arg11[%c0_157, %c0_158], %537 {strides = array<i32>} : memref<8x128xf32, #tpu.memory_space<vmem>>, vector<8x128xf32>,
      %cst_159 = arith.constant 0.000000e+00 : f32
      %539 = vector.broadcast %cst_159 : f32 to vector<8x128xf32>
      %c0_160 = arith.constant 0 : index
      %c0_161 = arith.constant 0 : index
      %540 = vector.load %arg12[%c0_160, %c0_161] : memref<8x128xf32, #tpu.memory_space<vmem>>, vector<8x128xf32>
      tpu.vector_store %arg12[%c0_160, %c0_161], %539 {strides = array<i32>} : memref<8x128xf32, #tpu.memory_space<vmem>>, vector<8x128xf32>,
      %cst_162 = arith.constant 0.000000e+00 : f32
      %541 = vector.broadcast %cst_162 : f32 to vector<8x128xf32>
      %c0_163 = arith.constant 0 : index
      %c0_164 = arith.constant 0 : index
      %542 = vector.load %arg13[%c0_163, %c0_164] : memref<8x128xf32, #tpu.memory_space<vmem>>, vector<8x128xf32>
      tpu.vector_store %arg13[%c0_163, %c0_164], %541 {strides = array<i32>} : memref<8x128xf32, #tpu.memory_space<vmem>>, vector<8x128xf32>,
      %cst_165 = arith.constant 0.000000e+00 : f32
      %543 = vector.broadcast %cst_165 : f32 to vector<8x128xf32>
      %c0_166 = arith.constant 0 : index
      %c0_167 = arith.constant 0 : index
      %544 = vector.load %arg14[%c0_166, %c0_167] : memref<8x128xf32, #tpu.memory_space<vmem>>, vector<8x128xf32>
      tpu.vector_store %arg14[%c0_166, %c0_167], %543 {strides = array<i32>} : memref<8x128xf32, #tpu.memory_space<vmem>>, vector<8x128xf32>,
    } else {
    }
    %c0 = arith.constant 0 : index
    %c0_1 = arith.constant 0 : index
    %3 = vector.load %arg5[%c0, %c0_1] : memref<1x512xf32, #tpu.memory_space<vmem>>, vector<1x512xf32>
    %4 = vector.shape_cast %3 : vector<1x512xf32> to vector<1x512xf32>
    %5 = vector.broadcast %4 : vector<1x512xf32> to vector<8x512xf32>
    %c0_2 = arith.constant 0 : index
    %c0_3 = arith.constant 0 : index
    %6 = vector.load %arg11[%c0_2, %c0_3] : memref<8x128xf32, #tpu.memory_space<vmem>>, vector<8x128xf32>
    %c0_4 = arith.constant 0 : index
    %c0_5 = arith.constant 0 : index
    %7 = vector.load %arg12[%c0_4, %c0_5] : memref<8x128xf32, #tpu.memory_space<vmem>>, vector<8x128xf32>
    %c0_6 = arith.constant 0 : index
    %c0_7 = arith.constant 0 : index
    %8 = vector.load %arg13[%c0_6, %c0_7] : memref<8x128xf32, #tpu.memory_space<vmem>>, vector<8x128xf32>
    %c0_8 = arith.constant 0 : index
    %c0_9 = arith.constant 0 : index
    %9 = vector.load %arg14[%c0_8, %c0_9] : memref<8x128xf32, #tpu.memory_space<vmem>>, vector<8x128xf32>
    %c0_i32_10 = arith.constant 0 : i32
    %10 = arith.truncf %8 : vector<8x128xf32> to vector<8x128xbf16>
    %c0_11 = arith.constant 0 : index
    %c0_12 = arith.constant 0 : index
    %11 = vector.load %arg4[%c0_11, %c0_12] : memref<128x512xbf16, #tpu.memory_space<vmem>>, vector<128x512xbf16>
    %cst = arith.constant dense<0.000000e+00> : vector<8x512xf32>
    %12 = tpu.matmul %10, %11, %cst {dimension_numbers = #tpu.dot_dimension_numbers<[1], [0], [0], [1], [0, 0, 1, 1], [], []>} : vector<8x128xbf16>, vector<128x512xbf16>, vector<8x512xf32> -> vector<8x512xf32>
    %13 = arith.addf %12, %5 : vector<8x512xf32>
    %14 = arith.index_cast %c0_i32_10 : i32 to index
    %c0_13 = arith.constant 0 : index
    %c0_14 = arith.constant 0 : index
    %15 = vector.load %arg1[%14, %c0_13, %c0_14] : memref<8x8x512xf32, #tpu.memory_space<vmem>>, vector<1x8x512xf32>
    %16 = vector.shape_cast %15 : vector<1x8x512xf32> to vector<8x512xf32>
    %17 = arith.truncf %6 : vector<8x128xf32> to vector<8x128xbf16>
    %c0_15 = arith.constant 0 : index
    %c0_16 = arith.constant 0 : index
    %18 = vector.load %arg2[%c0_15, %c0_16] : memref<128x512xbf16, #tpu.memory_space<vmem>>, vector<128x512xbf16>
    %cst_17 = arith.constant dense<0.000000e+00> : vector<8x512xf32>
    %19 = tpu.matmul %17, %18, %cst_17 {dimension_numbers = #tpu.dot_dimension_numbers<[1], [0], [0], [1], [0, 0, 1, 1], [], []>} : vector<8x128xbf16>, vector<128x512xbf16>, vector<8x512xf32> -> vector<8x512xf32>
    %20 = arith.addf %16, %19 : vector<8x512xf32>
    %21 = vector.extract_strided_slice %20 {offsets = [0, 0], sizes = [8, 128], strides = [1, 1]} : vector<8x512xf32> to vector<8x128xf32>
    %22 = arith.negf %21 : vector<8x128xf32>
    %23 = math.exp %22 : vector<8x128xf32>
    %cst_18 = arith.constant 1.000000e+00 : f32
    %24 = vector.broadcast %cst_18 : f32 to vector<8x128xf32>
    %25 = arith.addf %24, %23 : vector<8x128xf32>
    %26 = arith.divf %24, %25 : vector<8x128xf32>
    %27 = vector.extract_strided_slice %20 {offsets = [0, 128], sizes = [8, 128], strides = [1, 1]} : vector<8x512xf32> to vector<8x128xf32>
    %28 = arith.negf %27 : vector<8x128xf32>
    %29 = math.exp %28 : vector<8x128xf32>
    %cst_19 = arith.constant 1.000000e+00 : f32
    %30 = vector.broadcast %cst_19 : f32 to vector<8x128xf32>
    %31 = arith.addf %30, %29 : vector<8x128xf32>
    %32 = arith.divf %30, %31 : vector<8x128xf32>
    %33 = vector.extract_strided_slice %20 {offsets = [0, 256], sizes = [8, 128], strides = [1, 1]} : vector<8x512xf32> to vector<8x128xf32>
    %34 = math.tanh %33 : vector<8x128xf32>
    %35 = vector.extract_strided_slice %20 {offsets = [0, 384], sizes = [8, 128], strides = [1, 1]} : vector<8x512xf32> to vector<8x128xf32>
    %36 = arith.negf %35 : vector<8x128xf32>
    %37 = math.exp %36 : vector<8x128xf32>
    %cst_20 = arith.constant 1.000000e+00 : f32
    %38 = vector.broadcast %cst_20 : f32 to vector<8x128xf32>
    %39 = arith.addf %38, %37 : vector<8x128xf32>
    %40 = arith.divf %38, %39 : vector<8x128xf32>
    %41 = arith.mulf %32, %7 : vector<8x128xf32>
    %42 = arith.mulf %26, %34 : vector<8x128xf32>
    %43 = arith.addf %41, %42 : vector<8x128xf32>
    %44 = math.tanh %43 : vector<8x128xf32>
    %45 = arith.mulf %40, %44 : vector<8x128xf32>
    %46 = arith.truncf %45 : vector<8x128xf32> to vector<8x128xbf16>
    %c0_21 = arith.constant 0 : index
    %c0_22 = arith.constant 0 : index
    %47 = vector.load %arg3[%c0_21, %c0_22] : memref<128x512xbf16, #tpu.memory_space<vmem>>, vector<128x512xbf16>
    %cst_23 = arith.constant dense<0.000000e+00> : vector<8x512xf32>
    %48 = tpu.matmul %46, %47, %cst_23 {dimension_numbers = #tpu.dot_dimension_numbers<[1], [0], [0], [1], [0, 0, 1, 1], [], []>} : vector<8x128xbf16>, vector<128x512xbf16>, vector<8x512xf32> -> vector<8x512xf32>
    %49 = arith.addf %13, %48 : vector<8x512xf32>
    %50 = vector.extract_strided_slice %49 {offsets = [0, 0], sizes = [8, 128], strides = [1, 1]} : vector<8x512xf32> to vector<8x128xf32>
    %51 = arith.negf %50 : vector<8x128xf32>
    %52 = math.exp %51 : vector<8x128xf32>
    %cst_24 = arith.constant 1.000000e+00 : f32
    %53 = vector.broadcast %cst_24 : f32 to vector<8x128xf32>
    %54 = arith.addf %53, %52 : vector<8x128xf32>
    %55 = arith.divf %53, %54 : vector<8x128xf32>
    %56 = vector.extract_strided_slice %49 {offsets = [0, 128], sizes = [8, 128], strides = [1, 1]} : vector<8x512xf32> to vector<8x128xf32>
    %57 = arith.negf %56 : vector<8x128xf32>
    %58 = math.exp %57 : vector<8x128xf32>
    %cst_25 = arith.constant 1.000000e+00 : f32
    %59 = vector.broadcast %cst_25 : f32 to vector<8x128xf32>
    %60 = arith.addf %59, %58 : vector<8x128xf32>
    %61 = arith.divf %59, %60 : vector<8x128xf32>
    %62 = vector.extract_strided_slice %49 {offsets = [0, 256], sizes = [8, 128], strides = [1, 1]} : vector<8x512xf32> to vector<8x128xf32>
    %63 = math.tanh %62 : vector<8x128xf32>
    %64 = vector.extract_strided_slice %49 {offsets = [0, 384], sizes = [8, 128], strides = [1, 1]} : vector<8x512xf32> to vector<8x128xf32>
    %65 = arith.negf %64 : vector<8x128xf32>
    %66 = math.exp %65 : vector<8x128xf32>
    %cst_26 = arith.constant 1.000000e+00 : f32
    %67 = vector.broadcast %cst_26 : f32 to vector<8x128xf32>
    %68 = arith.addf %67, %66 : vector<8x128xf32>
    %69 = arith.divf %67, %68 : vector<8x128xf32>
    %70 = arith.mulf %61, %9 : vector<8x128xf32>
    %71 = arith.mulf %55, %63 : vector<8x128xf32>
    %72 = arith.addf %70, %71 : vector<8x128xf32>
    %73 = math.tanh %72 : vector<8x128xf32>
    %74 = arith.mulf %69, %73 : vector<8x128xf32>
    %c1_i32 = arith.constant 1 : i32
    %75 = arith.truncf %74 : vector<8x128xf32> to vector<8x128xbf16>
    %c0_27 = arith.constant 0 : index
    %c0_28 = arith.constant 0 : index
    %76 = vector.load %arg4[%c0_27, %c0_28] : memref<128x512xbf16, #tpu.memory_space<vmem>>, vector<128x512xbf16>
    %cst_29 = arith.constant dense<0.000000e+00> : vector<8x512xf32>
    %77 = tpu.matmul %75, %76, %cst_29 {dimension_numbers = #tpu.dot_dimension_numbers<[1], [0], [0], [1], [0, 0, 1, 1], [], []>} : vector<8x128xbf16>, vector<128x512xbf16>, vector<8x512xf32> -> vector<8x512xf32>
    %78 = arith.addf %77, %5 : vector<8x512xf32>
    %79 = arith.index_cast %c1_i32 : i32 to index
    %c0_30 = arith.constant 0 : index
    %c0_31 = arith.constant 0 : index
    %80 = vector.load %arg1[%79, %c0_30, %c0_31] : memref<8x8x512xf32, #tpu.memory_space<vmem>>, vector<1x8x512xf32>
    %81 = vector.shape_cast %80 : vector<1x8x512xf32> to vector<8x512xf32>
    %82 = arith.truncf %45 : vector<8x128xf32> to vector<8x128xbf16>
    %c0_32 = arith.constant 0 : index
    %c0_33 = arith.constant 0 : index
    %83 = vector.load %arg2[%c0_32, %c0_33] : memref<128x512xbf16, #tpu.memory_space<vmem>>, vector<128x512xbf16>
    %cst_34 = arith.constant dense<0.000000e+00> : vector<8x512xf32>
    %84 = tpu.matmul %82, %83, %cst_34 {dimension_numbers = #tpu.dot_dimension_numbers<[1], [0], [0], [1], [0, 0, 1, 1], [], []>} : vector<8x128xbf16>, vector<128x512xbf16>, vector<8x512xf32> -> vector<8x512xf32>
    %85 = arith.addf %81, %84 : vector<8x512xf32>
    %86 = vector.extract_strided_slice %85 {offsets = [0, 0], sizes = [8, 128], strides = [1, 1]} : vector<8x512xf32> to vector<8x128xf32>
    %87 = arith.negf %86 : vector<8x128xf32>
    %88 = math.exp %87 : vector<8x128xf32>
    %cst_35 = arith.constant 1.000000e+00 : f32
    %89 = vector.broadcast %cst_35 : f32 to vector<8x128xf32>
    %90 = arith.addf %89, %88 : vector<8x128xf32>
    %91 = arith.divf %89, %90 : vector<8x128xf32>
    %92 = vector.extract_strided_slice %85 {offsets = [0, 128], sizes = [8, 128], strides = [1, 1]} : vector<8x512xf32> to vector<8x128xf32>
    %93 = arith.negf %92 : vector<8x128xf32>
    %94 = math.exp %93 : vector<8x128xf32>
    %cst_36 = arith.constant 1.000000e+00 : f32
    %95 = vector.broadcast %cst_36 : f32 to vector<8x128xf32>
    %96 = arith.addf %95, %94 : vector<8x128xf32>
    %97 = arith.divf %95, %96 : vector<8x128xf32>
    %98 = vector.extract_strided_slice %85 {offsets = [0, 256], sizes = [8, 128], strides = [1, 1]} : vector<8x512xf32> to vector<8x128xf32>
    %99 = math.tanh %98 : vector<8x128xf32>
    %100 = vector.extract_strided_slice %85 {offsets = [0, 384], sizes = [8, 128], strides = [1, 1]} : vector<8x512xf32> to vector<8x128xf32>
    %101 = arith.negf %100 : vector<8x128xf32>
    %102 = math.exp %101 : vector<8x128xf32>
    %cst_37 = arith.constant 1.000000e+00 : f32
    %103 = vector.broadcast %cst_37 : f32 to vector<8x128xf32>
    %104 = arith.addf %103, %102 : vector<8x128xf32>
    %105 = arith.divf %103, %104 : vector<8x128xf32>
    %106 = arith.mulf %97, %43 : vector<8x128xf32>
    %107 = arith.mulf %91, %99 : vector<8x128xf32>
    %108 = arith.addf %106, %107 : vector<8x128xf32>
    %109 = math.tanh %108 : vector<8x128xf32>
    %110 = arith.mulf %105, %109 : vector<8x128xf32>
    %111 = arith.truncf %110 : vector<8x128xf32> to vector<8x128xbf16>
    %c0_38 = arith.constant 0 : index
    %c0_39 = arith.constant 0 : index
    %112 = vector.load %arg3[%c0_38, %c0_39] : memref<128x512xbf16, #tpu.memory_space<vmem>>, vector<128x512xbf16>
    %cst_40 = arith.constant dense<0.000000e+00> : vector<8x512xf32>
    %113 = tpu.matmul %111, %112, %cst_40 {dimension_numbers = #tpu.dot_dimension_numbers<[1], [0], [0], [1], [0, 0, 1, 1], [], []>} : vector<8x128xbf16>, vector<128x512xbf16>, vector<8x512xf32> -> vector<8x512xf32>
    %114 = arith.addf %78, %113 : vector<8x512xf32>
    %115 = vector.extract_strided_slice %114 {offsets = [0, 0], sizes = [8, 128], strides = [1, 1]} : vector<8x512xf32> to vector<8x128xf32>
    %116 = arith.negf %115 : vector<8x128xf32>
    %117 = math.exp %116 : vector<8x128xf32>
    %cst_41 = arith.constant 1.000000e+00 : f32
    %118 = vector.broadcast %cst_41 : f32 to vector<8x128xf32>
    %119 = arith.addf %118, %117 : vector<8x128xf32>
    %120 = arith.divf %118, %119 : vector<8x128xf32>
    %121 = vector.extract_strided_slice %114 {offsets = [0, 128], sizes = [8, 128], strides = [1, 1]} : vector<8x512xf32> to vector<8x128xf32>
    %122 = arith.negf %121 : vector<8x128xf32>
    %123 = math.exp %122 : vector<8x128xf32>
    %cst_42 = arith.constant 1.000000e+00 : f32
    %124 = vector.broadcast %cst_42 : f32 to vector<8x128xf32>
    %125 = arith.addf %124, %123 : vector<8x128xf32>
    %126 = arith.divf %124, %125 : vector<8x128xf32>
    %127 = vector.extract_strided_slice %114 {offsets = [0, 256], sizes = [8, 128], strides = [1, 1]} : vector<8x512xf32> to vector<8x128xf32>
    %128 = math.tanh %127 : vector<8x128xf32>
    %129 = vector.extract_strided_slice %114 {offsets = [0, 384], sizes = [8, 128], strides = [1, 1]} : vector<8x512xf32> to vector<8x128xf32>
    %130 = arith.negf %129 : vector<8x128xf32>
    %131 = math.exp %130 : vector<8x128xf32>
    %cst_43 = arith.constant 1.000000e+00 : f32
    %132 = vector.broadcast %cst_43 : f32 to vector<8x128xf32>
    %133 = arith.addf %132, %131 : vector<8x128xf32>
    %134 = arith.divf %132, %133 : vector<8x128xf32>
    %135 = arith.mulf %126, %72 : vector<8x128xf32>
    %136 = arith.mulf %120, %128 : vector<8x128xf32>
    %137 = arith.addf %135, %136 : vector<8x128xf32>
    %138 = math.tanh %137 : vector<8x128xf32>
    %139 = arith.mulf %134, %138 : vector<8x128xf32>
    %c2_i32 = arith.constant 2 : i32
    %140 = arith.truncf %139 : vector<8x128xf32> to vector<8x128xbf16>
    %c0_44 = arith.constant 0 : index
    %c0_45 = arith.constant 0 : index
    %141 = vector.load %arg4[%c0_44, %c0_45] : memref<128x512xbf16, #tpu.memory_space<vmem>>, vector<128x512xbf16>
    %cst_46 = arith.constant dense<0.000000e+00> : vector<8x512xf32>
    %142 = tpu.matmul %140, %141, %cst_46 {dimension_numbers = #tpu.dot_dimension_numbers<[1], [0], [0], [1], [0, 0, 1, 1], [], []>} : vector<8x128xbf16>, vector<128x512xbf16>, vector<8x512xf32> -> vector<8x512xf32>
    %143 = arith.addf %142, %5 : vector<8x512xf32>
    %144 = arith.index_cast %c2_i32 : i32 to index
    %c0_47 = arith.constant 0 : index
    %c0_48 = arith.constant 0 : index
    %145 = vector.load %arg1[%144, %c0_47, %c0_48] : memref<8x8x512xf32, #tpu.memory_space<vmem>>, vector<1x8x512xf32>
    %146 = vector.shape_cast %145 : vector<1x8x512xf32> to vector<8x512xf32>
    %147 = arith.truncf %110 : vector<8x128xf32> to vector<8x128xbf16>
    %c0_49 = arith.constant 0 : index
    %c0_50 = arith.constant 0 : index
    %148 = vector.load %arg2[%c0_49, %c0_50] : memref<128x512xbf16, #tpu.memory_space<vmem>>, vector<128x512xbf16>
    %cst_51 = arith.constant dense<0.000000e+00> : vector<8x512xf32>
    %149 = tpu.matmul %147, %148, %cst_51 {dimension_numbers = #tpu.dot_dimension_numbers<[1], [0], [0], [1], [0, 0, 1, 1], [], []>} : vector<8x128xbf16>, vector<128x512xbf16>, vector<8x512xf32> -> vector<8x512xf32>
    %150 = arith.addf %146, %149 : vector<8x512xf32>
    %151 = vector.extract_strided_slice %150 {offsets = [0, 0], sizes = [8, 128], strides = [1, 1]} : vector<8x512xf32> to vector<8x128xf32>
    %152 = arith.negf %151 : vector<8x128xf32>
    %153 = math.exp %152 : vector<8x128xf32>
    %cst_52 = arith.constant 1.000000e+00 : f32
    %154 = vector.broadcast %cst_52 : f32 to vector<8x128xf32>
    %155 = arith.addf %154, %153 : vector<8x128xf32>
    %156 = arith.divf %154, %155 : vector<8x128xf32>
    %157 = vector.extract_strided_slice %150 {offsets = [0, 128], sizes = [8, 128], strides = [1, 1]} : vector<8x512xf32> to vector<8x128xf32>
    %158 = arith.negf %157 : vector<8x128xf32>
    %159 = math.exp %158 : vector<8x128xf32>
    %cst_53 = arith.constant 1.000000e+00 : f32
    %160 = vector.broadcast %cst_53 : f32 to vector<8x128xf32>
    %161 = arith.addf %160, %159 : vector<8x128xf32>
    %162 = arith.divf %160, %161 : vector<8x128xf32>
    %163 = vector.extract_strided_slice %150 {offsets = [0, 256], sizes = [8, 128], strides = [1, 1]} : vector<8x512xf32> to vector<8x128xf32>
    %164 = math.tanh %163 : vector<8x128xf32>
    %165 = vector.extract_strided_slice %150 {offsets = [0, 384], sizes = [8, 128], strides = [1, 1]} : vector<8x512xf32> to vector<8x128xf32>
    %166 = arith.negf %165 : vector<8x128xf32>
    %167 = math.exp %166 : vector<8x128xf32>
    %cst_54 = arith.constant 1.000000e+00 : f32
    %168 = vector.broadcast %cst_54 : f32 to vector<8x128xf32>
    %169 = arith.addf %168, %167 : vector<8x128xf32>
    %170 = arith.divf %168, %169 : vector<8x128xf32>
    %171 = arith.mulf %162, %108 : vector<8x128xf32>
    %172 = arith.mulf %156, %164 : vector<8x128xf32>
    %173 = arith.addf %171, %172 : vector<8x128xf32>
    %174 = math.tanh %173 : vector<8x128xf32>
    %175 = arith.mulf %170, %174 : vector<8x128xf32>
    %176 = arith.truncf %175 : vector<8x128xf32> to vector<8x128xbf16>
    %c0_55 = arith.constant 0 : index
    %c0_56 = arith.constant 0 : index
    %177 = vector.load %arg3[%c0_55, %c0_56] : memref<128x512xbf16, #tpu.memory_space<vmem>>, vector<128x512xbf16>
    %cst_57 = arith.constant dense<0.000000e+00> : vector<8x512xf32>
    %178 = tpu.matmul %176, %177, %cst_57 {dimension_numbers = #tpu.dot_dimension_numbers<[1], [0], [0], [1], [0, 0, 1, 1], [], []>} : vector<8x128xbf16>, vector<128x512xbf16>, vector<8x512xf32> -> vector<8x512xf32>
    %179 = arith.addf %143, %178 : vector<8x512xf32>
    %180 = vector.extract_strided_slice %179 {offsets = [0, 0], sizes = [8, 128], strides = [1, 1]} : vector<8x512xf32> to vector<8x128xf32>
    %181 = arith.negf %180 : vector<8x128xf32>
    %182 = math.exp %181 : vector<8x128xf32>
    %cst_58 = arith.constant 1.000000e+00 : f32
    %183 = vector.broadcast %cst_58 : f32 to vector<8x128xf32>
    %184 = arith.addf %183, %182 : vector<8x128xf32>
    %185 = arith.divf %183, %184 : vector<8x128xf32>
    %186 = vector.extract_strided_slice %179 {offsets = [0, 128], sizes = [8, 128], strides = [1, 1]} : vector<8x512xf32> to vector<8x128xf32>
    %187 = arith.negf %186 : vector<8x128xf32>
    %188 = math.exp %187 : vector<8x128xf32>
    %cst_59 = arith.constant 1.000000e+00 : f32
    %189 = vector.broadcast %cst_59 : f32 to vector<8x128xf32>
    %190 = arith.addf %189, %188 : vector<8x128xf32>
    %191 = arith.divf %189, %190 : vector<8x128xf32>
    %192 = vector.extract_strided_slice %179 {offsets = [0, 256], sizes = [8, 128], strides = [1, 1]} : vector<8x512xf32> to vector<8x128xf32>
    %193 = math.tanh %192 : vector<8x128xf32>
    %194 = vector.extract_strided_slice %179 {offsets = [0, 384], sizes = [8, 128], strides = [1, 1]} : vector<8x512xf32> to vector<8x128xf32>
    %195 = arith.negf %194 : vector<8x128xf32>
    %196 = math.exp %195 : vector<8x128xf32>
    %cst_60 = arith.constant 1.000000e+00 : f32
    %197 = vector.broadcast %cst_60 : f32 to vector<8x128xf32>
    %198 = arith.addf %197, %196 : vector<8x128xf32>
    %199 = arith.divf %197, %198 : vector<8x128xf32>
    %200 = arith.mulf %191, %137 : vector<8x128xf32>
    %201 = arith.mulf %185, %193 : vector<8x128xf32>
    %202 = arith.addf %200, %201 : vector<8x128xf32>
    %203 = math.tanh %202 : vector<8x128xf32>
    %204 = arith.mulf %199, %203 : vector<8x128xf32>
    %c3_i32 = arith.constant 3 : i32
    %205 = arith.truncf %204 : vector<8x128xf32> to vector<8x128xbf16>
    %c0_61 = arith.constant 0 : index
    %c0_62 = arith.constant 0 : index
    %206 = vector.load %arg4[%c0_61, %c0_62] : memref<128x512xbf16, #tpu.memory_space<vmem>>, vector<128x512xbf16>
    %cst_63 = arith.constant dense<0.000000e+00> : vector<8x512xf32>
    %207 = tpu.matmul %205, %206, %cst_63 {dimension_numbers = #tpu.dot_dimension_numbers<[1], [0], [0], [1], [0, 0, 1, 1], [], []>} : vector<8x128xbf16>, vector<128x512xbf16>, vector<8x512xf32> -> vector<8x512xf32>
    %208 = arith.addf %207, %5 : vector<8x512xf32>
    %209 = arith.index_cast %c3_i32 : i32 to index
    %c0_64 = arith.constant 0 : index
    %c0_65 = arith.constant 0 : index
    %210 = vector.load %arg1[%209, %c0_64, %c0_65] : memref<8x8x512xf32, #tpu.memory_space<vmem>>, vector<1x8x512xf32>
    %211 = vector.shape_cast %210 : vector<1x8x512xf32> to vector<8x512xf32>
    %212 = arith.truncf %175 : vector<8x128xf32> to vector<8x128xbf16>
    %c0_66 = arith.constant 0 : index
    %c0_67 = arith.constant 0 : index
    %213 = vector.load %arg2[%c0_66, %c0_67] : memref<128x512xbf16, #tpu.memory_space<vmem>>, vector<128x512xbf16>
    %cst_68 = arith.constant dense<0.000000e+00> : vector<8x512xf32>
    %214 = tpu.matmul %212, %213, %cst_68 {dimension_numbers = #tpu.dot_dimension_numbers<[1], [0], [0], [1], [0, 0, 1, 1], [], []>} : vector<8x128xbf16>, vector<128x512xbf16>, vector<8x512xf32> -> vector<8x512xf32>
    %215 = arith.addf %211, %214 : vector<8x512xf32>
    %216 = vector.extract_strided_slice %215 {offsets = [0, 0], sizes = [8, 128], strides = [1, 1]} : vector<8x512xf32> to vector<8x128xf32>
    %217 = arith.negf %216 : vector<8x128xf32>
    %218 = math.exp %217 : vector<8x128xf32>
    %cst_69 = arith.constant 1.000000e+00 : f32
    %219 = vector.broadcast %cst_69 : f32 to vector<8x128xf32>
    %220 = arith.addf %219, %218 : vector<8x128xf32>
    %221 = arith.divf %219, %220 : vector<8x128xf32>
    %222 = vector.extract_strided_slice %215 {offsets = [0, 128], sizes = [8, 128], strides = [1, 1]} : vector<8x512xf32> to vector<8x128xf32>
    %223 = arith.negf %222 : vector<8x128xf32>
    %224 = math.exp %223 : vector<8x128xf32>
    %cst_70 = arith.constant 1.000000e+00 : f32
    %225 = vector.broadcast %cst_70 : f32 to vector<8x128xf32>
    %226 = arith.addf %225, %224 : vector<8x128xf32>
    %227 = arith.divf %225, %226 : vector<8x128xf32>
    %228 = vector.extract_strided_slice %215 {offsets = [0, 256], sizes = [8, 128], strides = [1, 1]} : vector<8x512xf32> to vector<8x128xf32>
    %229 = math.tanh %228 : vector<8x128xf32>
    %230 = vector.extract_strided_slice %215 {offsets = [0, 384], sizes = [8, 128], strides = [1, 1]} : vector<8x512xf32> to vector<8x128xf32>
    %231 = arith.negf %230 : vector<8x128xf32>
    %232 = math.exp %231 : vector<8x128xf32>
    %cst_71 = arith.constant 1.000000e+00 : f32
    %233 = vector.broadcast %cst_71 : f32 to vector<8x128xf32>
    %234 = arith.addf %233, %232 : vector<8x128xf32>
    %235 = arith.divf %233, %234 : vector<8x128xf32>
    %236 = arith.mulf %227, %173 : vector<8x128xf32>
    %237 = arith.mulf %221, %229 : vector<8x128xf32>
    %238 = arith.addf %236, %237 : vector<8x128xf32>
    %239 = math.tanh %238 : vector<8x128xf32>
    %240 = arith.mulf %235, %239 : vector<8x128xf32>
    %241 = arith.truncf %240 : vector<8x128xf32> to vector<8x128xbf16>
    %c0_72 = arith.constant 0 : index
    %c0_73 = arith.constant 0 : index
    %242 = vector.load %arg3[%c0_72, %c0_73] : memref<128x512xbf16, #tpu.memory_space<vmem>>, vector<128x512xbf16>
    %cst_74 = arith.constant dense<0.000000e+00> : vector<8x512xf32>
    %243 = tpu.matmul %241, %242, %cst_74 {dimension_numbers = #tpu.dot_dimension_numbers<[1], [0], [0], [1], [0, 0, 1, 1], [], []>} : vector<8x128xbf16>, vector<128x512xbf16>, vector<8x512xf32> -> vector<8x512xf32>
    %244 = arith.addf %208, %243 : vector<8x512xf32>
    %245 = vector.extract_strided_slice %244 {offsets = [0, 0], sizes = [8, 128], strides = [1, 1]} : vector<8x512xf32> to vector<8x128xf32>
    %246 = arith.negf %245 : vector<8x128xf32>
    %247 = math.exp %246 : vector<8x128xf32>
    %cst_75 = arith.constant 1.000000e+00 : f32
    %248 = vector.broadcast %cst_75 : f32 to vector<8x128xf32>
    %249 = arith.addf %248, %247 : vector<8x128xf32>
    %250 = arith.divf %248, %249 : vector<8x128xf32>
    %251 = vector.extract_strided_slice %244 {offsets = [0, 128], sizes = [8, 128], strides = [1, 1]} : vector<8x512xf32> to vector<8x128xf32>
    %252 = arith.negf %251 : vector<8x128xf32>
    %253 = math.exp %252 : vector<8x128xf32>
    %cst_76 = arith.constant 1.000000e+00 : f32
    %254 = vector.broadcast %cst_76 : f32 to vector<8x128xf32>
    %255 = arith.addf %254, %253 : vector<8x128xf32>
    %256 = arith.divf %254, %255 : vector<8x128xf32>
    %257 = vector.extract_strided_slice %244 {offsets = [0, 256], sizes = [8, 128], strides = [1, 1]} : vector<8x512xf32> to vector<8x128xf32>
    %258 = math.tanh %257 : vector<8x128xf32>
    %259 = vector.extract_strided_slice %244 {offsets = [0, 384], sizes = [8, 128], strides = [1, 1]} : vector<8x512xf32> to vector<8x128xf32>
    %260 = arith.negf %259 : vector<8x128xf32>
    %261 = math.exp %260 : vector<8x128xf32>
    %cst_77 = arith.constant 1.000000e+00 : f32
    %262 = vector.broadcast %cst_77 : f32 to vector<8x128xf32>
    %263 = arith.addf %262, %261 : vector<8x128xf32>
    %264 = arith.divf %262, %263 : vector<8x128xf32>
    %265 = arith.mulf %256, %202 : vector<8x128xf32>
    %266 = arith.mulf %250, %258 : vector<8x128xf32>
    %267 = arith.addf %265, %266 : vector<8x128xf32>
    %268 = math.tanh %267 : vector<8x128xf32>
    %269 = arith.mulf %264, %268 : vector<8x128xf32>
    %c4_i32 = arith.constant 4 : i32
    %270 = arith.truncf %269 : vector<8x128xf32> to vector<8x128xbf16>
    %c0_78 = arith.constant 0 : index
    %c0_79 = arith.constant 0 : index
    %271 = vector.load %arg4[%c0_78, %c0_79] : memref<128x512xbf16, #tpu.memory_space<vmem>>, vector<128x512xbf16>
    %cst_80 = arith.constant dense<0.000000e+00> : vector<8x512xf32>
    %272 = tpu.matmul %270, %271, %cst_80 {dimension_numbers = #tpu.dot_dimension_numbers<[1], [0], [0], [1], [0, 0, 1, 1], [], []>} : vector<8x128xbf16>, vector<128x512xbf16>, vector<8x512xf32> -> vector<8x512xf32>
    %273 = arith.addf %272, %5 : vector<8x512xf32>
    %274 = arith.index_cast %c4_i32 : i32 to index
    %c0_81 = arith.constant 0 : index
    %c0_82 = arith.constant 0 : index
    %275 = vector.load %arg1[%274, %c0_81, %c0_82] : memref<8x8x512xf32, #tpu.memory_space<vmem>>, vector<1x8x512xf32>
    %276 = vector.shape_cast %275 : vector<1x8x512xf32> to vector<8x512xf32>
    %277 = arith.truncf %240 : vector<8x128xf32> to vector<8x128xbf16>
    %c0_83 = arith.constant 0 : index
    %c0_84 = arith.constant 0 : index
    %278 = vector.load %arg2[%c0_83, %c0_84] : memref<128x512xbf16, #tpu.memory_space<vmem>>, vector<128x512xbf16>
    %cst_85 = arith.constant dense<0.000000e+00> : vector<8x512xf32>
    %279 = tpu.matmul %277, %278, %cst_85 {dimension_numbers = #tpu.dot_dimension_numbers<[1], [0], [0], [1], [0, 0, 1, 1], [], []>} : vector<8x128xbf16>, vector<128x512xbf16>, vector<8x512xf32> -> vector<8x512xf32>
    %280 = arith.addf %276, %279 : vector<8x512xf32>
    %281 = vector.extract_strided_slice %280 {offsets = [0, 0], sizes = [8, 128], strides = [1, 1]} : vector<8x512xf32> to vector<8x128xf32>
    %282 = arith.negf %281 : vector<8x128xf32>
    %283 = math.exp %282 : vector<8x128xf32>
    %cst_86 = arith.constant 1.000000e+00 : f32
    %284 = vector.broadcast %cst_86 : f32 to vector<8x128xf32>
    %285 = arith.addf %284, %283 : vector<8x128xf32>
    %286 = arith.divf %284, %285 : vector<8x128xf32>
    %287 = vector.extract_strided_slice %280 {offsets = [0, 128], sizes = [8, 128], strides = [1, 1]} : vector<8x512xf32> to vector<8x128xf32>
    %288 = arith.negf %287 : vector<8x128xf32>
    %289 = math.exp %288 : vector<8x128xf32>
    %cst_87 = arith.constant 1.000000e+00 : f32
    %290 = vector.broadcast %cst_87 : f32 to vector<8x128xf32>
    %291 = arith.addf %290, %289 : vector<8x128xf32>
    %292 = arith.divf %290, %291 : vector<8x128xf32>
    %293 = vector.extract_strided_slice %280 {offsets = [0, 256], sizes = [8, 128], strides = [1, 1]} : vector<8x512xf32> to vector<8x128xf32>
    %294 = math.tanh %293 : vector<8x128xf32>
    %295 = vector.extract_strided_slice %280 {offsets = [0, 384], sizes = [8, 128], strides = [1, 1]} : vector<8x512xf32> to vector<8x128xf32>
    %296 = arith.negf %295 : vector<8x128xf32>
    %297 = math.exp %296 : vector<8x128xf32>
    %cst_88 = arith.constant 1.000000e+00 : f32
    %298 = vector.broadcast %cst_88 : f32 to vector<8x128xf32>
    %299 = arith.addf %298, %297 : vector<8x128xf32>
    %300 = arith.divf %298, %299 : vector<8x128xf32>
    %301 = arith.mulf %292, %238 : vector<8x128xf32>
    %302 = arith.mulf %286, %294 : vector<8x128xf32>
    %303 = arith.addf %301, %302 : vector<8x128xf32>
    %304 = math.tanh %303 : vector<8x128xf32>
    %305 = arith.mulf %300, %304 : vector<8x128xf32>
    %306 = arith.truncf %305 : vector<8x128xf32> to vector<8x128xbf16>
    %c0_89 = arith.constant 0 : index
    %c0_90 = arith.constant 0 : index
    %307 = vector.load %arg3[%c0_89, %c0_90] : memref<128x512xbf16, #tpu.memory_space<vmem>>, vector<128x512xbf16>
    %cst_91 = arith.constant dense<0.000000e+00> : vector<8x512xf32>
    %308 = tpu.matmul %306, %307, %cst_91 {dimension_numbers = #tpu.dot_dimension_numbers<[1], [0], [0], [1], [0, 0, 1, 1], [], []>} : vector<8x128xbf16>, vector<128x512xbf16>, vector<8x512xf32> -> vector<8x512xf32>
    %309 = arith.addf %273, %308 : vector<8x512xf32>
    %310 = vector.extract_strided_slice %309 {offsets = [0, 0], sizes = [8, 128], strides = [1, 1]} : vector<8x512xf32> to vector<8x128xf32>
    %311 = arith.negf %310 : vector<8x128xf32>
    %312 = math.exp %311 : vector<8x128xf32>
    %cst_92 = arith.constant 1.000000e+00 : f32
    %313 = vector.broadcast %cst_92 : f32 to vector<8x128xf32>
    %314 = arith.addf %313, %312 : vector<8x128xf32>
    %315 = arith.divf %313, %314 : vector<8x128xf32>
    %316 = vector.extract_strided_slice %309 {offsets = [0, 128], sizes = [8, 128], strides = [1, 1]} : vector<8x512xf32> to vector<8x128xf32>
    %317 = arith.negf %316 : vector<8x128xf32>
    %318 = math.exp %317 : vector<8x128xf32>
    %cst_93 = arith.constant 1.000000e+00 : f32
    %319 = vector.broadcast %cst_93 : f32 to vector<8x128xf32>
    %320 = arith.addf %319, %318 : vector<8x128xf32>
    %321 = arith.divf %319, %320 : vector<8x128xf32>
    %322 = vector.extract_strided_slice %309 {offsets = [0, 256], sizes = [8, 128], strides = [1, 1]} : vector<8x512xf32> to vector<8x128xf32>
    %323 = math.tanh %322 : vector<8x128xf32>
    %324 = vector.extract_strided_slice %309 {offsets = [0, 384], sizes = [8, 128], strides = [1, 1]} : vector<8x512xf32> to vector<8x128xf32>
    %325 = arith.negf %324 : vector<8x128xf32>
    %326 = math.exp %325 : vector<8x128xf32>
    %cst_94 = arith.constant 1.000000e+00 : f32
    %327 = vector.broadcast %cst_94 : f32 to vector<8x128xf32>
    %328 = arith.addf %327, %326 : vector<8x128xf32>
    %329 = arith.divf %327, %328 : vector<8x128xf32>
    %330 = arith.mulf %321, %267 : vector<8x128xf32>
    %331 = arith.mulf %315, %323 : vector<8x128xf32>
    %332 = arith.addf %330, %331 : vector<8x128xf32>
    %333 = math.tanh %332 : vector<8x128xf32>
    %334 = arith.mulf %329, %333 : vector<8x128xf32>
    %c5_i32 = arith.constant 5 : i32
    %335 = arith.truncf %334 : vector<8x128xf32> to vector<8x128xbf16>
    %c0_95 = arith.constant 0 : index
    %c0_96 = arith.constant 0 : index
    %336 = vector.load %arg4[%c0_95, %c0_96] : memref<128x512xbf16, #tpu.memory_space<vmem>>, vector<128x512xbf16>
    %cst_97 = arith.constant dense<0.000000e+00> : vector<8x512xf32>
    %337 = tpu.matmul %335, %336, %cst_97 {dimension_numbers = #tpu.dot_dimension_numbers<[1], [0], [0], [1], [0, 0, 1, 1], [], []>} : vector<8x128xbf16>, vector<128x512xbf16>, vector<8x512xf32> -> vector<8x512xf32>
    %338 = arith.addf %337, %5 : vector<8x512xf32>
    %339 = arith.index_cast %c5_i32 : i32 to index
    %c0_98 = arith.constant 0 : index
    %c0_99 = arith.constant 0 : index
    %340 = vector.load %arg1[%339, %c0_98, %c0_99] : memref<8x8x512xf32, #tpu.memory_space<vmem>>, vector<1x8x512xf32>
    %341 = vector.shape_cast %340 : vector<1x8x512xf32> to vector<8x512xf32>
    %342 = arith.truncf %305 : vector<8x128xf32> to vector<8x128xbf16>
    %c0_100 = arith.constant 0 : index
    %c0_101 = arith.constant 0 : index
    %343 = vector.load %arg2[%c0_100, %c0_101] : memref<128x512xbf16, #tpu.memory_space<vmem>>, vector<128x512xbf16>
    %cst_102 = arith.constant dense<0.000000e+00> : vector<8x512xf32>
    %344 = tpu.matmul %342, %343, %cst_102 {dimension_numbers = #tpu.dot_dimension_numbers<[1], [0], [0], [1], [0, 0, 1, 1], [], []>} : vector<8x128xbf16>, vector<128x512xbf16>, vector<8x512xf32> -> vector<8x512xf32>
    %345 = arith.addf %341, %344 : vector<8x512xf32>
    %346 = vector.extract_strided_slice %345 {offsets = [0, 0], sizes = [8, 128], strides = [1, 1]} : vector<8x512xf32> to vector<8x128xf32>
    %347 = arith.negf %346 : vector<8x128xf32>
    %348 = math.exp %347 : vector<8x128xf32>
    %cst_103 = arith.constant 1.000000e+00 : f32
    %349 = vector.broadcast %cst_103 : f32 to vector<8x128xf32>
    %350 = arith.addf %349, %348 : vector<8x128xf32>
    %351 = arith.divf %349, %350 : vector<8x128xf32>
    %352 = vector.extract_strided_slice %345 {offsets = [0, 128], sizes = [8, 128], strides = [1, 1]} : vector<8x512xf32> to vector<8x128xf32>
    %353 = arith.negf %352 : vector<8x128xf32>
    %354 = math.exp %353 : vector<8x128xf32>
    %cst_104 = arith.constant 1.000000e+00 : f32
    %355 = vector.broadcast %cst_104 : f32 to vector<8x128xf32>
    %356 = arith.addf %355, %354 : vector<8x128xf32>
    %357 = arith.divf %355, %356 : vector<8x128xf32>
    %358 = vector.extract_strided_slice %345 {offsets = [0, 256], sizes = [8, 128], strides = [1, 1]} : vector<8x512xf32> to vector<8x128xf32>
    %359 = math.tanh %358 : vector<8x128xf32>
    %360 = vector.extract_strided_slice %345 {offsets = [0, 384], sizes = [8, 128], strides = [1, 1]} : vector<8x512xf32> to vector<8x128xf32>
    %361 = arith.negf %360 : vector<8x128xf32>
    %362 = math.exp %361 : vector<8x128xf32>
    %cst_105 = arith.constant 1.000000e+00 : f32
    %363 = vector.broadcast %cst_105 : f32 to vector<8x128xf32>
    %364 = arith.addf %363, %362 : vector<8x128xf32>
    %365 = arith.divf %363, %364 : vector<8x128xf32>
    %366 = arith.mulf %357, %303 : vector<8x128xf32>
    %367 = arith.mulf %351, %359 : vector<8x128xf32>
    %368 = arith.addf %366, %367 : vector<8x128xf32>
    %369 = math.tanh %368 : vector<8x128xf32>
    %370 = arith.mulf %365, %369 : vector<8x128xf32>
    %371 = arith.truncf %370 : vector<8x128xf32> to vector<8x128xbf16>
    %c0_106 = arith.constant 0 : index
    %c0_107 = arith.constant 0 : index
    %372 = vector.load %arg3[%c0_106, %c0_107] : memref<128x512xbf16, #tpu.memory_space<vmem>>, vector<128x512xbf16>
    %cst_108 = arith.constant dense<0.000000e+00> : vector<8x512xf32>
    %373 = tpu.matmul %371, %372, %cst_108 {dimension_numbers = #tpu.dot_dimension_numbers<[1], [0], [0], [1], [0, 0, 1, 1], [], []>} : vector<8x128xbf16>, vector<128x512xbf16>, vector<8x512xf32> -> vector<8x512xf32>
    %374 = arith.addf %338, %373 : vector<8x512xf32>
    %375 = vector.extract_strided_slice %374 {offsets = [0, 0], sizes = [8, 128], strides = [1, 1]} : vector<8x512xf32> to vector<8x128xf32>
    %376 = arith.negf %375 : vector<8x128xf32>
    %377 = math.exp %376 : vector<8x128xf32>
    %cst_109 = arith.constant 1.000000e+00 : f32
    %378 = vector.broadcast %cst_109 : f32 to vector<8x128xf32>
    %379 = arith.addf %378, %377 : vector<8x128xf32>
    %380 = arith.divf %378, %379 : vector<8x128xf32>
    %381 = vector.extract_strided_slice %374 {offsets = [0, 128], sizes = [8, 128], strides = [1, 1]} : vector<8x512xf32> to vector<8x128xf32>
    %382 = arith.negf %381 : vector<8x128xf32>
    %383 = math.exp %382 : vector<8x128xf32>
    %cst_110 = arith.constant 1.000000e+00 : f32
    %384 = vector.broadcast %cst_110 : f32 to vector<8x128xf32>
    %385 = arith.addf %384, %383 : vector<8x128xf32>
    %386 = arith.divf %384, %385 : vector<8x128xf32>
    %387 = vector.extract_strided_slice %374 {offsets = [0, 256], sizes = [8, 128], strides = [1, 1]} : vector<8x512xf32> to vector<8x128xf32>
    %388 = math.tanh %387 : vector<8x128xf32>
    %389 = vector.extract_strided_slice %374 {offsets = [0, 384], sizes = [8, 128], strides = [1, 1]} : vector<8x512xf32> to vector<8x128xf32>
    %390 = arith.negf %389 : vector<8x128xf32>
    %391 = math.exp %390 : vector<8x128xf32>
    %cst_111 = arith.constant 1.000000e+00 : f32
    %392 = vector.broadcast %cst_111 : f32 to vector<8x128xf32>
    %393 = arith.addf %392, %391 : vector<8x128xf32>
    %394 = arith.divf %392, %393 : vector<8x128xf32>
    %395 = arith.mulf %386, %332 : vector<8x128xf32>
    %396 = arith.mulf %380, %388 : vector<8x128xf32>
    %397 = arith.addf %395, %396 : vector<8x128xf32>
    %398 = math.tanh %397 : vector<8x128xf32>
    %399 = arith.mulf %394, %398 : vector<8x128xf32>
    %c6_i32 = arith.constant 6 : i32
    %400 = arith.truncf %399 : vector<8x128xf32> to vector<8x128xbf16>
    %c0_112 = arith.constant 0 : index
    %c0_113 = arith.constant 0 : index
    %401 = vector.load %arg4[%c0_112, %c0_113] : memref<128x512xbf16, #tpu.memory_space<vmem>>, vector<128x512xbf16>
    %cst_114 = arith.constant dense<0.000000e+00> : vector<8x512xf32>
    %402 = tpu.matmul %400, %401, %cst_114 {dimension_numbers = #tpu.dot_dimension_numbers<[1], [0], [0], [1], [0, 0, 1, 1], [], []>} : vector<8x128xbf16>, vector<128x512xbf16>, vector<8x512xf32> -> vector<8x512xf32>
    %403 = arith.addf %402, %5 : vector<8x512xf32>
    %404 = arith.index_cast %c6_i32 : i32 to index
    %c0_115 = arith.constant 0 : index
    %c0_116 = arith.constant 0 : index
    %405 = vector.load %arg1[%404, %c0_115, %c0_116] : memref<8x8x512xf32, #tpu.memory_space<vmem>>, vector<1x8x512xf32>
    %406 = vector.shape_cast %405 : vector<1x8x512xf32> to vector<8x512xf32>
    %407 = arith.truncf %370 : vector<8x128xf32> to vector<8x128xbf16>
    %c0_117 = arith.constant 0 : index
    %c0_118 = arith.constant 0 : index
    %408 = vector.load %arg2[%c0_117, %c0_118] : memref<128x512xbf16, #tpu.memory_space<vmem>>, vector<128x512xbf16>
    %cst_119 = arith.constant dense<0.000000e+00> : vector<8x512xf32>
    %409 = tpu.matmul %407, %408, %cst_119 {dimension_numbers = #tpu.dot_dimension_numbers<[1], [0], [0], [1], [0, 0, 1, 1], [], []>} : vector<8x128xbf16>, vector<128x512xbf16>, vector<8x512xf32> -> vector<8x512xf32>
    %410 = arith.addf %406, %409 : vector<8x512xf32>
    %411 = vector.extract_strided_slice %410 {offsets = [0, 0], sizes = [8, 128], strides = [1, 1]} : vector<8x512xf32> to vector<8x128xf32>
    %412 = arith.negf %411 : vector<8x128xf32>
    %413 = math.exp %412 : vector<8x128xf32>
    %cst_120 = arith.constant 1.000000e+00 : f32
    %414 = vector.broadcast %cst_120 : f32 to vector<8x128xf32>
    %415 = arith.addf %414, %413 : vector<8x128xf32>
    %416 = arith.divf %414, %415 : vector<8x128xf32>
    %417 = vector.extract_strided_slice %410 {offsets = [0, 128], sizes = [8, 128], strides = [1, 1]} : vector<8x512xf32> to vector<8x128xf32>
    %418 = arith.negf %417 : vector<8x128xf32>
    %419 = math.exp %418 : vector<8x128xf32>
    %cst_121 = arith.constant 1.000000e+00 : f32
    %420 = vector.broadcast %cst_121 : f32 to vector<8x128xf32>
    %421 = arith.addf %420, %419 : vector<8x128xf32>
    %422 = arith.divf %420, %421 : vector<8x128xf32>
    %423 = vector.extract_strided_slice %410 {offsets = [0, 256], sizes = [8, 128], strides = [1, 1]} : vector<8x512xf32> to vector<8x128xf32>
    %424 = math.tanh %423 : vector<8x128xf32>
    %425 = vector.extract_strided_slice %410 {offsets = [0, 384], sizes = [8, 128], strides = [1, 1]} : vector<8x512xf32> to vector<8x128xf32>
    %426 = arith.negf %425 : vector<8x128xf32>
    %427 = math.exp %426 : vector<8x128xf32>
    %cst_122 = arith.constant 1.000000e+00 : f32
    %428 = vector.broadcast %cst_122 : f32 to vector<8x128xf32>
    %429 = arith.addf %428, %427 : vector<8x128xf32>
    %430 = arith.divf %428, %429 : vector<8x128xf32>
    %431 = arith.mulf %422, %368 : vector<8x128xf32>
    %432 = arith.mulf %416, %424 : vector<8x128xf32>
    %433 = arith.addf %431, %432 : vector<8x128xf32>
    %434 = math.tanh %433 : vector<8x128xf32>
    %435 = arith.mulf %430, %434 : vector<8x128xf32>
    %436 = arith.truncf %435 : vector<8x128xf32> to vector<8x128xbf16>
    %c0_123 = arith.constant 0 : index
    %c0_124 = arith.constant 0 : index
    %437 = vector.load %arg3[%c0_123, %c0_124] : memref<128x512xbf16, #tpu.memory_space<vmem>>, vector<128x512xbf16>
    %cst_125 = arith.constant dense<0.000000e+00> : vector<8x512xf32>
    %438 = tpu.matmul %436, %437, %cst_125 {dimension_numbers = #tpu.dot_dimension_numbers<[1], [0], [0], [1], [0, 0, 1, 1], [], []>} : vector<8x128xbf16>, vector<128x512xbf16>, vector<8x512xf32> -> vector<8x512xf32>
    %439 = arith.addf %403, %438 : vector<8x512xf32>
    %440 = vector.extract_strided_slice %439 {offsets = [0, 0], sizes = [8, 128], strides = [1, 1]} : vector<8x512xf32> to vector<8x128xf32>
    %441 = arith.negf %440 : vector<8x128xf32>
    %442 = math.exp %441 : vector<8x128xf32>
    %cst_126 = arith.constant 1.000000e+00 : f32
    %443 = vector.broadcast %cst_126 : f32 to vector<8x128xf32>
    %444 = arith.addf %443, %442 : vector<8x128xf32>
    %445 = arith.divf %443, %444 : vector<8x128xf32>
    %446 = vector.extract_strided_slice %439 {offsets = [0, 128], sizes = [8, 128], strides = [1, 1]} : vector<8x512xf32> to vector<8x128xf32>
    %447 = arith.negf %446 : vector<8x128xf32>
    %448 = math.exp %447 : vector<8x128xf32>
    %cst_127 = arith.constant 1.000000e+00 : f32
    %449 = vector.broadcast %cst_127 : f32 to vector<8x128xf32>
    %450 = arith.addf %449, %448 : vector<8x128xf32>
    %451 = arith.divf %449, %450 : vector<8x128xf32>
    %452 = vector.extract_strided_slice %439 {offsets = [0, 256], sizes = [8, 128], strides = [1, 1]} : vector<8x512xf32> to vector<8x128xf32>
    %453 = math.tanh %452 : vector<8x128xf32>
    %454 = vector.extract_strided_slice %439 {offsets = [0, 384], sizes = [8, 128], strides = [1, 1]} : vector<8x512xf32> to vector<8x128xf32>
    %455 = arith.negf %454 : vector<8x128xf32>
    %456 = math.exp %455 : vector<8x128xf32>
    %cst_128 = arith.constant 1.000000e+00 : f32
    %457 = vector.broadcast %cst_128 : f32 to vector<8x128xf32>
    %458 = arith.addf %457, %456 : vector<8x128xf32>
    %459 = arith.divf %457, %458 : vector<8x128xf32>
    %460 = arith.mulf %451, %397 : vector<8x128xf32>
    %461 = arith.mulf %445, %453 : vector<8x128xf32>
    %462 = arith.addf %460, %461 : vector<8x128xf32>
    %463 = math.tanh %462 : vector<8x128xf32>
    %464 = arith.mulf %459, %463 : vector<8x128xf32>
    %c7_i32 = arith.constant 7 : i32
    %465 = arith.truncf %464 : vector<8x128xf32> to vector<8x128xbf16>
    %c0_129 = arith.constant 0 : index
    %c0_130 = arith.constant 0 : index
    %466 = vector.load %arg4[%c0_129, %c0_130] : memref<128x512xbf16, #tpu.memory_space<vmem>>, vector<128x512xbf16>
    %cst_131 = arith.constant dense<0.000000e+00> : vector<8x512xf32>
    %467 = tpu.matmul %465, %466, %cst_131 {dimension_numbers = #tpu.dot_dimension_numbers<[1], [0], [0], [1], [0, 0, 1, 1], [], []>} : vector<8x128xbf16>, vector<128x512xbf16>, vector<8x512xf32> -> vector<8x512xf32>
    %468 = arith.addf %467, %5 : vector<8x512xf32>
    %469 = arith.index_cast %c7_i32 : i32 to index
    %c0_132 = arith.constant 0 : index
    %c0_133 = arith.constant 0 : index
    %470 = vector.load %arg1[%469, %c0_132, %c0_133] : memref<8x8x512xf32, #tpu.memory_space<vmem>>, vector<1x8x512xf32>
    %471 = vector.shape_cast %470 : vector<1x8x512xf32> to vector<8x512xf32>
    %472 = arith.truncf %435 : vector<8x128xf32> to vector<8x128xbf16>
    %c0_134 = arith.constant 0 : index
    %c0_135 = arith.constant 0 : index
    %473 = vector.load %arg2[%c0_134, %c0_135] : memref<128x512xbf16, #tpu.memory_space<vmem>>, vector<128x512xbf16>
    %cst_136 = arith.constant dense<0.000000e+00> : vector<8x512xf32>
    %474 = tpu.matmul %472, %473, %cst_136 {dimension_numbers = #tpu.dot_dimension_numbers<[1], [0], [0], [1], [0, 0, 1, 1], [], []>} : vector<8x128xbf16>, vector<128x512xbf16>, vector<8x512xf32> -> vector<8x512xf32>
    %475 = arith.addf %471, %474 : vector<8x512xf32>
    %476 = vector.extract_strided_slice %475 {offsets = [0, 0], sizes = [8, 128], strides = [1, 1]} : vector<8x512xf32> to vector<8x128xf32>
    %477 = arith.negf %476 : vector<8x128xf32>
    %478 = math.exp %477 : vector<8x128xf32>
    %cst_137 = arith.constant 1.000000e+00 : f32
    %479 = vector.broadcast %cst_137 : f32 to vector<8x128xf32>
    %480 = arith.addf %479, %478 : vector<8x128xf32>
    %481 = arith.divf %479, %480 : vector<8x128xf32>
    %482 = vector.extract_strided_slice %475 {offsets = [0, 128], sizes = [8, 128], strides = [1, 1]} : vector<8x512xf32> to vector<8x128xf32>
    %483 = arith.negf %482 : vector<8x128xf32>
    %484 = math.exp %483 : vector<8x128xf32>
    %cst_138 = arith.constant 1.000000e+00 : f32
    %485 = vector.broadcast %cst_138 : f32 to vector<8x128xf32>
    %486 = arith.addf %485, %484 : vector<8x128xf32>
    %487 = arith.divf %485, %486 : vector<8x128xf32>
    %488 = vector.extract_strided_slice %475 {offsets = [0, 256], sizes = [8, 128], strides = [1, 1]} : vector<8x512xf32> to vector<8x128xf32>
    %489 = math.tanh %488 : vector<8x128xf32>
    %490 = vector.extract_strided_slice %475 {offsets = [0, 384], sizes = [8, 128], strides = [1, 1]} : vector<8x512xf32> to vector<8x128xf32>
    %491 = arith.negf %490 : vector<8x128xf32>
    %492 = math.exp %491 : vector<8x128xf32>
    %cst_139 = arith.constant 1.000000e+00 : f32
    %493 = vector.broadcast %cst_139 : f32 to vector<8x128xf32>
    %494 = arith.addf %493, %492 : vector<8x128xf32>
    %495 = arith.divf %493, %494 : vector<8x128xf32>
    %496 = arith.mulf %487, %433 : vector<8x128xf32>
    %497 = arith.mulf %481, %489 : vector<8x128xf32>
    %498 = arith.addf %496, %497 : vector<8x128xf32>
    %499 = math.tanh %498 : vector<8x128xf32>
    %500 = arith.mulf %495, %499 : vector<8x128xf32>
    %501 = arith.truncf %500 : vector<8x128xf32> to vector<8x128xbf16>
    %c0_140 = arith.constant 0 : index
    %c0_141 = arith.constant 0 : index
    %502 = vector.load %arg3[%c0_140, %c0_141] : memref<128x512xbf16, #tpu.memory_space<vmem>>, vector<128x512xbf16>
    %cst_142 = arith.constant dense<0.000000e+00> : vector<8x512xf32>
    %503 = tpu.matmul %501, %502, %cst_142 {dimension_numbers = #tpu.dot_dimension_numbers<[1], [0], [0], [1], [0, 0, 1, 1], [], []>} : vector<8x128xbf16>, vector<128x512xbf16>, vector<8x512xf32> -> vector<8x512xf32>
    %504 = arith.addf %468, %503 : vector<8x512xf32>
    %505 = vector.extract_strided_slice %504 {offsets = [0, 0], sizes = [8, 128], strides = [1, 1]} : vector<8x512xf32> to vector<8x128xf32>
    %506 = arith.negf %505 : vector<8x128xf32>
    %507 = math.exp %506 : vector<8x128xf32>
    %cst_143 = arith.constant 1.000000e+00 : f32
    %508 = vector.broadcast %cst_143 : f32 to vector<8x128xf32>
    %509 = arith.addf %508, %507 : vector<8x128xf32>
    %510 = arith.divf %508, %509 : vector<8x128xf32>
    %511 = vector.extract_strided_slice %504 {offsets = [0, 128], sizes = [8, 128], strides = [1, 1]} : vector<8x512xf32> to vector<8x128xf32>
    %512 = arith.negf %511 : vector<8x128xf32>
    %513 = math.exp %512 : vector<8x128xf32>
    %cst_144 = arith.constant 1.000000e+00 : f32
    %514 = vector.broadcast %cst_144 : f32 to vector<8x128xf32>
    %515 = arith.addf %514, %513 : vector<8x128xf32>
    %516 = arith.divf %514, %515 : vector<8x128xf32>
    %517 = vector.extract_strided_slice %504 {offsets = [0, 256], sizes = [8, 128], strides = [1, 1]} : vector<8x512xf32> to vector<8x128xf32>
    %518 = math.tanh %517 : vector<8x128xf32>
    %519 = vector.extract_strided_slice %504 {offsets = [0, 384], sizes = [8, 128], strides = [1, 1]} : vector<8x512xf32> to vector<8x128xf32>
    %520 = arith.negf %519 : vector<8x128xf32>
    %521 = math.exp %520 : vector<8x128xf32>
    %cst_145 = arith.constant 1.000000e+00 : f32
    %522 = vector.broadcast %cst_145 : f32 to vector<8x128xf32>
    %523 = arith.addf %522, %521 : vector<8x128xf32>
    %524 = arith.divf %522, %523 : vector<8x128xf32>
    %525 = arith.mulf %516, %462 : vector<8x128xf32>
    %526 = arith.mulf %510, %518 : vector<8x128xf32>
    %527 = arith.addf %525, %526 : vector<8x128xf32>
    %528 = math.tanh %527 : vector<8x128xf32>
    %529 = arith.mulf %524, %528 : vector<8x128xf32>
    %c8_i32 = arith.constant 8 : i32
    %c0_146 = arith.constant 0 : index
    %c0_147 = arith.constant 0 : index
    %530 = vector.load %arg11[%c0_146, %c0_147] : memref<8x128xf32, #tpu.memory_space<vmem>>, vector<8x128xf32>
    tpu.vector_store %arg11[%c0_146, %c0_147], %500 {strides = array<i32>} : memref<8x128xf32, #tpu.memory_space<vmem>>, vector<8x128xf32>,
    %c0_148 = arith.constant 0 : index
    %c0_149 = arith.constant 0 : index
    %531 = vector.load %arg12[%c0_148, %c0_149] : memref<8x128xf32, #tpu.memory_space<vmem>>, vector<8x128xf32>
    tpu.vector_store %arg12[%c0_148, %c0_149], %498 {strides = array<i32>} : memref<8x128xf32, #tpu.memory_space<vmem>>, vector<8x128xf32>,
    %c0_150 = arith.constant 0 : index
    %c0_151 = arith.constant 0 : index
    %532 = vector.load %arg13[%c0_150, %c0_151] : memref<8x128xf32, #tpu.memory_space<vmem>>, vector<8x128xf32>
    tpu.vector_store %arg13[%c0_150, %c0_151], %529 {strides = array<i32>} : memref<8x128xf32, #tpu.memory_space<vmem>>, vector<8x128xf32>,
    %c0_152 = arith.constant 0 : index
    %c0_153 = arith.constant 0 : index
    %533 = vector.load %arg14[%c0_152, %c0_153] : memref<8x128xf32, #tpu.memory_space<vmem>>, vector<8x128xf32>
    tpu.vector_store %arg14[%c0_152, %c0_153], %527 {strides = array<i32>} : memref<8x128xf32, #tpu.memory_space<vmem>>, vector<8x128xf32>,
    %c0_i32_154 = arith.constant 0 : i32
    %534 = arith.cmpi eq, %arg0, %c0_i32_154 : i32
    %535 = arith.extui %534 : i1 to i32
    %c0_i32_155 = arith.constant 0 : i32
    %536 = arith.cmpi ne, %535, %c0_i32_155 : i32
    scf.if %536 {
      %c0_156 = arith.constant 0 : index
      %c0_157 = arith.constant 0 : index
      %537 = vector.load %arg13[%c0_156, %c0_157] : memref<8x128xf32, #tpu.memory_space<vmem>>, vector<8x128xf32>
      %538 = arith.truncf %537 : vector<8x128xf32> to vector<8x128xbf16>
      %c0_158 = arith.constant 0 : index
      %c0_159 = arith.constant 0 : index
      %539 = vector.load %arg6[%c0_158, %c0_159] : memref<128x128xbf16, #tpu.memory_space<vmem>>, vector<128x128xbf16>
      %cst_160 = arith.constant dense<0.000000e+00> : vector<8x128xf32>
      %540 = tpu.matmul %538, %539, %cst_160 {dimension_numbers = #tpu.dot_dimension_numbers<[1], [0], [0], [1], [0, 0, 1, 1], [], []>} : vector<8x128xbf16>, vector<128x128xbf16>, vector<8x128xf32> -> vector<8x128xf32>
      %c0_161 = arith.constant 0 : index
      %c0_162 = arith.constant 0 : index
      %541 = vector.load %arg7[%c0_161, %c0_162] : memref<1x128xf32, #tpu.memory_space<vmem>>, vector<1x128xf32>
      %542 = vector.broadcast %541 : vector<1x128xf32> to vector<8x128xf32>
      %543 = arith.addf %540, %542 : vector<8x128xf32>
      %cst_163 = arith.constant 0.000000e+00 : f32
      %544 = vector.broadcast %cst_163 : f32 to vector<8x128xf32>
      %545 = arith.maximumf %543, %544 : vector<8x128xf32>
      %c0_164 = arith.constant 0 : index
      %c0_165 = arith.constant 0 : index
      %546 = vector.load %arg8[%c0_164, %c0_165] : memref<1x128xf32, #tpu.memory_space<vmem>>, vector<1x128xf32>
      %547 = vector.broadcast %546 : vector<1x128xf32> to vector<8x128xf32>
      %548 = arith.mulf %545, %547 : vector<8x128xf32>
      %cst_166 = arith.constant dense<0.000000e+00> : vector<8xf32>
      %549 = vector.multi_reduction <add>, %548, %cst_166 [1] : vector<8x128xf32> to vector<8xf32>
      %550 = vector.shape_cast %549 : vector<8xf32> to vector<8x1xf32>
      %c0_167 = arith.constant 0 : index
      %c0_168 = arith.constant 0 : index
      %551 = vector.load %arg9[%c0_167, %c0_168] : memref<1x1xf32, #tpu.memory_space<vmem>>, vector<1x1xf32>
      %552 = vector.broadcast %551 : vector<1x1xf32> to vector<8x1xf32>
      %553 = arith.addf %550, %552 : vector<8x1xf32>
      %c0_169 = arith.constant 0 : index
      %c0_170 = arith.constant 0 : index
      %554 = vector.load %arg10[%c0_169, %c0_170] : memref<8x1xf32, #tpu.memory_space<vmem>>, vector<8x1xf32>
      tpu.vector_store %arg10[%c0_169, %c0_170], %553 {strides = array<i32>} : memref<8x1xf32, #tpu.memory_space<vmem>>, vector<8x1xf32>,
    } else {
    }
    return
  }
  func.func @transform_0(%arg0: i32) -> (i32, i32, i32) {
    %c0_i32 = arith.constant 0 : i32
    %c0_i32_0 = arith.constant 0 : i32
    %c0_i32_1 = arith.constant 0 : i32
    return %arg0, %c0_i32, %c0_i32_0 : i32, i32, i32
  }
  func.func @transform_1(%arg0: i32) -> (i32, i32) {
    %c0_i32 = arith.constant 0 : i32
    %c0_i32_0 = arith.constant 0 : i32
    %c0_i32_1 = arith.constant 0 : i32
    return %c0_i32, %c0_i32_0 : i32, i32
  }
  func.func @transform_2(%arg0: i32) -> (i32, i32) {
    %c0_i32 = arith.constant 0 : i32
    %c0_i32_0 = arith.constant 0 : i32
    %c0_i32_1 = arith.constant 0 : i32
    return %c0_i32, %c0_i32_0 : i32, i32
  }
  func.func @transform_3(%arg0: i32) -> (i32, i32) {
    %c0_i32 = arith.constant 0 : i32
    %c0_i32_0 = arith.constant 0 : i32
    %c0_i32_1 = arith.constant 0 : i32
    return %c0_i32, %c0_i32_0 : i32, i32
  }
  func.func @transform_4(%arg0: i32) -> (i32, i32) {
    %c0_i32 = arith.constant 0 : i32
    %c0_i32_0 = arith.constant 0 : i32
    %c0_i32_1 = arith.constant 0 : i32
    return %c0_i32, %c0_i32_0 : i32, i32
  }
  func.func @transform_5(%arg0: i32) -> (i32, i32) {
    %c0_i32 = arith.constant 0 : i32
    %c0_i32_0 = arith.constant 0 : i32
    %c0_i32_1 = arith.constant 0 : i32
    return %c0_i32, %c0_i32_0 : i32, i32
  }
  func.func @transform_6(%arg0: i32) -> (i32, i32) {
    %c0_i32 = arith.constant 0 : i32
    %c0_i32_0 = arith.constant 0 : i32
    %c0_i32_1 = arith.constant 0 : i32
    return %c0_i32, %c0_i32_0 : i32, i32
  }
  func.func @transform_7(%arg0: i32) -> (i32, i32) {
    %c0_i32 = arith.constant 0 : i32
    %c0_i32_0 = arith.constant 0 : i32
    %c0_i32_1 = arith.constant 0 : i32
    return %c0_i32, %c0_i32_0 : i32, i32
  }
  func.func @transform_8(%arg0: i32) -> (i32, i32) {
    %c0_i32 = arith.constant 0 : i32
    %c0_i32_0 = arith.constant 0 : i32
    %c0_i32_1 = arith.constant 0 : i32
    return %c0_i32, %c0_i32_0 : i32, i32
  }
  func.func @transform_9(%arg0: i32) -> (i32, i32) {
    %c0_i32 = arith.constant 0 : i32
    %c0_i32_0 = arith.constant 0 : i32
    %c0_i32_1 = arith.constant 0 : i32
    return %c0_i32, %c0_i32_0 : i32, i32
  }
}

</mosaic_0001>

<bundles_post_ra>
// kernel: rnn_forward.1
= control target key start
LH: loop header
LB: loop body
LE: loop exit
PB: predicated region body
PF: predicated region fallthrough
CT: control target
= control target key end

     0   :  { %v6771_v1 = vmov 0   ;;  %v6773_v37 = vmov 0.0|0.0   ;;  %vm4081_vm0 = vmmov 0   ;;  %vm3256_vm1 = vcmask 7168   ;;  %s6761_s3 = inlined_call_operand.vmem [shape: bf16[128,512], index: 3, kind: input, shape index: {}]   ;;  %s6762_s1 = inlined_call_operand.vmem [shape: bf16[128,512], index: 1, kind: input, shape index: {}]   ;;  %s6763_s2 = inlined_call_operand.vmem [shape: bf16[128,512], index: 2, kind: input, shape index: {}]   ;;  %s6764_s0 = inlined_call_operand.vmem [shape: f32[8,8,512], index: 0, kind: input, shape index: {}]   ;;  %s6765_s4 = inlined_call_operand.vmem [shape: f32[1,512], index: 4, kind: input, shape index: {}]   ;;  %s6766_s5 = inlined_call_operand.vmem [shape: bf16[128,128], index: 5, kind: input, shape index: {}]   ;;  %s6767_s8 = inlined_call_operand.<no memory space> [shape: f32[1,1], index: 8, kind: input, shape index: {}]   ;;  %s6768_s6 = inlined_call_operand.vmem [shape: f32[1,128], index: 6, kind: input, shape index: {}]   ;;  %s6769_s7 = inlined_call_operand.vmem [shape: f32[1,128], index: 7, kind: input, shape index: {}]   ;;  %s6770_s9 = inlined_call_operand.vmem [shape: f32[8,1], index: 9, kind: output, shape index: {}]  }
   0x1   :  { %v4135_v0 = vld [vmem:[%s6761_s3 + $0xe4] ss:$16 sps:$4 sm:$0xff]   ;;  %294 = vmatprep.mubr.bf16.mxu0 %v6771_v1  ;;  %335 = vmatprep.mubr.bf16.mxu1 %v6771_v1  ;;  %v4142_v2 = vld [vmem:[%s6761_s3 + $0xe0] ss:$16 sps:$4 sm:$0xff]   ;;  %v4165_v6 = vld [vmem:[%s6761_s3 + $0xec] ss:$16 sps:$4 sm:$0xff]  }
   0x2   :  { %262 = vmatprep.subr.bf16.mxu0 %v4135_v0  ;;  %v4148_v3 = vld [vmem:[%s6761_s3 + $0xc4] ss:$16 sps:$4 sm:$0xff]   ;;  %v4154_v4 = vld [vmem:[%s6761_s3 + $0xc0] ss:$16 sps:$4 sm:$0xff]   ;;  %7121 = vst [vmem:[#allocation7_spill] sm:$0xff] %v4165_v6  ;;  %303 = vmatprep.subr.bf16.mxu1 %v4165_v6 }
   0x3   :  { %263 = vmatpush1.bf16.msra.mxu0 %v4142_v2  ;;  %v4160_v5 = vld [vmem:[%s6761_s3 + $0xa4] ss:$16 sps:$4 sm:$0xff]   ;;  %v4170_v7 = vld [vmem:[%s6761_s3 + $0xe8] ss:$16 sps:$4 sm:$0xff]   ;;  %v4176_v8 = vld [vmem:[%s6761_s3 + $0xa0] ss:$16 sps:$4 sm:$0xff]  }
   0x4   :  { %264 = vmatprep.subr.bf16.mxu0 %v4148_v3  ;;  %v4183_v9 = vld [vmem:[%s6761_s3 + $0x84] ss:$16 sps:$4 sm:$0xff]   ;;  %304 = vmatpush1.bf16.msra.mxu1 %v4170_v7  ;;  %v4189_v10 = vld [vmem:[%s6761_s3 + $0xcc] ss:$16 sps:$4 sm:$0xff]   ;;  %v4194_v11 = vld [vmem:[%s6761_s3 + $0xc8] ss:$16 sps:$4 sm:$0xff]  }
   0x5   :  { %305 = vmatprep.subr.bf16.mxu1 %v4189_v10  ;;  %v4201_v12 = vld [vmem:[%s6761_s3 + $0x80] ss:$16 sps:$4 sm:$0xff]   ;;  %v4206_v13 = vld [vmem:[%s6761_s3 + $0x64] ss:$16 sps:$4 sm:$0xff]   ;;  %v4211_v14 = vld [vmem:[%s6761_s3 + $0xac] ss:$16 sps:$4 sm:$0xff]  }
   0x6   :  { %v4218_v15 = vld [vmem:[%s6761_s3 + $0xa8] ss:$16 sps:$4 sm:$0xff]   ;;  %v4224_v16 = vld [vmem:[%s6761_s3 + $0x8c] ss:$16 sps:$4 sm:$0xff]   ;;  %v4230_v17 = vld [vmem:[%s6761_s3 + $0x60] ss:$16 sps:$4 sm:$0xff]  }
   0x7   :  { %265 = vmatpush1.bf16.msra.mxu0 %v4154_v4  ;;  %v4236_v18 = vld [vmem:[%s6761_s3 + $0x44] ss:$16 sps:$4 sm:$0xff]   ;;  %v4242_v19 = vld [vmem:[%s6761_s3 + $0x88] ss:$16 sps:$4 sm:$0xff]   ;;  %v4248_v20 = vld [vmem:[%s6761_s3 + $0x6c] ss:$16 sps:$4 sm:$0xff]  }
   0x8   :  { %266 = vmatprep.subr.bf16.mxu0 %v4160_v5  ;;  %306 = vmatpush1.bf16.msra.mxu1 %v4194_v11  ;;  %v4254_v21 = vld [vmem:[%s6761_s3 + $0x40] ss:$16 sps:$4 sm:$0xff]   ;;  %v4259_v22 = vld [vmem:[%s6761_s3 + $0x24] ss:$16 sps:$4 sm:$0xff]   ;;  %v4266_v23 = vld [vmem:[%s6761_s3 + $0x68] ss:$16 sps:$4 sm:$0xff]  }
   0x9   :  { %307 = vmatprep.subr.bf16.mxu1 %v4211_v14  ;;  %v4272_v24 = vld [vmem:[%s6761_s3 + $0x4c] ss:$16 sps:$4 sm:$0xff]   ;;  %v4278_v25 = vld [vmem:[%s6761_s3 + $0x20] ss:$16 sps:$4 sm:$0xff]   ;;  %v4284_v26 = vld [vmem:[%s6761_s3 + $0x4] ss:$16 sps:$4 sm:$0xff]  }
   0xa   :  { %v4290_v27 = vld [vmem:[%s6761_s3 + $0x48] ss:$16 sps:$4 sm:$0xff]   ;;  %v4296_v28 = vld [vmem:[%s6761_s3 + $0x2c] ss:$16 sps:$4 sm:$0xff]   ;;  %v4302_v29 = vld [vmem:[%s6761_s3] ss:$16 sps:$4 sm:$0xff]  }
   0xb   :  { %267 = vmatpush1.bf16.msra.mxu0 %v4176_v8  ;;  %v4307_v30 = vld [vmem:[%s6762_s1 + $0xe4] ss:$16 sps:$4 sm:$0xff]   ;;  %v4314_v31 = vld [vmem:[%s6761_s3 + $0x28] ss:$16 sps:$4 sm:$0xff]   ;;  %v4320_v32 = vld [vmem:[%s6761_s3 + $0xc] ss:$16 sps:$4 sm:$0xff]  }
   0xc   :  { %268 = vmatprep.subr.bf16.mxu0 %v4183_v9  ;;  %308 = vmatpush1.bf16.msra.mxu1 %v4218_v15  ;;  %v4326_v33 = vld [vmem:[%s6762_s1 + $0xe0] ss:$16 sps:$4 sm:$0xff]   ;;  %v4332_v34 = vld [vmem:[%s6762_s1 + $0xc4] ss:$16 sps:$4 sm:$0xff]   ;;  %v4338_v35 = vld [vmem:[%s6761_s3 + $0x8] ss:$16 sps:$4 sm:$0xff]  }
   0xd   :  { %309 = vmatprep.subr.bf16.mxu1 %v4224_v16  ;;  %v4344_v36 = vld [vmem:[%s6762_s1 + $0xec] ss:$16 sps:$4 sm:$0xff]   ;;  %v4351_v38 = vld [vmem:[%s6762_s1 + $0xc0] ss:$16 sps:$4 sm:$0xff]   ;;  %v4356_v39 = vld [vmem:[%s6762_s1 + $0xa4] ss:$16 sps:$4 sm:$0xff]  }
   0xe   :  { %v4364_v40 = vld [vmem:[%s6762_s1 + $0xe8] ss:$16 sps:$4 sm:$0xff]   ;;  %v4370_v41 = vld [vmem:[%s6762_s1 + $0xcc] ss:$16 sps:$4 sm:$0xff]   ;;  %v4376_v42 = vld [vmem:[%s6762_s1 + $0xa0] ss:$16 sps:$4 sm:$0xff]  }
   0xf   :  { %269 = vmatpush1.bf16.msra.mxu0 %v4201_v12  ;;  %7122 = vst [vmem:[#allocation8_spill] sm:$0xff] %v4376_v42  ;;  %v4381_v43 = vld [vmem:[%s6762_s1 + $0x84] ss:$16 sps:$4 sm:$0xff]   ;;  %v4389_v44 = vld [vmem:[%s6762_s1 + $0xc8] ss:$16 sps:$4 sm:$0xff]  }
  0x10   :  { %270 = vmatprep.subr.bf16.mxu0 %v4206_v13  ;;  %310 = vmatpush1.bf16.msra.mxu1 %v4242_v19  ;;  %7123 = vst [vmem:[#allocation9_spill] sm:$0xff] %v4381_v43  ;;  %v4395_v45 = vld [vmem:[%s6762_s1 + $0xac] ss:$16 sps:$4 sm:$0xff]   ;;  %v4402_v46 = vld [vmem:[%s6762_s1 + $0x80] ss:$16 sps:$4 sm:$0xff]  }
  0x11   :  { %311 = vmatprep.subr.bf16.mxu1 %v4248_v20  ;;  %7124 = vst [vmem:[#allocation10_spill] sm:$0xff] %v4402_v46  ;;  %v4408_v47 = vld [vmem:[%s6762_s1 + $0x64] ss:$16 sps:$4 sm:$0xff]   ;;  %v4414_v48 = vld [vmem:[%s6762_s1 + $0xa8] ss:$16 sps:$4 sm:$0xff]  }
  0x12   :  { %7125 = vst [vmem:[#allocation11_spill] sm:$0xff] %v4408_v47  ;;  %7126 = vst [vmem:[#allocation12_spill] sm:$0xff] %v4414_v48  ;;  %v4420_v49 = vld [vmem:[%s6762_s1 + $0x8c] ss:$16 sps:$4 sm:$0xff]   ;;  %v4426_v50 = vld [vmem:[%s6762_s1 + $0x60] ss:$16 sps:$4 sm:$0xff]  }
  0x13   :  { %271 = vmatpush1.bf16.msra.mxu0 %v4230_v17  ;;  %7127 = vst [vmem:[#allocation13_spill] sm:$0xff] %v4420_v49  ;;  %7128 = vst [vmem:[#allocation14_spill] sm:$0xff] %v4426_v50  ;;  %v4432_v51 = vld [vmem:[%s6762_s1 + $0x44] ss:$16 sps:$4 sm:$0xff]   ;;  %v4438_v52 = vld [vmem:[%s6762_s1 + $0x88] ss:$16 sps:$4 sm:$0xff]  }
  0x14   :  { %272 = vmatprep.subr.bf16.mxu0 %v4236_v18  ;;  %312 = vmatpush1.bf16.msra.mxu1 %v4266_v23  ;;  %7129 = vst [vmem:[#allocation15_spill] sm:$0xff] %v4432_v51  ;;  %7130 = vst [vmem:[#allocation16_spill] sm:$0xff] %v4438_v52  ;;  %v4444_v53 = vld [vmem:[%s6762_s1 + $0x6c] ss:$16 sps:$4 sm:$0xff]   ;;  %v4450_v54 = vld [vmem:[%s6762_s1 + $0x40] ss:$16 sps:$4 sm:$0xff]  }
  0x15   :  { %313 = vmatprep.subr.bf16.mxu1 %v4272_v24  ;;  %7131 = vst [vmem:[#allocation17_spill] sm:$0xff] %v4444_v53  ;;  %7132 = vst [vmem:[#allocation18_spill] sm:$0xff] %v4450_v54  ;;  %v4456_v55 = vld [vmem:[%s6762_s1 + $0x24] ss:$16 sps:$4 sm:$0xff]   ;;  %v4462_v56 = vld [vmem:[%s6762_s1 + $0x68] ss:$16 sps:$4 sm:$0xff]  }
  0x16   :  { %7133 = vst [vmem:[#allocation19_spill] sm:$0xff] %v4456_v55  ;;  %7134 = vst [vmem:[#allocation20_spill] sm:$0xff] %v4462_v56  ;;  %v4468_v57 = vld [vmem:[%s6762_s1 + $0x4c] ss:$16 sps:$4 sm:$0xff]   ;;  %v4474_v58 = vld [vmem:[%s6762_s1 + $0x20] ss:$16 sps:$4 sm:$0xff]  }
  0x17   :  { %273 = vmatpush1.bf16.msra.mxu0 %v4254_v21  ;;  %7135 = vst [vmem:[#allocation21_spill] sm:$0xff] %v4468_v57  ;;  %7136 = vst [vmem:[#allocation22_spill] sm:$0xff] %v4474_v58  ;;  %v4480_v59 = vld [vmem:[%s6762_s1 + $0x4] ss:$16 sps:$4 sm:$0xff]   ;;  %v4486_v60 = vld [vmem:[%s6762_s1 + $0x48] ss:$16 sps:$4 sm:$0xff]  }
  0x18   :  { %274 = vmatprep.subr.bf16.mxu0 %v4259_v22  ;;  %314 = vmatpush1.bf16.msra.mxu1 %v4290_v27  ;;  %7137 = vst [vmem:[#allocation23_spill] sm:$0xff] %v4480_v59  ;;  %7138 = vst [vmem:[#allocation24_spill] sm:$0xff] %v4486_v60  ;;  %v4492_v61 = vld [vmem:[%s6762_s1 + $0x2c] ss:$16 sps:$4 sm:$0xff]   ;;  %v4498_v62 = vld [vmem:[%s6762_s1] ss:$16 sps:$4 sm:$0xff]  }
  0x19   :  { %315 = vmatprep.subr.bf16.mxu1 %v4296_v28  ;;  %7139 = vst [vmem:[#allocation25_spill] sm:$0xff] %v4492_v61  ;;  %7140 = vst [vmem:[#allocation26_spill] sm:$0xff] %v4498_v62  ;;  %v4505_v63 = vld [vmem:[%s6762_s1 + $0x28] ss:$16 sps:$4 sm:$0xff]  }
  0x1a   :  { %7141 = vst [vmem:[#allocation27_spill] sm:$0xff] %v4505_v63 }
  0x1b   :  { %275 = vmatpush1.bf16.msra.mxu0 %v4278_v25 }
  0x1c   :  { %276 = vmatprep.subr.bf16.mxu0 %v4284_v26  ;;  %316 = vmatpush1.bf16.msra.mxu1 %v4314_v31 }
  0x1d   :  { %317 = vmatprep.subr.bf16.mxu1 %v4320_v32 }
  0x1f   :  { %277 = vmatpush1.bf16.msra.mxu0 %v4302_v29 }
  0x20   :  { %541 = vmatprep.subr.bf16.mxu0 %v4307_v30  ;;  %318 = vmatpush1.bf16.msra.mxu1 %v4338_v35 }
  0x21   :  { %582 = vmatprep.subr.bf16.mxu1 %v4344_v36 }
  0x22   :  { %295 = vmatmul.mubr.bf16.vlgmr.msra.gmra.mxu0 %v6773_v37 }
  0x23   :  { %542 = vmatpush1.bf16.msra.mxu0 %v4326_v33  ;;  %573 = vmatprep.mubr.bf16.mxu0 %v6771_v1 }
  0x24   :  { %543 = vmatprep.subr.bf16.mxu0 %v4332_v34  ;;  %336 = vmatmul.mubr.bf16.vlgmr.msra.gmra.mxu1 %v6773_v37  ;;  %v4518_v37 = vld [vmem:[%s6762_s1 + $0x8] ss:$16 sps:$4 sm:$0xff]  }
  0x25   :  { %583 = vmatpush1.bf16.msra.mxu1 %v4364_v40  ;;  %614 = vmatprep.mubr.bf16.mxu1 %v6771_v1  ;;  %v4511_v1 = vld [vmem:[%s6762_s1 + $0xc] ss:$16 sps:$4 sm:$0xff]   ;;  %7143 = vst [vmem:[#allocation29_spill] sm:$0xff] %v4518_v37 }
  0x26   :  { %584 = vmatprep.subr.bf16.mxu1 %v4370_v41  ;;  %7142 = vst [vmem:[#allocation28_spill] sm:$0xff] %v4511_v1 }
  0x27   :  { %544 = vmatpush1.bf16.msra.mxu0 %v4351_v38 }
  0x28   :  { %545 = vmatprep.subr.bf16.mxu0 %v4356_v39 }
  0x29   :  { %585 = vmatpush1.bf16.msra.mxu1 %v4389_v44 }
  0x2a   :  { %586 = vmatprep.subr.bf16.mxu1 %v4395_v45 }
  0x2b   :  { %546 = vmatpush1.bf16.msra.mxu0 %v4376_v42 }
  0x2c   :  { %547 = vmatprep.subr.bf16.mxu0 %v4381_v43 }
  0x2d   :  { %587 = vmatpush1.bf16.msra.mxu1 %v4414_v48 }
  0x2e   :  { %588 = vmatprep.subr.bf16.mxu1 %v4420_v49 }
  0x2f   :  { %548 = vmatpush1.bf16.msra.mxu0 %v4402_v46 }
  0x30   :  { %549 = vmatprep.subr.bf16.mxu0 %v4408_v47 }
  0x31   :  { %589 = vmatpush1.bf16.msra.mxu1 %v4438_v52 }
  0x32   :  { %590 = vmatprep.subr.bf16.mxu1 %v4444_v53 }
  0x33   :  { %550 = vmatpush1.bf16.msra.mxu0 %v4426_v50 }
  0x34   :  { %551 = vmatprep.subr.bf16.mxu0 %v4432_v51 }
  0x35   :  { %591 = vmatpush1.bf16.msra.mxu1 %v4462_v56 }
  0x36   :  { %592 = vmatprep.subr.bf16.mxu1 %v4468_v57 }
  0x37   :  { %552 = vmatpush1.bf16.msra.mxu0 %v4450_v54 }
  0x38   :  { %553 = vmatprep.subr.bf16.mxu0 %v4456_v55  ;;  %v4659_v55 = vld [vmem:[%s6763_s2 + $0x40] ss:$16 sps:$4 sm:$0xff]  }
  0x39   :  { %593 = vmatpush1.bf16.msra.mxu1 %v4486_v60  ;;  %7168 = vst [vmem:[#allocation52_spill] sm:$0xff] %v4659_v55  ;;  %v4664_v60 = vld [vmem:[%s6763_s2 + $0x48] ss:$16 sps:$4 sm:$0xff]  }
  0x3a   :  { %594 = vmatprep.subr.bf16.mxu1 %v4492_v61  ;;  %v4563_v61 = vld [vmem:[%s6763_s2 + $0xc0] ss:$16 sps:$4 sm:$0xff]   ;;  %7169 = vst [vmem:[#allocation53_spill] sm:$0xff] %v4664_v60 }
  0x3b   :  { %554 = vmatpush1.bf16.msra.mxu0 %v4474_v58  ;;  %v7145_v58 = vmov 0   ;;  %7152 = vst [vmem:[#allocation36_spill] sm:$0xff] %v4563_v61 }
  0x3c   :  { %555 = vmatprep.subr.bf16.mxu0 %v4480_v59  ;;  %v7144_v59 = vmov 0.0|0.0  }
  0x3d   :  { %595 = vmatpush1.bf16.msra.mxu1 %v4505_v63  ;;  %v4534_v63 = vld [vmem:[%s6763_s2 + $0xec] ss:$16 sps:$4 sm:$0xff]  }
  0x3e   :  { %596 = vmatprep.subr.bf16.mxu1 %v4511_v1  ;;  %7147 = vst [vmem:[#allocation31_spill] sm:$0xff] %v4534_v63  ;;  %v4558_v1 = vld [vmem:[%s6763_s2 + $0xcc] ss:$16 sps:$4 sm:$0xff]  }
  0x3f   :  { %556 = vmatpush1.bf16.msra.mxu0 %v4498_v62  ;;  %v4529_v62 = vld [vmem:[%s6763_s2 + $0xe4] ss:$16 sps:$4 sm:$0xff]   ;;  %7151 = vst [vmem:[#allocation35_spill] sm:$0xff] %v4558_v1 }
  0x40   :  { %7146 = vst [vmem:[#allocation30_spill] sm:$0xff] %v4529_v62  ;;  %844 = vmatprep.subr.bf16.mxu0 %v4529_v62  ;;  %v4553_v62 = vld [vmem:[%s6763_s2 + $0xc4] ss:$16 sps:$4 sm:$0xff]  }
  0x41   :  { %597 = vmatpush1.bf16.msra.mxu1 %v4518_v37  ;;  %v4540_v37 = vld [vmem:[%s6763_s2 + $0xe0] ss:$16 sps:$4 sm:$0xff]   ;;  %7150 = vst [vmem:[#allocation34_spill] sm:$0xff] %v4553_v62 }
  0x42   :  { %574 = vmatmul.mubr.bf16.vlgmr.msra.gmra.mxu0 %v7144_v59  ;;  %7148 = vst [vmem:[#allocation32_spill] sm:$0xff] %v4540_v37  ;;  %885 = vmatprep.subr.bf16.mxu1 %v4534_v63  ;;  %v4582_v63 = vld [vmem:[%s6763_s2 + $0xac] ss:$16 sps:$4 sm:$0xff]  }
  0x43   :  { %876 = vmatprep.mubr.bf16.mxu0 %v7145_v58  ;;  %845 = vmatpush1.bf16.msra.mxu0 %v4540_v37  ;;  %v4568_v37 = vld [vmem:[%s6763_s2 + $0xc8] ss:$16 sps:$4 sm:$0xff]   ;;  %7155 = vst [vmem:[#allocation39_spill] sm:$0xff] %v4582_v63 }
  0x44   :  { %615 = vmatmul.mubr.bf16.vlgmr.msra.gmra.mxu1 %v7144_v59  ;;  %v4545_v59 = vld [vmem:[%s6763_s2 + $0xe8] ss:$16 sps:$4 sm:$0xff]   ;;  %7153 = vst [vmem:[#allocation37_spill] sm:$0xff] %v4568_v37  ;;  %846 = vmatprep.subr.bf16.mxu0 %v4553_v62  ;;  %v4587_v62 = vld [vmem:[%s6763_s2 + $0xa0] ss:$16 sps:$4 sm:$0xff]  }
  0x45   :  { %917 = vmatprep.mubr.bf16.mxu1 %v7145_v58  ;;  %7149 = vst [vmem:[#allocation33_spill] sm:$0xff] %v4545_v59  ;;  %886 = vmatpush1.bf16.msra.mxu1 %v4545_v59  ;;  %v4577_v59 = vld [vmem:[%s6763_s2 + $0xa4] ss:$16 sps:$4 sm:$0xff]   ;;  %7156 = vst [vmem:[#allocation40_spill] sm:$0xff] %v4587_v62 }
  0x46   :  { %887 = vmatprep.subr.bf16.mxu1 %v4558_v1  ;;  %7154 = vst [vmem:[#allocation38_spill] sm:$0xff] %v4577_v59  ;;  %v4606_v1 = vld [vmem:[%s6763_s2 + $0x8c] ss:$16 sps:$4 sm:$0xff]  }
  0x47   :  { %847 = vmatpush1.bf16.msra.mxu0 %v4563_v61  ;;  %v4592_v61 = vld [vmem:[%s6763_s2 + $0xa8] ss:$16 sps:$4 sm:$0xff]   ;;  %7159 = vst [vmem:[#allocation43_spill] sm:$0xff] %v4606_v1 }
  0x48   :  { %7157 = vst [vmem:[#allocation41_spill] sm:$0xff] %v4592_v61  ;;  %848 = vmatprep.subr.bf16.mxu0 %v4577_v59  ;;  %v4611_v59 = vld [vmem:[%s6763_s2 + $0x80] ss:$16 sps:$4 sm:$0xff]  }
  0x49   :  { %888 = vmatpush1.bf16.msra.mxu1 %v4568_v37  ;;  %v4601_v37 = vld [vmem:[%s6763_s2 + $0x84] ss:$16 sps:$4 sm:$0xff]   ;;  %7160 = vst [vmem:[#allocation44_spill] sm:$0xff] %v4611_v59 }
  0x4a   :  { %889 = vmatprep.subr.bf16.mxu1 %v4582_v63  ;;  %7158 = vst [vmem:[#allocation42_spill] sm:$0xff] %v4601_v37  ;;  %v4630_v63 = vld [vmem:[%s6763_s2 + $0x6c] ss:$16 sps:$4 sm:$0xff]  }
  0x4b   :  { %849 = vmatpush1.bf16.msra.mxu0 %v4587_v62  ;;  %v4616_v62 = vld [vmem:[%s6763_s2 + $0x88] ss:$16 sps:$4 sm:$0xff]   ;;  %7163 = vst [vmem:[#allocation47_spill] sm:$0xff] %v4630_v63 }
  0x4c   :  { %7161 = vst [vmem:[#allocation45_spill] sm:$0xff] %v4616_v62  ;;  %850 = vmatprep.subr.bf16.mxu0 %v4601_v37  ;;  %v4635_v37 = vld [vmem:[%s6763_s2 + $0x60] ss:$16 sps:$4 sm:$0xff]  }
  0x4d   :  { %890 = vmatpush1.bf16.msra.mxu1 %v4592_v61  ;;  %v4625_v61 = vld [vmem:[%s6763_s2 + $0x64] ss:$16 sps:$4 sm:$0xff]   ;;  %7164 = vst [vmem:[#allocation48_spill] sm:$0xff] %v4635_v37 }
  0x4e   :  { %891 = vmatprep.subr.bf16.mxu1 %v4606_v1  ;;  %7162 = vst [vmem:[#allocation46_spill] sm:$0xff] %v4625_v61  ;;  %v4650_v1 = vld [vmem:[%s6763_s2 + $0x4c] ss:$16 sps:$4 sm:$0xff]  }
  0x4f   :  { %851 = vmatpush1.bf16.msra.mxu0 %v4611_v59  ;;  %v4640_v59 = vld [vmem:[%s6763_s2 + $0x68] ss:$16 sps:$4 sm:$0xff]   ;;  %7167 = vst [vmem:[#allocation51_spill] sm:$0xff] %v4650_v1 }
  0x50   :  { %7165 = vst [vmem:[#allocation49_spill] sm:$0xff] %v4640_v59  ;;  %852 = vmatprep.subr.bf16.mxu0 %v4625_v61 }
  0x51   :  { %892 = vmatpush1.bf16.msra.mxu1 %v4616_v62  ;;  %v4645_v62 = vld [vmem:[%s6763_s2 + $0x44] ss:$16 sps:$4 sm:$0xff]  }
  0x52   :  { %7166 = vst [vmem:[#allocation50_spill] sm:$0xff] %v4645_v62  ;;  %893 = vmatprep.subr.bf16.mxu1 %v4630_v63 }
  0x53   :  { %853 = vmatpush1.bf16.msra.mxu0 %v4635_v37  ;;  %v4671_v37 = vld [vmem:[%s6763_s2 + $0x24] ss:$16 sps:$4 sm:$0xff]  }
  0x54   :  { %854 = vmatprep.subr.bf16.mxu0 %v4645_v62  ;;  %7170 = vst [vmem:[#allocation54_spill] sm:$0xff] %v4671_v37  ;;  %v4683_v62 = vld [vmem:[%s6763_s2 + $0x20] ss:$16 sps:$4 sm:$0xff]  }
  0x55   :  { %894 = vmatpush1.bf16.msra.mxu1 %v4640_v59  ;;  %v4676_v59 = vld [vmem:[%s6763_s2 + $0x2c] ss:$16 sps:$4 sm:$0xff]   ;;  %7172 = vst [vmem:[#allocation56_spill] sm:$0xff] %v4683_v62 }
  0x56   :  { %895 = vmatprep.subr.bf16.mxu1 %v4650_v1  ;;  %7171 = vst [vmem:[#allocation55_spill] sm:$0xff] %v4676_v59  ;;  %v4688_v1 = vld [vmem:[%s6763_s2 + $0x28] ss:$16 sps:$4 sm:$0xff]  }
  0x57   :  { %855 = vmatpush1.bf16.msra.mxu0 %v4659_v55  ;;  %7173 = vst [vmem:[#allocation57_spill] sm:$0xff] %v4688_v1  ;;  %v4695_v55 = vld [vmem:[%s6763_s2 + $0x4] ss:$16 sps:$4 sm:$0xff]  }
  0x58   :  { %856 = vmatprep.subr.bf16.mxu0 %v4671_v37  ;;  %7174 = vst [vmem:[#allocation58_spill] sm:$0xff] %v4695_v55  ;;  %v4707_v37 = vld [vmem:[%s6763_s2] ss:$16 sps:$4 sm:$0xff]  }
  0x59   :  { %896 = vmatpush1.bf16.msra.mxu1 %v4664_v60  ;;  %v4700_v60 = vld [vmem:[%s6763_s2 + $0xc] ss:$16 sps:$4 sm:$0xff]   ;;  %7176 = vst [vmem:[#allocation60_spill] sm:$0xff] %v4707_v37 }
  0x5a   :  { %897 = vmatprep.subr.bf16.mxu1 %v4676_v59  ;;  %7175 = vst [vmem:[#allocation59_spill] sm:$0xff] %v4700_v60  ;;  %v4712_v59 = vld [vmem:[%s6763_s2 + $0x8] ss:$16 sps:$4 sm:$0xff]  }
  0x5b   :  { %857 = vmatpush1.bf16.msra.mxu0 %v4683_v62  ;;  %7177 = vst [vmem:[#allocation61_spill] sm:$0xff] %v4712_v59 }
  0x5c   :  { %858 = vmatprep.subr.bf16.mxu0 %v4695_v55 }
  0x5d   :  { %898 = vmatpush1.bf16.msra.mxu1 %v4688_v1 }
  0x5e   :  { %899 = vmatprep.subr.bf16.mxu1 %v4700_v60 }
  0x5f   :  { %859 = vmatpush1.bf16.msra.mxu0 %v4707_v37 }
  0x60   :  { %955 = vmatprep.subr.bf16.mxu0 %v4135_v0  ;;  %v345_v0 = vld [vmem:[%s6764_s0 + $0x8] sm:$0xff] }
  0x61   :  { %900 = vmatpush1.bf16.msra.mxu1 %v4712_v59  ;;  %v344_v59 = vld [vmem:[%s6764_s0] sm:$0xff] }
  0x62   :  { %996 = vmatprep.subr.bf16.mxu1 %v4165_v6 }
  0xe2   :  { %v4720_v1 = vpop.f32.mrf.mxu0 }
  0xe4   :  { %v4722_v62 = vpop.f32.mrf.mxu0  ;;  %v4724_v61 = vpop.f32.mrf.mxu1 }
  0xe6   :  { %v300_v63 = vpop.f32.mrf.mxu0  ;;  %v4726_v57 = vpop.f32.mrf.mxu1 }
  0xe8   :  { %v301_v54 = vpop.f32.mrf.mxu0  ;;  %v341_v55 = vpop.f32.mrf.mxu1 }
  0xea   :  { %v342_v60 = vpop.f32.mrf.mxu1 }
  0xeb   :  { %v347_v60 = vld [vmem:[%s6764_s0 + $0x18] sm:$0xff] }
 0x102   :  { %v575_v37 = vpop.f32.mrf.mxu0 }
 0x103   :  { %v623_v6 = vadd.f32 %v575_v37, %v344_v59  ;;  %v346_v37 = vld [vmem:[%s6764_s0 + $0x10] sm:$0xff] }
 0x104   :  { %v577_v51 = vpop.f32.mrf.mxu0  ;;  %v616_v53 = vpop.f32.mrf.mxu1 }
 0x105   :  { %v3326_v56 = vmul.f32 -1.442695, %v623_v6  ;;  %v624_v63 = vadd.f32 %v577_v51, %v345_v0  ;;  %v625_v6 = vadd.f32 %v616_v53, %v346_v37 }
 0x106   :  { %v579_v50 = vpop.f32.mrf.mxu0  ;;  %v618_v55 = vpop.f32.mrf.mxu1 }
 0x107   :  { %3630 = vpow2.f32 %v3326_v56  ;;  %v3327_v54 = vmul.f32 -1.442695, %v624_v63  ;;  %v626_v59 = vadd.f32 %v618_v55, %v347_v60 }
 0x108   :  { %v580_v47 = vpop.f32.mrf.mxu0  ;;  %v620_v52 = vpop.f32.mrf.mxu1 }
 0x109   :  { %3632 = vpow2.f32 %v3327_v54  ;;  %v3328_v51 = vmul.f32 -1.442695, %v626_v59 }
 0x10a   :  { %v621_v46 = vpop.f32.mrf.mxu1  ;;  %3634 = vtanh.f32 %v625_v6 }
 0x10b   :  { %3636 = vpow2.f32 %v3328_v51 }
 0x114   :  { %v3631_v50 = vpop.eup %3630 }
 0x115   :  { %v630_v56 = vadd.f32 1.0, %v3631_v50 }
 0x116   :  { %v3633_v0 = vpop.eup %3632 }
 0x117   :  { %3638 = vrcp.f32 %v630_v56  ;;  %v636_v47 = vadd.f32 1.0, %v3633_v0  ;;  %v3635_v63 = vpop.eup %3634 }
 0x118   :  { %v3637_v54 = vpop.eup %3636 }
 0x119   :  { %3640 = vrcp.f32 %v636_v47  ;;  %v643_v46 = vadd.f32 1.0, %v3637_v54 }
 0x11b   :  { %3642 = vrcp.f32 %v643_v46 }
 0x124   :  { %v3639_v49 = vpop.eup %3638 }
 0x125   :  { %v647_v48 = vmul.f32 %v3639_v49, %v3635_v63 }
 0x126   :  { %v3641_v52 = vpop.eup %3640 }
 0x127   :  { %v646_v43 = vmul.f32 0.0, %v3641_v52 }
 0x128   :  { %v3643_v53 = vpop.eup %3642 }
 0x129   :  { %v4740_v42 = vadd.f32 %v647_v48, %v646_v43 }
 0x12b   :  { %3644 = vtanh.f32 %v4740_v42 }
 0x138   :  { %v3645_v55 = vpop.eup %3644 }
 0x139   :  { %v650_v60 = vmul.f32 %v3645_v55, %v3643_v53 }
 0x13b   :  { %v4743_v37 = vpack.c.bf16 %v650_v60, %v650_v60 }
 0x13d   :  { %877 = vmatmul.mubr.bf16.vlgmr.msra.gmra.mxu0 %v4743_v37  ;;  %918 = vmatmul.mubr.bf16.vlgmr.msra.gmra.mxu1 %v4743_v37 }
 0x13e   :  { %956 = vmatpush1.bf16.msra.mxu0 %v4142_v2  ;;  %997 = vmatpush1.bf16.msra.mxu1 %v4170_v7  ;;  %v45_v2 = vlaneseq }
 0x13f   :  { %957 = vmatprep.subr.bf16.mxu0 %v4148_v3  ;;  %998 = vmatprep.subr.bf16.mxu1 %v4189_v10 }
 0x140   :  { %987 = vmatprep.mubr.bf16.mxu0 %v7145_v58  ;;  %1028 = vmatprep.mubr.bf16.mxu1 %v7145_v58  ;;  %v46_v3 = vshrl.u32 %v45_v2, 7 }
 0x142   :  { %958 = vmatpush1.bf16.msra.mxu0 %v4154_v4  ;;  %999 = vmatpush1.bf16.msra.mxu1 %v4194_v11  ;;  %v47_v4 = vsub.s32 0, %v46_v3  ;;  %v51_v7 = vsub.s32 1, %v46_v3 }
 0x143   :  { %959 = vmatprep.subr.bf16.mxu0 %v4160_v5  ;;  %1000 = vmatprep.subr.bf16.mxu1 %v4211_v14  ;;  %v43_v5 = vld [vmem:[%s6765_s4] sm:$0xf] }
 0x146   :  { %960 = vmatpush1.bf16.msra.mxu0 %v4176_v8  ;;  %1001 = vmatpush1.bf16.msra.mxu1 %v4218_v15  ;;  %v4784_v8 = vrot.slane %v43_v5, %v47_v4  ;;  %v59_v15 = vsub.s32 3, %v46_v3  ;;  %v7185_v4 = vld [vmem:[#allocation16_spill] sm:$0xff] }
 0x147   :  { %961 = vmatprep.subr.bf16.mxu0 %v4183_v9  ;;  %1002 = vmatprep.subr.bf16.mxu1 %v4224_v16  ;;  %v4786_v9 = vrot.slane %v43_v5, %v51_v7  ;;  %v7188_v7 = vld [vmem:[#allocation14_spill] sm:$0xff] }
 0x148   :  { %7178 = vst [vmem:[#allocation62_spill] sm:$0xff] %v4784_v8  ;;  %v297_v10 = vadd.f32 %v4720_v1, %v4784_v8 }
 0x149   :  { %7179 = vst [vmem:[#allocation63_spill] sm:$0xff] %v4786_v9 }
 0x14a   :  { %962 = vmatpush1.bf16.msra.mxu0 %v4201_v12  ;;  %1003 = vmatpush1.bf16.msra.mxu1 %v4242_v19 }
 0x14b   :  { %963 = vmatprep.subr.bf16.mxu0 %v4206_v13  ;;  %1004 = vmatprep.subr.bf16.mxu1 %v4248_v20  ;;  %v299_v13 = vadd.f32 %v4722_v62, %v4786_v9 }
 0x14e   :  { %964 = vmatpush1.bf16.msra.mxu0 %v4230_v17  ;;  %1005 = vmatpush1.bf16.msra.mxu1 %v4266_v23 }
 0x14f   :  { %965 = vmatprep.subr.bf16.mxu0 %v4236_v18  ;;  %1006 = vmatprep.subr.bf16.mxu1 %v4272_v24  ;;  %v4792_v24 = vrot.slane %v43_v5, %v59_v15  ;;  %v7195_v15 = vld [vmem:[#allocation25_spill] sm:$0xff] }
 0x151   :  { %v340_v43 = vadd.f32 %v4726_v57, %v4792_v24 }
 0x152   :  { %966 = vmatpush1.bf16.msra.mxu0 %v4254_v21  ;;  %1007 = vmatpush1.bf16.msra.mxu1 %v4290_v27 }
 0x153   :  { %967 = vmatprep.subr.bf16.mxu0 %v4259_v22  ;;  %1008 = vmatprep.subr.bf16.mxu1 %v4296_v28  ;;  %v55_v22 = vsub.s32 2, %v46_v3  ;;  %v7180_v3 = vld [vmem:[#allocation8_spill] sm:$0xff] }
 0x156   :  { %968 = vmatpush1.bf16.msra.mxu0 %v4278_v25  ;;  %1009 = vmatpush1.bf16.msra.mxu1 %v4314_v31 }
 0x157   :  { %969 = vmatprep.subr.bf16.mxu0 %v4284_v26  ;;  %1010 = vmatprep.subr.bf16.mxu1 %v4320_v32  ;;  %v4794_v26 = vrot.slane %v43_v5, %v55_v22  ;;  %v7186_v5 = vld [vmem:[#allocation11_spill] sm:$0xff]  ;;  %v7202_v22 = vld [vmem:[#allocation30_spill] sm:$0xff] }
 0x159   :  { %v338_v49 = vadd.f32 %v4724_v61, %v4794_v26 }
 0x15a   :  { %970 = vmatpush1.bf16.msra.mxu0 %v4302_v29  ;;  %1011 = vmatpush1.bf16.msra.mxu1 %v4338_v35 }
 0x15b   :  { %1042 = vmatprep.subr.bf16.mxu0 %v4307_v30  ;;  %1083 = vmatprep.subr.bf16.mxu1 %v4344_v36 }
 0x1fd   :  { %v878_v11 = vpop.f32.mrf.mxu0  ;;  %v919_v12 = vpop.f32.mrf.mxu1 }
 0x1fe   :  { %v926_v14 = vadd.f32 %v878_v11, %v297_v10  ;;  %v928_v62 = vadd.f32 %v919_v12, %v338_v49  ;;  %v7190_v10 = vld [vmem:[#allocation15_spill] sm:$0xff]  ;;  %v7191_v11 = vld [vmem:[#allocation21_spill] sm:$0xff]  ;;  %v7192_v12 = vld [vmem:[#allocation18_spill] sm:$0xff] }
 0x1ff   :  { %v880_v16 = vpop.f32.mrf.mxu0  ;;  %v921_v17 = vpop.f32.mrf.mxu1  ;;  %v7208_v49 = vld [vmem:[#allocation36_spill] sm:$0xff] }
 0x200   :  { %v3361_v18 = vmul.f32 -1.442695, %v926_v14  ;;  %v927_v19 = vadd.f32 %v880_v16, %v299_v13  ;;  %v929_v48 = vadd.f32 %v921_v17, %v340_v43  ;;  %v7193_v13 = vld [vmem:[#allocation24_spill] sm:$0xff]  ;;  %v7194_v14 = vld [vmem:[#allocation19_spill] sm:$0xff]  ;;  %v7196_v16 = vld [vmem:[#allocation22_spill] sm:$0xff] }
 0x201   :  { %v882_v20 = vpop.f32.mrf.mxu0  ;;  %v923_v21 = vpop.f32.mrf.mxu1  ;;  %v7197_v17 = vld [vmem:[#allocation27_spill] sm:$0xff]  ;;  %v7206_v43 = vld [vmem:[#allocation34_spill] sm:$0xff] }
 0x202   :  { %3646 = vpow2.f32 %v3361_v18  ;;  %v3362_v23 = vmul.f32 -1.442695, %v927_v19  ;;  %v3363_v59 = vmul.f32 -1.442695, %v929_v48  ;;  %v7198_v18 = vld [vmem:[#allocation23_spill] sm:$0xff]  ;;  %v7199_v19 = vld [vmem:[#allocation28_spill] sm:$0xff] }
 0x203   :  { %v883_v25 = vpop.f32.mrf.mxu0  ;;  %v924_v1 = vpop.f32.mrf.mxu1  ;;  %v7200_v20 = vld [vmem:[#allocation26_spill] sm:$0xff]  ;;  %v7201_v21 = vld [vmem:[#allocation29_spill] sm:$0xff]  ;;  %v7207_v48 = vld [vmem:[#allocation35_spill] sm:$0xff] }
 0x204   :  { %3648 = vpow2.f32 %v3362_v23  ;;  %v7203_v23 = vld [vmem:[#allocation31_spill] sm:$0xff]  ;;  %v7204_v25 = vld [vmem:[#allocation32_spill] sm:$0xff]  ;;  %v7205_v1 = vld [vmem:[#allocation33_spill] sm:$0xff] }
 0x205   :  { %3650 = vtanh.f32 %v928_v62  ;;  %v7209_v62 = vld [vmem:[#allocation37_spill] sm:$0xff] }
 0x206   :  { %3652 = vpow2.f32 %v3363_v59  ;;  %v7210_v59 = vld [vmem:[#allocation38_spill] sm:$0xff] }
 0x20f   :  { %v3647_v6 = vpop.eup %3646 }
 0x210   :  { %v933_v51 = vadd.f32 1.0, %v3647_v6  ;;  %v7211_v6 = vld [vmem:[#allocation39_spill] sm:$0xff] }
 0x211   :  { %v3649_v50 = vpop.eup %3648 }
 0x212   :  { %3654 = vrcp.f32 %v933_v51  ;;  %v939_v56 = vadd.f32 1.0, %v3649_v50  ;;  %v3651_v0 = vpop.eup %3650  ;;  %v7213_v51 = vld [vmem:[#allocation41_spill] sm:$0xff]  ;;  %v7214_v50 = vld [vmem:[#allocation42_spill] sm:$0xff] }
 0x213   :  { %v3653_v47 = vpop.eup %3652 }
 0x214   :  { %3656 = vrcp.f32 %v939_v56  ;;  %v946_v57 = vadd.f32 1.0, %v3653_v47  ;;  %v7215_v56 = vld [vmem:[#allocation43_spill] sm:$0xff]  ;;  %v7217_v47 = vld [vmem:[#allocation45_spill] sm:$0xff] }
 0x216   :  { %3658 = vrcp.f32 %v946_v57  ;;  %v7221_v57 = vld [vmem:[#allocation49_spill] sm:$0xff] }
 0x21f   :  { %v3655_v63 = vpop.eup %3654 }
 0x220   :  { %v950_v54 = vmul.f32 %v3655_v63, %v3651_v0  ;;  %v7216_v0 = vld [vmem:[#allocation44_spill] sm:$0xff]  ;;  %v7218_v63 = vld [vmem:[#allocation46_spill] sm:$0xff] }
 0x221   :  { %v3657_v52 = vpop.eup %3656 }
 0x222   :  { %v949_v46 = vmul.f32 0.0, %v3657_v52  ;;  %v7220_v52 = vld [vmem:[#allocation48_spill] sm:$0xff] }
 0x223   :  { %v3659_v61 = vpop.eup %3658 }
 0x224   :  { %v4800_v53 = vadd.f32 %v950_v54, %v949_v46  ;;  %v7219_v54 = vld [vmem:[#allocation47_spill] sm:$0xff]  ;;  %v7222_v46 = vld [vmem:[#allocation50_spill] sm:$0xff] }
 0x226   :  { %3660 = vtanh.f32 %v4800_v53 }
 0x233   :  { %v3661_v55 = vpop.eup %3660 }
 0x234   :  { %v953_v60 = vmul.f32 %v3661_v55, %v3659_v61  ;;  %v7223_v61 = vld [vmem:[#allocation51_spill] sm:$0xff]  ;;  %v7224_v55 = vld [vmem:[#allocation52_spill] sm:$0xff] }
 0x236   :  { %v954_v2 = vpack.c.bf16 %v953_v60, %v953_v60  ;;  %v7225_v60 = vld [vmem:[#allocation53_spill] sm:$0xff] }
 0x238   :  { %988 = vmatmul.mubr.bf16.vlgmr.msra.gmra.mxu0 %v954_v2  ;;  %1029 = vmatmul.mubr.bf16.vlgmr.msra.gmra.mxu1 %v954_v2  ;;  %v7226_v2 = vld [vmem:[#allocation54_spill] sm:$0xff] }
 0x239   :  { %1043 = vmatpush1.bf16.msra.mxu0 %v4326_v33  ;;  %1084 = vmatpush1.bf16.msra.mxu1 %v4364_v40  ;;  %v7181_v33 = vld [vmem:[#allocation12_spill] sm:$0xff]  ;;  %v7182_v40 = vld [vmem:[#allocation9_spill] sm:$0xff] }
 0x23a   :  { %1044 = vmatprep.subr.bf16.mxu0 %v4332_v34  ;;  %1085 = vmatprep.subr.bf16.mxu1 %v4370_v41  ;;  %v7183_v34 = vld [vmem:[#allocation13_spill] sm:$0xff]  ;;  %v7184_v41 = vld [vmem:[#allocation10_spill] sm:$0xff] }
 0x23b   :  { %1074 = vmatprep.mubr.bf16.mxu0 %v7145_v58  ;;  %1115 = vmatprep.mubr.bf16.mxu1 %v7145_v58 }
 0x23d   :  { %1045 = vmatpush1.bf16.msra.mxu0 %v4351_v38  ;;  %1086 = vmatpush1.bf16.msra.mxu1 %v4389_v44  ;;  %v7187_v38 = vld [vmem:[#allocation17_spill] sm:$0xff] }
 0x23e   :  { %1046 = vmatprep.subr.bf16.mxu0 %v4356_v39  ;;  %1087 = vmatprep.subr.bf16.mxu1 %v4395_v45  ;;  %v7189_v39 = vld [vmem:[#allocation20_spill] sm:$0xff] }
 0x241   :  { %1047 = vmatpush1.bf16.msra.mxu0 %v7180_v3  ;;  %1088 = vmatpush1.bf16.msra.mxu1 %v7181_v33  ;;  %v7227_v3 = vld [vmem:[#allocation55_spill] sm:$0xff] }
 0x242   :  { %1048 = vmatprep.subr.bf16.mxu0 %v7182_v40  ;;  %1089 = vmatprep.subr.bf16.mxu1 %v7183_v34  ;;  %v7228_v40 = vld [vmem:[#allocation56_spill] sm:$0xff] }
 0x245   :  { %1049 = vmatpush1.bf16.msra.mxu0 %v7184_v41  ;;  %1090 = vmatpush1.bf16.msra.mxu1 %v7185_v4 }
 0x246   :  { %1050 = vmatprep.subr.bf16.mxu0 %v7186_v5  ;;  %1091 = vmatprep.subr.bf16.mxu1 %v7187_v38 }
 0x249   :  { %1051 = vmatpush1.bf16.msra.mxu0 %v7188_v7  ;;  %1092 = vmatpush1.bf16.msra.mxu1 %v7189_v39 }
 0x24a   :  { %1052 = vmatprep.subr.bf16.mxu0 %v7190_v10  ;;  %1093 = vmatprep.subr.bf16.mxu1 %v7191_v11 }
 0x24d   :  { %1053 = vmatpush1.bf16.msra.mxu0 %v7192_v12  ;;  %1094 = vmatpush1.bf16.msra.mxu1 %v7193_v13 }
 0x24e   :  { %1054 = vmatprep.subr.bf16.mxu0 %v7194_v14  ;;  %1095 = vmatprep.subr.bf16.mxu1 %v7195_v15 }
 0x251   :  { %1055 = vmatpush1.bf16.msra.mxu0 %v7196_v16  ;;  %1096 = vmatpush1.bf16.msra.mxu1 %v7197_v17 }
 0x252   :  { %1056 = vmatprep.subr.bf16.mxu0 %v7198_v18  ;;  %1097 = vmatprep.subr.bf16.mxu1 %v7199_v19 }
 0x255   :  { %1057 = vmatpush1.bf16.msra.mxu0 %v7200_v20  ;;  %1098 = vmatpush1.bf16.msra.mxu1 %v7201_v21 }
 0x256   :  { %1153 = vmatprep.subr.bf16.mxu0 %v7202_v22  ;;  %1194 = vmatprep.subr.bf16.mxu1 %v7203_v23 }
 0x258   :  { %1075 = vmatmul.mubr.bf16.vlgmr.msra.gmra.mxu0 %v4743_v37  ;;  %1116 = vmatmul.mubr.bf16.vlgmr.msra.gmra.mxu1 %v4743_v37  ;;  %v7212_v37 = vld [vmem:[#allocation40_spill] sm:$0xff] }
 0x259   :  { %1154 = vmatpush1.bf16.msra.mxu0 %v7204_v25  ;;  %1195 = vmatpush1.bf16.msra.mxu1 %v7205_v1 }
 0x25a   :  { %1155 = vmatprep.subr.bf16.mxu0 %v7206_v43  ;;  %1196 = vmatprep.subr.bf16.mxu1 %v7207_v48 }
 0x25b   :  { %1185 = vmatprep.mubr.bf16.mxu0 %v7145_v58  ;;  %1226 = vmatprep.mubr.bf16.mxu1 %v7145_v58 }
 0x25d   :  { %1156 = vmatpush1.bf16.msra.mxu0 %v7208_v49  ;;  %1197 = vmatpush1.bf16.msra.mxu1 %v7209_v62 }
 0x25e   :  { %1157 = vmatprep.subr.bf16.mxu0 %v7210_v59  ;;  %1198 = vmatprep.subr.bf16.mxu1 %v7211_v6  ;;  %v3367_v59 = vld [vmem:[%s6764_s0 + $0x38] sm:$0xff] }
 0x261   :  { %1158 = vmatpush1.bf16.msra.mxu0 %v7212_v37  ;;  %1199 = vmatpush1.bf16.msra.mxu1 %v7213_v51 }
 0x262   :  { %1159 = vmatprep.subr.bf16.mxu0 %v7214_v50  ;;  %1200 = vmatprep.subr.bf16.mxu1 %v7215_v56 }
 0x265   :  { %1160 = vmatpush1.bf16.msra.mxu0 %v7216_v0  ;;  %1201 = vmatpush1.bf16.msra.mxu1 %v7217_v47 }
 0x266   :  { %1161 = vmatprep.subr.bf16.mxu0 %v7218_v63  ;;  %1202 = vmatprep.subr.bf16.mxu1 %v7219_v54  ;;  %v7229_v63 = vld [vmem:[#allocation57_spill] sm:$0xff]  ;;  %v7230_v54 = vld [vmem:[#allocation58_spill] sm:$0xff] }
 0x269   :  { %1162 = vmatpush1.bf16.msra.mxu0 %v7220_v52  ;;  %1203 = vmatpush1.bf16.msra.mxu1 %v7221_v57  ;;  %v7231_v52 = vld [vmem:[#allocation59_spill] sm:$0xff]  ;;  %v7232_v57 = vld [vmem:[#allocation60_spill] sm:$0xff] }
 0x26a   :  { %1163 = vmatprep.subr.bf16.mxu0 %v7222_v46  ;;  %1204 = vmatprep.subr.bf16.mxu1 %v7223_v61  ;;  %v7233_v46 = vld [vmem:[#allocation61_spill] sm:$0xff]  ;;  %v3364_v61 = vld [vmem:[%s6764_s0 + $0x20] sm:$0xff] }
 0x26d   :  { %1164 = vmatpush1.bf16.msra.mxu0 %v7224_v55  ;;  %1205 = vmatpush1.bf16.msra.mxu1 %v7225_v60  ;;  %v4874_v60 = vld [vmem:[%s6761_s3 + $0xe4] ss:$16 sps:$4 sm:$0xff]  }
 0x26e   :  { %1165 = vmatprep.subr.bf16.mxu0 %v7226_v2  ;;  %1206 = vmatprep.subr.bf16.mxu1 %v7227_v3  ;;  %7234 = vst [vmem:[#allocation8_spill] sm:$0xff] %v4874_v60  ;;  %v7235_v3 = vld [vmem:[#allocation7_spill] sm:$0xff] }
 0x271   :  { %1166 = vmatpush1.bf16.msra.mxu0 %v7228_v40  ;;  %1207 = vmatpush1.bf16.msra.mxu1 %v7229_v63 }
 0x272   :  { %1167 = vmatprep.subr.bf16.mxu0 %v7230_v54  ;;  %1208 = vmatprep.subr.bf16.mxu1 %v7231_v52 }
 0x275   :  { %1168 = vmatpush1.bf16.msra.mxu0 %v7232_v57  ;;  %1209 = vmatpush1.bf16.msra.mxu1 %v7233_v46 }
 0x276   :  { %1264 = vmatprep.subr.bf16.mxu0 %v4874_v60  ;;  %1305 = vmatprep.subr.bf16.mxu1 %v7235_v3  ;;  %v3365_v3 = vld [vmem:[%s6764_s0 + $0x28] sm:$0xff] }
 0x2f8   :  { %v4878_v40 = vpop.f32.mrf.mxu0  ;;  %v4880_v63 = vpop.f32.mrf.mxu1 }
 0x2fa   :  { %v4882_v54 = vpop.f32.mrf.mxu0  ;;  %v4884_v52 = vpop.f32.mrf.mxu1 }
 0x2fc   :  { %v993_v57 = vpop.f32.mrf.mxu0  ;;  %v1034_v2 = vpop.f32.mrf.mxu1 }
 0x2fe   :  { %v994_v46 = vpop.f32.mrf.mxu0  ;;  %v1035_v55 = vpop.f32.mrf.mxu1 }
 0x318   :  { %v1076_v47 = vpop.f32.mrf.mxu0  ;;  %v1117_v60 = vpop.f32.mrf.mxu1 }
 0x319   :  { %v1124_v0 = vadd.f32 %v3364_v61, %v1076_v47  ;;  %v3366_v47 = vld [vmem:[%s6764_s0 + $0x30] sm:$0xff] }
 0x31a   :  { %v1078_v56 = vpop.f32.mrf.mxu0  ;;  %v1119_v50 = vpop.f32.mrf.mxu1 }
 0x31b   :  { %v3368_v51 = vmul.f32 -1.442695, %v1124_v0  ;;  %v1125_v37 = vadd.f32 %v3365_v3, %v1078_v56  ;;  %v1127_v62 = vadd.f32 %v3367_v59, %v1119_v50  ;;  %v1126_v0 = vadd.f32 %v3366_v47, %v1117_v60 }
 0x31c   :  { %v1080_v6 = vpop.f32.mrf.mxu0  ;;  %v1121_v57 = vpop.f32.mrf.mxu1 }
 0x31d   :  { %3662 = vpow2.f32 %v3368_v51  ;;  %v3369_v46 = vmul.f32 -1.442695, %v1125_v37  ;;  %v3370_v61 = vmul.f32 -1.442695, %v1127_v62 }
 0x31e   :  { %v1081_v55 = vpop.f32.mrf.mxu0  ;;  %v1122_v2 = vpop.f32.mrf.mxu1 }
 0x31f   :  { %3664 = vpow2.f32 %v3369_v46 }
 0x320   :  { %3666 = vpow2.f32 %v3370_v61  ;;  %v4909_v61 = vld [vmem:[%s6761_s3 + $0xe0] ss:$16 sps:$4 sm:$0xff]  }
 0x32a   :  { %v3663_v49 = vpop.eup %3662 }
 0x32b   :  { %v1131_v56 = vadd.f32 1.0, %v3663_v49 }
 0x32c   :  { %v3665_v6 = vpop.eup %3664 }
 0x32d   :  { %3668 = vrcp.f32 %v1131_v56  ;;  %v1137_v37 = vadd.f32 1.0, %v3665_v6  ;;  %v3667_v51 = vpop.eup %3666  ;;  %v4927_v56 = vld [vmem:[%s6761_s3 + $0xcc] ss:$16 sps:$4 sm:$0xff]   ;;  %v4935_v6 = vld [vmem:[%s6761_s3 + $0xc0] ss:$16 sps:$4 sm:$0xff]  }
 0x32e   :  { %3670 = vtanh.f32 %v1126_v0  ;;  %v1144_v55 = vadd.f32 1.0, %v3667_v51  ;;  %v4921_v0 = vld [vmem:[%s6761_s3 + $0xc4] ss:$16 sps:$4 sm:$0xff]  }
 0x32f   :  { %3672 = vrcp.f32 %v1137_v37  ;;  %v4941_v37 = vld [vmem:[%s6761_s3 + $0xc8] ss:$16 sps:$4 sm:$0xff]   ;;  %v4947_v51 = vld [vmem:[%s6761_s3 + $0xa4] ss:$16 sps:$4 sm:$0xff]  }
 0x330   :  { %3674 = vrcp.f32 %v1144_v55  ;;  %v4971_v55 = vld [vmem:[%s6761_s3 + $0x84] ss:$16 sps:$4 sm:$0xff]  }
 0x331   :  { %7237 = vst [vmem:[#allocation9_spill] sm:$0xff] %v4971_v55 }
 0x33a   :  { %v3669_v3 = vpop.eup %3668 }
 0x33b   :  { %v3671_v57 = vpop.eup %3670 }
 0x33c   :  { %v3673_v46 = vpop.eup %3672  ;;  %v1148_v59 = vmul.f32 %v3671_v57, %v3669_v3  ;;  %v4953_v3 = vld [vmem:[%s6761_s3 + $0xac] ss:$16 sps:$4 sm:$0xff]   ;;  %v4959_v57 = vld [vmem:[%s6761_s3 + $0xa0] ss:$16 sps:$4 sm:$0xff]  }
 0x33d   :  { %v1147_v50 = vmul.f32 %v3673_v46, %v4740_v42  ;;  %v3675_v49 = vpop.eup %3674  ;;  %v4915_v42 = vld [vmem:[%s6761_s3 + $0xe8] ss:$16 sps:$4 sm:$0xff]  }
 0x33e   :  { %v4965_v46 = vld [vmem:[%s6761_s3 + $0xa8] ss:$16 sps:$4 sm:$0xff]  }
 0x33f   :  { %v4899_v2 = vadd.f32 %v1148_v59, %v1147_v50  ;;  %7236 = vst [vmem:[#allocation12_spill] sm:$0xff] %v4965_v46  ;;  %v4977_v59 = vld [vmem:[%s6761_s3 + $0x8c] ss:$16 sps:$4 sm:$0xff]   ;;  %v4983_v50 = vld [vmem:[%s6761_s3 + $0x80] ss:$16 sps:$4 sm:$0xff]  }
 0x340   :  { %7238 = vst [vmem:[#allocation13_spill] sm:$0xff] %v4977_v59  ;;  %7239 = vst [vmem:[#allocation10_spill] sm:$0xff] %v4983_v50 }
 0x341   :  { %3676 = vtanh.f32 %v4899_v2 }
 0x34e   :  { %v3677_v62 = vpop.eup %3676 }
 0x34f   :  { %v1151_v60 = vmul.f32 %v3677_v62, %v3675_v49  ;;  %v4989_v49 = vld [vmem:[%s6761_s3 + $0x88] ss:$16 sps:$4 sm:$0xff]   ;;  %v4995_v62 = vld [vmem:[%s6761_s3 + $0x64] ss:$16 sps:$4 sm:$0xff]  }
 0x350   :  { %7240 = vst [vmem:[#allocation16_spill] sm:$0xff] %v4989_v49  ;;  %7241 = vst [vmem:[#allocation11_spill] sm:$0xff] %v4995_v62 }
 0x351   :  { %v4902_v47 = vpack.c.bf16 %v1151_v60, %v1151_v60  ;;  %v5001_v60 = vld [vmem:[%s6761_s3 + $0x6c] ss:$16 sps:$4 sm:$0xff]  }
 0x352   :  { %7242 = vst [vmem:[#allocation17_spill] sm:$0xff] %v5001_v60 }
 0x353   :  { %1186 = vmatmul.mubr.bf16.vlgmr.msra.gmra.mxu0 %v4902_v47  ;;  %1227 = vmatmul.mubr.bf16.vlgmr.msra.gmra.mxu1 %v4902_v47 }
 0x354   :  { %1265 = vmatpush1.bf16.msra.mxu0 %v4909_v61  ;;  %1306 = vmatpush1.bf16.msra.mxu1 %v4915_v42 }
 0x355   :  { %1266 = vmatprep.subr.bf16.mxu0 %v4921_v0  ;;  %1307 = vmatprep.subr.bf16.mxu1 %v4927_v56 }
 0x356   :  { %1296 = vmatprep.mubr.bf16.mxu0 %v7145_v58  ;;  %1337 = vmatprep.mubr.bf16.mxu1 %v7145_v58 }
 0x358   :  { %1267 = vmatpush1.bf16.msra.mxu0 %v4935_v6  ;;  %1308 = vmatpush1.bf16.msra.mxu1 %v4941_v37 }
 0x359   :  { %1268 = vmatprep.subr.bf16.mxu0 %v4947_v51  ;;  %1309 = vmatprep.subr.bf16.mxu1 %v4953_v3 }
 0x35c   :  { %1269 = vmatpush1.bf16.msra.mxu0 %v4959_v57  ;;  %1310 = vmatpush1.bf16.msra.mxu1 %v4965_v46 }
 0x35d   :  { %1270 = vmatprep.subr.bf16.mxu0 %v4971_v55  ;;  %1311 = vmatprep.subr.bf16.mxu1 %v4977_v59 }
 0x360   :  { %1271 = vmatpush1.bf16.msra.mxu0 %v4983_v50  ;;  %1312 = vmatpush1.bf16.msra.mxu1 %v4989_v49  ;;  %v5007_v50 = vld [vmem:[%s6761_s3 + $0x60] ss:$16 sps:$4 sm:$0xff]   ;;  %v5013_v49 = vld [vmem:[%s6761_s3 + $0x68] ss:$16 sps:$4 sm:$0xff]  }
 0x361   :  { %1272 = vmatprep.subr.bf16.mxu0 %v4995_v62  ;;  %1313 = vmatprep.subr.bf16.mxu1 %v5001_v60  ;;  %7243 = vst [vmem:[#allocation14_spill] sm:$0xff] %v5007_v50  ;;  %7244 = vst [vmem:[#allocation20_spill] sm:$0xff] %v5013_v49  ;;  %v5019_v62 = vld [vmem:[%s6761_s3 + $0x44] ss:$16 sps:$4 sm:$0xff]   ;;  %v5025_v60 = vld [vmem:[%s6761_s3 + $0x4c] ss:$16 sps:$4 sm:$0xff]  }
 0x362   :  { %7245 = vst [vmem:[#allocation15_spill] sm:$0xff] %v5019_v62  ;;  %7246 = vst [vmem:[#allocation21_spill] sm:$0xff] %v5025_v60 }
 0x364   :  { %1273 = vmatpush1.bf16.msra.mxu0 %v5007_v50  ;;  %1314 = vmatpush1.bf16.msra.mxu1 %v5013_v49  ;;  %v5031_v50 = vld [vmem:[%s6761_s3 + $0x40] ss:$16 sps:$4 sm:$0xff]  }
 0x365   :  { %1274 = vmatprep.subr.bf16.mxu0 %v5019_v62  ;;  %1315 = vmatprep.subr.bf16.mxu1 %v5025_v60  ;;  %7247 = vst [vmem:[#allocation18_spill] sm:$0xff] %v5031_v50  ;;  %v5038_v62 = vld [vmem:[%s6761_s3 + $0x24] ss:$16 sps:$4 sm:$0xff]   ;;  %v5045_v60 = vld [vmem:[%s6761_s3 + $0x20] ss:$16 sps:$4 sm:$0xff]  }
 0x366   :  { %7248 = vst [vmem:[#allocation24_spill] sm:$0xff] %v5038_v62  ;;  %7249 = vst [vmem:[#allocation19_spill] sm:$0xff] %v5045_v60 }
 0x368   :  { %1275 = vmatpush1.bf16.msra.mxu0 %v5031_v50  ;;  %1316 = vmatpush1.bf16.msra.mxu1 %v4290_v27  ;;  %v5052_v27 = vld [vmem:[%s6761_s3 + $0x4] ss:$16 sps:$4 sm:$0xff]  }
 0x369   :  { %1276 = vmatprep.subr.bf16.mxu0 %v5038_v62  ;;  %1317 = vmatprep.subr.bf16.mxu1 %v4296_v28  ;;  %7250 = vst [vmem:[#allocation25_spill] sm:$0xff] %v5052_v27  ;;  %v990_v28 = vadd.f32 %v4878_v40, %v4784_v8  ;;  %v992_v62 = vadd.f32 %v4882_v54, %v4786_v9 }
 0x36a   :  { %v1031_v8 = vadd.f32 %v4880_v63, %v4794_v26 }
 0x36c   :  { %1277 = vmatpush1.bf16.msra.mxu0 %v5045_v60  ;;  %1318 = vmatpush1.bf16.msra.mxu1 %v4314_v31 }
 0x36d   :  { %1278 = vmatprep.subr.bf16.mxu0 %v5052_v27  ;;  %1319 = vmatprep.subr.bf16.mxu1 %v4320_v32 }
 0x370   :  { %1279 = vmatpush1.bf16.msra.mxu0 %v4302_v29  ;;  %1320 = vmatpush1.bf16.msra.mxu1 %v4338_v35 }
 0x371   :  { %1351 = vmatprep.subr.bf16.mxu0 %v4307_v30  ;;  %1392 = vmatprep.subr.bf16.mxu1 %v4344_v36  ;;  %v1033_v36 = vadd.f32 %v4884_v52, %v4792_v24 }
 0x413   :  { %v1187_v31 = vpop.f32.mrf.mxu0  ;;  %v1228_v60 = vpop.f32.mrf.mxu1 }
 0x414   :  { %v1235_v50 = vadd.f32 %v1187_v31, %v990_v28  ;;  %v1237_v54 = vadd.f32 %v1228_v60, %v1031_v8 }
 0x415   :  { %v1189_v27 = vpop.f32.mrf.mxu0  ;;  %v1230_v49 = vpop.f32.mrf.mxu1 }
 0x416   :  { %v3371_v32 = vmul.f32 -1.442695, %v1235_v50  ;;  %v1236_v59 = vadd.f32 %v1189_v27, %v992_v62  ;;  %v1238_v40 = vadd.f32 %v1230_v49, %v1033_v36  ;;  %v5093_v36 = vld [vmem:[%s6762_s1 + $0xcc] ss:$16 sps:$4 sm:$0xff]  }
 0x417   :  { %v1191_v29 = vpop.f32.mrf.mxu0  ;;  %v1232_v55 = vpop.f32.mrf.mxu1 }
 0x418   :  { %3678 = vpow2.f32 %v3371_v32  ;;  %v3372_v35 = vmul.f32 -1.442695, %v1236_v59  ;;  %v3373_v28 = vmul.f32 -1.442695, %v1238_v40  ;;  %v5101_v40 = vld [vmem:[%s6762_s1 + $0xc0] ss:$16 sps:$4 sm:$0xff]  }
 0x419   :  { %v1192_v30 = vpop.f32.mrf.mxu0  ;;  %v1233_v46 = vpop.f32.mrf.mxu1 }
 0x41a   :  { %3680 = vpow2.f32 %v3372_v35  ;;  %v5087_v30 = vld [vmem:[%s6762_s1 + $0xc4] ss:$16 sps:$4 sm:$0xff]  }
 0x41b   :  { %3682 = vtanh.f32 %v1237_v54  ;;  %v5108_v54 = vld [vmem:[%s6762_s1 + $0xa4] ss:$16 sps:$4 sm:$0xff]  }
 0x41c   :  { %3684 = vpow2.f32 %v3373_v28  ;;  %v5115_v28 = vld [vmem:[%s6762_s1 + $0xa0] ss:$16 sps:$4 sm:$0xff]  }
 0x425   :  { %v3679_v31 = vpop.eup %3678 }
 0x426   :  { %v1242_v9 = vadd.f32 1.0, %v3679_v31 }
 0x427   :  { %v3681_v50 = vpop.eup %3680 }
 0x428   :  { %3686 = vrcp.f32 %v1242_v9  ;;  %v1248_v55 = vadd.f32 1.0, %v3681_v50  ;;  %v3683_v59 = vpop.eup %3682  ;;  %v5075_v9 = vld [vmem:[%s6762_s1 + $0xe0] ss:$16 sps:$4 sm:$0xff]  }
 0x429   :  { %v3685_v46 = vpop.eup %3684 }
 0x42a   :  { %3688 = vrcp.f32 %v1248_v55  ;;  %v1255_v52 = vadd.f32 1.0, %v3685_v46 }
 0x42c   :  { %3690 = vrcp.f32 %v1255_v52  ;;  %v3374_v52 = vld [vmem:[%s6764_s0 + $0x40] sm:$0xff] }
 0x435   :  { %v3687_v62 = vpop.eup %3686 }
 0x436   :  { %v1259_v27 = vmul.f32 %v3687_v62, %v3683_v59 }
 0x437   :  { %v3689_v32 = vpop.eup %3688 }
 0x438   :  { %v1258_v49 = vmul.f32 %v3689_v32, %v4800_v53  ;;  %v5081_v53 = vld [vmem:[%s6762_s1 + $0xe8] ss:$16 sps:$4 sm:$0xff]  }
 0x439   :  { %v3691_v8 = vpop.eup %3690 }
 0x43a   :  { %v5069_v29 = vadd.f32 %v1259_v27, %v1258_v49 }
 0x43c   :  { %3692 = vtanh.f32 %v5069_v29 }
 0x449   :  { %v3693_v63 = vpop.eup %3692 }
 0x44a   :  { %v1262_v60 = vmul.f32 %v3693_v63, %v3691_v8  ;;  %v3375_v63 = vld [vmem:[%s6764_s0 + $0x48] sm:$0xff] }
 0x44c   :  { %v1263_v35 = vpack.c.bf16 %v1262_v60, %v1262_v60 }
 0x44e   :  { %1297 = vmatmul.mubr.bf16.vlgmr.msra.gmra.mxu0 %v1263_v35  ;;  %1338 = vmatmul.mubr.bf16.vlgmr.msra.gmra.mxu1 %v1263_v35 }
 0x44f   :  { %1352 = vmatpush1.bf16.msra.mxu0 %v5075_v9  ;;  %1393 = vmatpush1.bf16.msra.mxu1 %v5081_v53 }
 0x450   :  { %1353 = vmatprep.subr.bf16.mxu0 %v5087_v30  ;;  %1394 = vmatprep.subr.bf16.mxu1 %v5093_v36 }
 0x451   :  { %1383 = vmatprep.mubr.bf16.mxu0 %v7145_v58  ;;  %1424 = vmatprep.mubr.bf16.mxu1 %v7145_v58 }
 0x453   :  { %1354 = vmatpush1.bf16.msra.mxu0 %v5101_v40  ;;  %1395 = vmatpush1.bf16.msra.mxu1 %v4389_v44  ;;  %v5122_v44 = vld [vmem:[%s6762_s1 + $0x84] ss:$16 sps:$4 sm:$0xff]  }
 0x454   :  { %1355 = vmatprep.subr.bf16.mxu0 %v5108_v54  ;;  %1396 = vmatprep.subr.bf16.mxu1 %v4395_v45  ;;  %v7251_v45 = vld [vmem:[#allocation36_spill] sm:$0xff] }
 0x457   :  { %1356 = vmatpush1.bf16.msra.mxu0 %v5115_v28  ;;  %1397 = vmatpush1.bf16.msra.mxu1 %v7181_v33  ;;  %v7252_v33 = vld [vmem:[#allocation37_spill] sm:$0xff] }
 0x458   :  { %1357 = vmatprep.subr.bf16.mxu0 %v5122_v44  ;;  %1398 = vmatprep.subr.bf16.mxu1 %v7183_v34  ;;  %v7253_v34 = vld [vmem:[#allocation38_spill] sm:$0xff] }
 0x45b   :  { %1358 = vmatpush1.bf16.msra.mxu0 %v7184_v41  ;;  %1399 = vmatpush1.bf16.msra.mxu1 %v7185_v4  ;;  %v7254_v41 = vld [vmem:[#allocation39_spill] sm:$0xff]  ;;  %v7255_v4 = vld [vmem:[#allocation40_spill] sm:$0xff] }
 0x45c   :  { %1359 = vmatprep.subr.bf16.mxu0 %v7186_v5  ;;  %1400 = vmatprep.subr.bf16.mxu1 %v7187_v38  ;;  %v7256_v5 = vld [vmem:[#allocation41_spill] sm:$0xff]  ;;  %v7257_v38 = vld [vmem:[#allocation42_spill] sm:$0xff] }
 0x45f   :  { %1360 = vmatpush1.bf16.msra.mxu0 %v7188_v7  ;;  %1401 = vmatpush1.bf16.msra.mxu1 %v7189_v39  ;;  %v7258_v7 = vld [vmem:[#allocation43_spill] sm:$0xff]  ;;  %v7259_v39 = vld [vmem:[#allocation44_spill] sm:$0xff] }
 0x460   :  { %1361 = vmatprep.subr.bf16.mxu0 %v7190_v10  ;;  %1402 = vmatprep.subr.bf16.mxu1 %v7191_v11  ;;  %v7260_v10 = vld [vmem:[#allocation45_spill] sm:$0xff]  ;;  %v7261_v11 = vld [vmem:[#allocation46_spill] sm:$0xff] }
 0x463   :  { %1362 = vmatpush1.bf16.msra.mxu0 %v7192_v12  ;;  %1403 = vmatpush1.bf16.msra.mxu1 %v7193_v13  ;;  %v7262_v12 = vld [vmem:[#allocation47_spill] sm:$0xff]  ;;  %v7263_v13 = vld [vmem:[#allocation48_spill] sm:$0xff] }
 0x464   :  { %1363 = vmatprep.subr.bf16.mxu0 %v7194_v14  ;;  %1404 = vmatprep.subr.bf16.mxu1 %v7195_v15  ;;  %v7264_v14 = vld [vmem:[#allocation49_spill] sm:$0xff]  ;;  %v7265_v15 = vld [vmem:[#allocation50_spill] sm:$0xff] }
 0x467   :  { %1364 = vmatpush1.bf16.msra.mxu0 %v7196_v16  ;;  %1405 = vmatpush1.bf16.msra.mxu1 %v7197_v17  ;;  %v7266_v16 = vld [vmem:[#allocation51_spill] sm:$0xff]  ;;  %v7267_v17 = vld [vmem:[#allocation52_spill] sm:$0xff] }
 0x468   :  { %1365 = vmatprep.subr.bf16.mxu0 %v7198_v18  ;;  %1406 = vmatprep.subr.bf16.mxu1 %v7199_v19  ;;  %v7268_v18 = vld [vmem:[#allocation53_spill] sm:$0xff]  ;;  %v7269_v19 = vld [vmem:[#allocation54_spill] sm:$0xff] }
 0x46b   :  { %1366 = vmatpush1.bf16.msra.mxu0 %v7200_v20  ;;  %1407 = vmatpush1.bf16.msra.mxu1 %v7201_v21  ;;  %v7270_v20 = vld [vmem:[#allocation55_spill] sm:$0xff]  ;;  %v7271_v21 = vld [vmem:[#allocation56_spill] sm:$0xff] }
 0x46c   :  { %1462 = vmatprep.subr.bf16.mxu0 %v7202_v22  ;;  %1503 = vmatprep.subr.bf16.mxu1 %v7203_v23  ;;  %v7272_v22 = vld [vmem:[#allocation57_spill] sm:$0xff]  ;;  %v7273_v23 = vld [vmem:[#allocation58_spill] sm:$0xff] }
 0x46e   :  { %1384 = vmatmul.mubr.bf16.vlgmr.msra.gmra.mxu0 %v4902_v47  ;;  %1425 = vmatmul.mubr.bf16.vlgmr.msra.gmra.mxu1 %v4902_v47  ;;  %v5184_v47 = vld [vmem:[%s6761_s3 + $0xec] ss:$16 sps:$4 sm:$0xff]  }
 0x46f   :  { %1463 = vmatpush1.bf16.msra.mxu0 %v7204_v25  ;;  %1504 = vmatpush1.bf16.msra.mxu1 %v7205_v1  ;;  %v7274_v25 = vld [vmem:[#allocation59_spill] sm:$0xff]  ;;  %v7275_v1 = vld [vmem:[#allocation60_spill] sm:$0xff]  ;;  %7278 = vst [vmem:[#allocation22_spill] sm:$0xff] %v5184_v47 }
 0x470   :  { %1464 = vmatprep.subr.bf16.mxu0 %v7206_v43  ;;  %1505 = vmatprep.subr.bf16.mxu1 %v7207_v48  ;;  %v7276_v43 = vld [vmem:[#allocation61_spill] sm:$0xff]  ;;  %v7277_v48 = vld [vmem:[#allocation8_spill] sm:$0xff] }
 0x471   :  { %1494 = vmatprep.mubr.bf16.mxu0 %v7145_v58  ;;  %1535 = vmatprep.mubr.bf16.mxu1 %v7145_v58 }
 0x473   :  { %1465 = vmatpush1.bf16.msra.mxu0 %v7251_v45  ;;  %1506 = vmatpush1.bf16.msra.mxu1 %v7252_v33 }
 0x474   :  { %1466 = vmatprep.subr.bf16.mxu0 %v7253_v34  ;;  %1507 = vmatprep.subr.bf16.mxu1 %v7254_v41 }
 0x477   :  { %1467 = vmatpush1.bf16.msra.mxu0 %v7255_v4  ;;  %1508 = vmatpush1.bf16.msra.mxu1 %v7256_v5 }
 0x478   :  { %1468 = vmatprep.subr.bf16.mxu0 %v7257_v38  ;;  %1509 = vmatprep.subr.bf16.mxu1 %v7258_v7 }
 0x47b   :  { %1469 = vmatpush1.bf16.msra.mxu0 %v7259_v39  ;;  %1510 = vmatpush1.bf16.msra.mxu1 %v7260_v10  ;;  %v3377_v39 = vld [vmem:[%s6764_s0 + $0x58] sm:$0xff] }
 0x47c   :  { %1470 = vmatprep.subr.bf16.mxu0 %v7261_v11  ;;  %1511 = vmatprep.subr.bf16.mxu1 %v7262_v12  ;;  %v3376_v11 = vld [vmem:[%s6764_s0 + $0x50] sm:$0xff] }
 0x47f   :  { %1471 = vmatpush1.bf16.msra.mxu0 %v7263_v13  ;;  %1512 = vmatpush1.bf16.msra.mxu1 %v7264_v14 }
 0x480   :  { %1472 = vmatprep.subr.bf16.mxu0 %v7265_v15  ;;  %1513 = vmatprep.subr.bf16.mxu1 %v7266_v16 }
 0x483   :  { %1473 = vmatpush1.bf16.msra.mxu0 %v7267_v17  ;;  %1514 = vmatpush1.bf16.msra.mxu1 %v7268_v18 }
 0x484   :  { %1474 = vmatprep.subr.bf16.mxu0 %v7269_v19  ;;  %1515 = vmatprep.subr.bf16.mxu1 %v7270_v20 }
 0x487   :  { %1475 = vmatpush1.bf16.msra.mxu0 %v7271_v21  ;;  %1516 = vmatpush1.bf16.msra.mxu1 %v7272_v22 }
 0x488   :  { %1476 = vmatprep.subr.bf16.mxu0 %v7273_v23  ;;  %1517 = vmatprep.subr.bf16.mxu1 %v7274_v25 }
 0x48b   :  { %1477 = vmatpush1.bf16.msra.mxu0 %v7275_v1  ;;  %1518 = vmatpush1.bf16.msra.mxu1 %v7276_v43 }
 0x48c   :  { %1573 = vmatprep.subr.bf16.mxu0 %v7277_v48  ;;  %1614 = vmatprep.subr.bf16.mxu1 %v5184_v47 }
 0x50e   :  { %v5187_v31 = vpop.f32.mrf.mxu0  ;;  %v5189_v50 = vpop.f32.mrf.mxu1 }
 0x510   :  { %v5191_v55 = vpop.f32.mrf.mxu0  ;;  %v5193_v59 = vpop.f32.mrf.mxu1 }
 0x512   :  { %v1302_v46 = vpop.f32.mrf.mxu0  ;;  %v1343_v62 = vpop.f32.mrf.mxu1 }
 0x514   :  { %v1303_v27 = vpop.f32.mrf.mxu0  ;;  %v1344_v32 = vpop.f32.mrf.mxu1 }
 0x515   :  { %v7280_v32 = vld [vmem:[#allocation9_spill] sm:$0xff] }
 0x52e   :  { %v1385_v49 = vpop.f32.mrf.mxu0  ;;  %v1426_v8 = vpop.f32.mrf.mxu1 }
 0x52f   :  { %v1433_v60 = vadd.f32 %v3374_v52, %v1385_v49  ;;  %v1435_v14 = vadd.f32 %v3376_v11, %v1426_v8  ;;  %v7281_v52 = vld [vmem:[#allocation13_spill] sm:$0xff]  ;;  %v7282_v49 = vld [vmem:[#allocation10_spill] sm:$0xff]  ;;  %v7283_v8 = vld [vmem:[#allocation16_spill] sm:$0xff] }
 0x530   :  { %v1387_v35 = vpop.f32.mrf.mxu0  ;;  %v1428_v45 = vpop.f32.mrf.mxu1  ;;  %v5262_v11 = vld [vmem:[%s6761_s3 + $0xc] ss:$16 sps:$4 sm:$0xff]  }
 0x531   :  { %v3378_v33 = vmul.f32 -1.442695, %v1433_v60  ;;  %v1434_v34 = vadd.f32 %v3375_v63, %v1387_v35  ;;  %v1436_v10 = vadd.f32 %v3377_v39, %v1428_v45  ;;  %v7284_v63 = vld [vmem:[#allocation11_spill] sm:$0xff]  ;;  %v7285_v60 = vld [vmem:[#allocation17_spill] sm:$0xff]  ;;  %v7286_v35 = vld [vmem:[#allocation14_spill] sm:$0xff]  ;;  %7294 = vst [vmem:[#allocation27_spill] sm:$0xff] %v5262_v11 }
 0x532   :  { %v1389_v41 = vpop.f32.mrf.mxu0  ;;  %v1430_v4 = vpop.f32.mrf.mxu1  ;;  %v7287_v45 = vld [vmem:[#allocation20_spill] sm:$0xff] }
 0x533   :  { %3694 = vpow2.f32 %v3378_v33  ;;  %v3379_v5 = vmul.f32 -1.442695, %v1434_v34  ;;  %v3380_v12 = vmul.f32 -1.442695, %v1436_v10  ;;  %v7288_v33 = vld [vmem:[#allocation15_spill] sm:$0xff]  ;;  %v7289_v34 = vld [vmem:[#allocation21_spill] sm:$0xff] }
 0x534   :  { %v1390_v38 = vpop.f32.mrf.mxu0  ;;  %v1431_v7 = vpop.f32.mrf.mxu1  ;;  %v7290_v41 = vld [vmem:[#allocation18_spill] sm:$0xff]  ;;  %v7293_v10 = vld [vmem:[#allocation25_spill] sm:$0xff] }
 0x535   :  { %3696 = vpow2.f32 %v3379_v5  ;;  %v5241_v4 = vld [vmem:[%s6761_s3 + $0x48] ss:$16 sps:$4 sm:$0xff]   ;;  %v5248_v38 = vld [vmem:[%s6761_s3 + $0x2c] ss:$16 sps:$4 sm:$0xff]  }
 0x536   :  { %3698 = vpow2.f32 %v3380_v12  ;;  %v7291_v5 = vld [vmem:[#allocation24_spill] sm:$0xff]  ;;  %v7292_v7 = vld [vmem:[#allocation19_spill] sm:$0xff] }
 0x537   :  { %v5255_v39 = vld [vmem:[%s6761_s3 + $0x28] ss:$16 sps:$4 sm:$0xff]   ;;  %v5268_v12 = vld [vmem:[%s6761_s3] ss:$16 sps:$4 sm:$0xff]  }
 0x538   :  { %7295 = vst [vmem:[#allocation23_spill] sm:$0xff] %v5268_v12 }
 0x540   :  { %v3695_v13 = vpop.eup %3694 }
 0x541   :  { %v1440_v15 = vadd.f32 1.0, %v3695_v13  ;;  %v5274_v13 = vld [vmem:[%s6761_s3 + $0x8] ss:$16 sps:$4 sm:$0xff]  }
 0x542   :  { %v3697_v16 = vpop.eup %3696  ;;  %7296 = vst [vmem:[#allocation28_spill] sm:$0xff] %v5274_v13 }
 0x543   :  { %3700 = vrcp.f32 %v1440_v15  ;;  %v1446_v17 = vadd.f32 1.0, %v3697_v16  ;;  %v3699_v18 = vpop.eup %3698  ;;  %v5286_v15 = vld [vmem:[%s6762_s1 + $0xec] ss:$16 sps:$4 sm:$0xff]  }
 0x544   :  { %3702 = vtanh.f32 %v1435_v14  ;;  %v1453_v22 = vadd.f32 1.0, %v3699_v18  ;;  %v5280_v14 = vld [vmem:[%s6762_s1 + $0xe4] ss:$16 sps:$4 sm:$0xff]   ;;  %7298 = vst [vmem:[#allocation29_spill] sm:$0xff] %v5286_v15  ;;  %v7299_v16 = vld [vmem:[#allocation62_spill] sm:$0xff] }
 0x545   :  { %3704 = vrcp.f32 %v1446_v17  ;;  %7297 = vst [vmem:[#allocation26_spill] sm:$0xff] %v5280_v14  ;;  %v1299_v17 = vadd.f32 %v5187_v31, %v7299_v16  ;;  %v1342_v31 = vadd.f32 %v5193_v59, %v4792_v24 }
 0x546   :  { %3706 = vrcp.f32 %v1453_v22 }
 0x550   :  { %v3701_v19 = vpop.eup %3700 }
 0x551   :  { %v3703_v20 = vpop.eup %3702 }
 0x552   :  { %v3705_v21 = vpop.eup %3704  ;;  %v1457_v23 = vmul.f32 %v3703_v20, %v3701_v19  ;;  %v7300_v20 = vld [vmem:[#allocation63_spill] sm:$0xff] }
 0x553   :  { %v1456_v25 = vmul.f32 %v3705_v21, %v4899_v2  ;;  %v3707_v43 = vpop.eup %3706  ;;  %v7279_v2 = vld [vmem:[#allocation12_spill] sm:$0xff]  ;;  %v1301_v21 = vadd.f32 %v5191_v55, %v7300_v20 }
 0x555   :  { %v5208_v1 = vadd.f32 %v1457_v23, %v1456_v25 }
 0x557   :  { %3708 = vtanh.f32 %v5208_v1 }
 0x564   :  { %v3709_v46 = vpop.eup %3708 }
 0x565   :  { %v1460_v62 = vmul.f32 %v3709_v46, %v3707_v43 }
 0x567   :  { %v5211_v27 = vpack.c.bf16 %v1460_v62, %v1460_v62 }
 0x569   :  { %1495 = vmatmul.mubr.bf16.vlgmr.msra.gmra.mxu0 %v5211_v27  ;;  %1536 = vmatmul.mubr.bf16.vlgmr.msra.gmra.mxu1 %v5211_v27 }
 0x56a   :  { %1574 = vmatpush1.bf16.msra.mxu0 %v4909_v61  ;;  %1615 = vmatpush1.bf16.msra.mxu1 %v4915_v42 }
 0x56b   :  { %1575 = vmatprep.subr.bf16.mxu0 %v4921_v0  ;;  %1616 = vmatprep.subr.bf16.mxu1 %v4927_v56 }
 0x56c   :  { %1605 = vmatprep.mubr.bf16.mxu0 %v7145_v58  ;;  %1646 = vmatprep.mubr.bf16.mxu1 %v7145_v58 }
 0x56e   :  { %1576 = vmatpush1.bf16.msra.mxu0 %v4935_v6  ;;  %1617 = vmatpush1.bf16.msra.mxu1 %v4941_v37 }
 0x56f   :  { %1577 = vmatprep.subr.bf16.mxu0 %v4947_v51  ;;  %1618 = vmatprep.subr.bf16.mxu1 %v4953_v3 }
 0x572   :  { %1578 = vmatpush1.bf16.msra.mxu0 %v4959_v57  ;;  %1619 = vmatpush1.bf16.msra.mxu1 %v7279_v2 }
 0x573   :  { %1579 = vmatprep.subr.bf16.mxu0 %v7280_v32  ;;  %1620 = vmatprep.subr.bf16.mxu1 %v7281_v52 }
 0x576   :  { %1580 = vmatpush1.bf16.msra.mxu0 %v7282_v49  ;;  %1621 = vmatpush1.bf16.msra.mxu1 %v7283_v8 }
 0x577   :  { %1581 = vmatprep.subr.bf16.mxu0 %v7284_v63  ;;  %1622 = vmatprep.subr.bf16.mxu1 %v7285_v60 }
 0x57a   :  { %1582 = vmatpush1.bf16.msra.mxu0 %v7286_v35  ;;  %1623 = vmatpush1.bf16.msra.mxu1 %v7287_v45 }
 0x57b   :  { %1583 = vmatprep.subr.bf16.mxu0 %v7288_v33  ;;  %1624 = vmatprep.subr.bf16.mxu1 %v7289_v34 }
 0x57e   :  { %1584 = vmatpush1.bf16.msra.mxu0 %v7290_v41  ;;  %1625 = vmatpush1.bf16.msra.mxu1 %v5241_v4 }
 0x57f   :  { %1585 = vmatprep.subr.bf16.mxu0 %v7291_v5  ;;  %1626 = vmatprep.subr.bf16.mxu1 %v5248_v38 }
 0x582   :  { %1586 = vmatpush1.bf16.msra.mxu0 %v7292_v7  ;;  %1627 = vmatpush1.bf16.msra.mxu1 %v5255_v39 }
 0x583   :  { %1587 = vmatprep.subr.bf16.mxu0 %v7293_v10  ;;  %1628 = vmatprep.subr.bf16.mxu1 %v5262_v11 }
 0x586   :  { %1588 = vmatpush1.bf16.msra.mxu0 %v5268_v12  ;;  %1629 = vmatpush1.bf16.msra.mxu1 %v5274_v13 }
 0x587   :  { %1660 = vmatprep.subr.bf16.mxu0 %v5280_v14  ;;  %1701 = vmatprep.subr.bf16.mxu1 %v5286_v15  ;;  %v1340_v15 = vadd.f32 %v5189_v50, %v4794_v26 }
 0x629   :  { %v1496_v18 = vpop.f32.mrf.mxu0  ;;  %v1537_v19 = vpop.f32.mrf.mxu1 }
 0x62a   :  { %v1544_v22 = vadd.f32 %v1496_v18, %v1299_v17  ;;  %v1546_v55 = vadd.f32 %v1537_v19, %v1340_v15 }
 0x62b   :  { %v1498_v23 = vpop.f32.mrf.mxu0  ;;  %v1539_v25 = vpop.f32.mrf.mxu1 }
 0x62c   :  { %v3381_v43 = vmul.f32 -1.442695, %v1544_v22  ;;  %v1545_v46 = vadd.f32 %v1498_v23, %v1301_v21  ;;  %v1547_v16 = vadd.f32 %v1539_v25, %v1342_v31  ;;  %v5338_v31 = vld [vmem:[%s6762_s1 + $0x80] ss:$16 sps:$4 sm:$0xff]  }
 0x62d   :  { %v1500_v62 = vpop.f32.mrf.mxu0  ;;  %v1541_v14 = vpop.f32.mrf.mxu1  ;;  %7302 = vst [vmem:[#allocation31_spill] sm:$0xff] %v5338_v31 }
 0x62e   :  { %3710 = vpow2.f32 %v3381_v43  ;;  %v3382_v13 = vmul.f32 -1.442695, %v1545_v46  ;;  %v3383_v17 = vmul.f32 -1.442695, %v1547_v16  ;;  %v5325_v46 = vld [vmem:[%s6762_s1 + $0xa8] ss:$16 sps:$4 sm:$0xff]  }
 0x62f   :  { %v1501_v12 = vpop.f32.mrf.mxu0  ;;  %v1542_v11 = vpop.f32.mrf.mxu1  ;;  %v5332_v62 = vld [vmem:[%s6762_s1 + $0x8c] ss:$16 sps:$4 sm:$0xff]  }
 0x630   :  { %3712 = vpow2.f32 %v3382_v13  ;;  %7301 = vst [vmem:[#allocation30_spill] sm:$0xff] %v5332_v62 }
 0x631   :  { %3714 = vtanh.f32 %v1546_v55  ;;  %v5344_v55 = vld [vmem:[%s6762_s1 + $0x88] ss:$16 sps:$4 sm:$0xff]  }
 0x632   :  { %3716 = vpow2.f32 %v3383_v17  ;;  %7303 = vst [vmem:[#allocation32_spill] sm:$0xff] %v5344_v55  ;;  %v5350_v17 = vld [vmem:[%s6762_s1 + $0x64] ss:$16 sps:$4 sm:$0xff]  }
 0x633   :  { %7304 = vst [vmem:[#allocation33_spill] sm:$0xff] %v5350_v17 }
 0x63b   :  { %v3711_v18 = vpop.eup %3710 }
 0x63c   :  { %v1551_v20 = vadd.f32 1.0, %v3711_v18  ;;  %v5356_v18 = vld [vmem:[%s6762_s1 + $0x6c] ss:$16 sps:$4 sm:$0xff]  }
 0x63d   :  { %v3713_v21 = vpop.eup %3712  ;;  %7305 = vst [vmem:[#allocation34_spill] sm:$0xff] %v5356_v18 }
 0x63e   :  { %3718 = vrcp.f32 %v1551_v20  ;;  %v1557_v14 = vadd.f32 1.0, %v3713_v21  ;;  %v3715_v12 = vpop.eup %3714  ;;  %v5318_v20 = vld [vmem:[%s6762_s1 + $0xac] ss:$16 sps:$4 sm:$0xff]   ;;  %v5362_v21 = vld [vmem:[%s6762_s1 + $0x60] ss:$16 sps:$4 sm:$0xff]  }
 0x63f   :  { %v3717_v11 = vpop.eup %3716  ;;  %7306 = vst [vmem:[#allocation35_spill] sm:$0xff] %v5362_v21 }
 0x640   :  { %3720 = vrcp.f32 %v1557_v14  ;;  %v1564_v59 = vadd.f32 1.0, %v3717_v11  ;;  %v5368_v14 = vld [vmem:[%s6762_s1 + $0x68] ss:$16 sps:$4 sm:$0xff]   ;;  %v5380_v11 = vld [vmem:[%s6762_s1 + $0x4c] ss:$16 sps:$4 sm:$0xff]  }
 0x641   :  { %7307 = vst [vmem:[#allocation7_spill] sm:$0xff] %v5368_v14  ;;  %7309 = vst [vmem:[#allocation37_spill] sm:$0xff] %v5380_v11 }
 0x642   :  { %3722 = vrcp.f32 %v1564_v59  ;;  %v5404_v59 = vld [vmem:[%s6762_s1 + $0x2c] ss:$16 sps:$4 sm:$0xff]  }
 0x643   :  { %7313 = vst [vmem:[#allocation41_spill] sm:$0xff] %v5404_v59 }
 0x64b   :  { %v3719_v13 = vpop.eup %3718 }
 0x64c   :  { %v1568_v22 = vmul.f32 %v3719_v13, %v3715_v12  ;;  %v5374_v12 = vld [vmem:[%s6762_s1 + $0x44] ss:$16 sps:$4 sm:$0xff]   ;;  %v5386_v13 = vld [vmem:[%s6762_s1 + $0x40] ss:$16 sps:$4 sm:$0xff]  }
 0x64d   :  { %v3721_v23 = vpop.eup %3720  ;;  %7308 = vst [vmem:[#allocation36_spill] sm:$0xff] %v5374_v12  ;;  %7310 = vst [vmem:[#allocation38_spill] sm:$0xff] %v5386_v13 }
 0x64e   :  { %v1567_v25 = vmul.f32 %v3721_v23, %v5069_v29  ;;  %v5311_v29 = vld [vmem:[%s6762_s1 + $0xc8] ss:$16 sps:$4 sm:$0xff]   ;;  %v5398_v23 = vld [vmem:[%s6762_s1 + $0x24] ss:$16 sps:$4 sm:$0xff]  }
 0x64f   :  { %v3723_v50 = vpop.eup %3722  ;;  %7312 = vst [vmem:[#allocation40_spill] sm:$0xff] %v5398_v23 }
 0x650   :  { %v5298_v43 = vadd.f32 %v1568_v22, %v1567_v25  ;;  %v5392_v22 = vld [vmem:[%s6762_s1 + $0x48] ss:$16 sps:$4 sm:$0xff]   ;;  %v5410_v25 = vld [vmem:[%s6762_s1 + $0x20] ss:$16 sps:$4 sm:$0xff]  }
 0x651   :  { %7311 = vst [vmem:[#allocation39_spill] sm:$0xff] %v5392_v22  ;;  %7314 = vst [vmem:[#allocation42_spill] sm:$0xff] %v5410_v25 }
 0x652   :  { %3724 = vtanh.f32 %v5298_v43 }
 0x65f   :  { %v3725_v15 = vpop.eup %3724 }
 0x660   :  { %v1571_v16 = vmul.f32 %v3725_v15, %v3723_v50  ;;  %v5416_v50 = vld [vmem:[%s6762_s1 + $0x28] ss:$16 sps:$4 sm:$0xff]   ;;  %v5422_v15 = vld [vmem:[%s6762_s1 + $0x4] ss:$16 sps:$4 sm:$0xff]  }
 0x661   :  { %7315 = vst [vmem:[#allocation43_spill] sm:$0xff] %v5416_v50  ;;  %7316 = vst [vmem:[#allocation44_spill] sm:$0xff] %v5422_v15 }
 0x662   :  { %v1572_v19 = vpack.c.bf16 %v1571_v16, %v1571_v16  ;;  %v5428_v16 = vld [vmem:[%s6762_s1 + $0xc] ss:$16 sps:$4 sm:$0xff]  }
 0x663   :  { %7317 = vst [vmem:[#allocation45_spill] sm:$0xff] %v5428_v16 }
 0x664   :  { %1606 = vmatmul.mubr.bf16.vlgmr.msra.gmra.mxu0 %v1572_v19  ;;  %1647 = vmatmul.mubr.bf16.vlgmr.msra.gmra.mxu1 %v1572_v19  ;;  %v5434_v19 = vld [vmem:[%s6762_s1] ss:$16 sps:$4 sm:$0xff]  }
 0x665   :  { %1661 = vmatpush1.bf16.msra.mxu0 %v5075_v9  ;;  %1702 = vmatpush1.bf16.msra.mxu1 %v5081_v53  ;;  %7318 = vst [vmem:[#allocation46_spill] sm:$0xff] %v5434_v19 }
 0x666   :  { %1662 = vmatprep.subr.bf16.mxu0 %v5087_v30  ;;  %1703 = vmatprep.subr.bf16.mxu1 %v5093_v36 }
 0x667   :  { %1692 = vmatprep.mubr.bf16.mxu0 %v7145_v58  ;;  %1733 = vmatprep.mubr.bf16.mxu1 %v7145_v58 }
 0x669   :  { %1663 = vmatpush1.bf16.msra.mxu0 %v5101_v40  ;;  %1704 = vmatpush1.bf16.msra.mxu1 %v5311_v29 }
 0x66a   :  { %1664 = vmatprep.subr.bf16.mxu0 %v5108_v54  ;;  %1705 = vmatprep.subr.bf16.mxu1 %v5318_v20 }
 0x66d   :  { %1665 = vmatpush1.bf16.msra.mxu0 %v5115_v28  ;;  %1706 = vmatpush1.bf16.msra.mxu1 %v5325_v46 }
 0x66e   :  { %1666 = vmatprep.subr.bf16.mxu0 %v5122_v44  ;;  %1707 = vmatprep.subr.bf16.mxu1 %v5332_v62 }
 0x671   :  { %1667 = vmatpush1.bf16.msra.mxu0 %v5338_v31  ;;  %1708 = vmatpush1.bf16.msra.mxu1 %v5344_v55  ;;  %v3387_v55 = vld [vmem:[%s6764_s0 + $0x78] sm:$0xff] }
 0x672   :  { %1668 = vmatprep.subr.bf16.mxu0 %v5350_v17  ;;  %1709 = vmatprep.subr.bf16.mxu1 %v5356_v18 }
 0x675   :  { %1669 = vmatpush1.bf16.msra.mxu0 %v5362_v21  ;;  %1710 = vmatpush1.bf16.msra.mxu1 %v5368_v14 }
 0x676   :  { %1670 = vmatprep.subr.bf16.mxu0 %v5374_v12  ;;  %1711 = vmatprep.subr.bf16.mxu1 %v5380_v11 }
 0x679   :  { %1671 = vmatpush1.bf16.msra.mxu0 %v5386_v13  ;;  %1712 = vmatpush1.bf16.msra.mxu1 %v5392_v22 }
 0x67a   :  { %1672 = vmatprep.subr.bf16.mxu0 %v5398_v23  ;;  %1713 = vmatprep.subr.bf16.mxu1 %v5404_v59 }
 0x67d   :  { %1673 = vmatpush1.bf16.msra.mxu0 %v5410_v25  ;;  %1714 = vmatpush1.bf16.msra.mxu1 %v5416_v50  ;;  %v5440_v50 = vld [vmem:[%s6762_s1 + $0x8] ss:$16 sps:$4 sm:$0xff]  }
 0x67e   :  { %1674 = vmatprep.subr.bf16.mxu0 %v5422_v15  ;;  %1715 = vmatprep.subr.bf16.mxu1 %v5428_v16  ;;  %7319 = vst [vmem:[#allocation47_spill] sm:$0xff] %v5440_v50  ;;  %v5446_v15 = vld [vmem:[%s6763_s2 + $0xe4] ss:$16 sps:$4 sm:$0xff]   ;;  %v5452_v16 = vld [vmem:[%s6763_s2 + $0xec] ss:$16 sps:$4 sm:$0xff]  }
 0x67f   :  { %7320 = vst [vmem:[#allocation48_spill] sm:$0xff] %v5446_v15  ;;  %7321 = vst [vmem:[#allocation49_spill] sm:$0xff] %v5452_v16 }
 0x681   :  { %1675 = vmatpush1.bf16.msra.mxu0 %v5434_v19  ;;  %1716 = vmatpush1.bf16.msra.mxu1 %v5440_v50  ;;  %v5460_v50 = vld [vmem:[%s6763_s2 + $0xe0] ss:$16 sps:$4 sm:$0xff]  }
 0x682   :  { %1771 = vmatprep.subr.bf16.mxu0 %v5446_v15  ;;  %1812 = vmatprep.subr.bf16.mxu1 %v5452_v16  ;;  %7322 = vst [vmem:[#allocation50_spill] sm:$0xff] %v5460_v50  ;;  %v5466_v15 = vld [vmem:[%s6763_s2 + $0xe8] ss:$16 sps:$4 sm:$0xff]   ;;  %v5472_v16 = vld [vmem:[%s6763_s2 + $0xc4] ss:$16 sps:$4 sm:$0xff]  }
 0x683   :  { %7323 = vst [vmem:[#allocation51_spill] sm:$0xff] %v5466_v15  ;;  %7324 = vst [vmem:[#allocation52_spill] sm:$0xff] %v5472_v16 }
 0x684   :  { %1693 = vmatmul.mubr.bf16.vlgmr.msra.gmra.mxu0 %v5211_v27  ;;  %1734 = vmatmul.mubr.bf16.vlgmr.msra.gmra.mxu1 %v5211_v27  ;;  %v5478_v27 = vld [vmem:[%s6763_s2 + $0xcc] ss:$16 sps:$4 sm:$0xff]  }
 0x685   :  { %1772 = vmatpush1.bf16.msra.mxu0 %v5460_v50  ;;  %1813 = vmatpush1.bf16.msra.mxu1 %v5466_v15  ;;  %7325 = vst [vmem:[#allocation53_spill] sm:$0xff] %v5478_v27  ;;  %v5486_v15 = vld [vmem:[%s6763_s2 + $0xc0] ss:$16 sps:$4 sm:$0xff]   ;;  %v5504_v50 = vld [vmem:[%s6763_s2 + $0xac] ss:$16 sps:$4 sm:$0xff]  }
 0x686   :  { %1773 = vmatprep.subr.bf16.mxu0 %v5472_v16  ;;  %1814 = vmatprep.subr.bf16.mxu1 %v5478_v27  ;;  %7326 = vst [vmem:[#allocation54_spill] sm:$0xff] %v5486_v15  ;;  %v5492_v16 = vld [vmem:[%s6763_s2 + $0xc8] ss:$16 sps:$4 sm:$0xff]   ;;  %v5498_v27 = vld [vmem:[%s6763_s2 + $0xa4] ss:$16 sps:$4 sm:$0xff]   ;;  %7329 = vst [vmem:[#allocation57_spill] sm:$0xff] %v5504_v50 }
 0x687   :  { %1803 = vmatprep.mubr.bf16.mxu0 %v7145_v58  ;;  %1844 = vmatprep.mubr.bf16.mxu1 %v7145_v58  ;;  %7327 = vst [vmem:[#allocation55_spill] sm:$0xff] %v5492_v16  ;;  %7328 = vst [vmem:[#allocation56_spill] sm:$0xff] %v5498_v27 }
 0x689   :  { %1774 = vmatpush1.bf16.msra.mxu0 %v5486_v15  ;;  %1815 = vmatpush1.bf16.msra.mxu1 %v5492_v16  ;;  %v5510_v15 = vld [vmem:[%s6763_s2 + $0xa0] ss:$16 sps:$4 sm:$0xff]   ;;  %v5516_v16 = vld [vmem:[%s6763_s2 + $0xa8] ss:$16 sps:$4 sm:$0xff]  }
 0x68a   :  { %1775 = vmatprep.subr.bf16.mxu0 %v5498_v27  ;;  %1816 = vmatprep.subr.bf16.mxu1 %v5504_v50  ;;  %7330 = vst [vmem:[#allocation58_spill] sm:$0xff] %v5510_v15  ;;  %7331 = vst [vmem:[#allocation59_spill] sm:$0xff] %v5516_v16  ;;  %v5522_v27 = vld [vmem:[%s6763_s2 + $0x84] ss:$16 sps:$4 sm:$0xff]   ;;  %v5528_v50 = vld [vmem:[%s6763_s2 + $0x8c] ss:$16 sps:$4 sm:$0xff]  }
 0x68b   :  { %7332 = vst [vmem:[#allocation60_spill] sm:$0xff] %v5522_v27  ;;  %7333 = vst [vmem:[#allocation61_spill] sm:$0xff] %v5528_v50 }
 0x68d   :  { %1776 = vmatpush1.bf16.msra.mxu0 %v5510_v15  ;;  %1817 = vmatpush1.bf16.msra.mxu1 %v5516_v16  ;;  %v5534_v15 = vld [vmem:[%s6763_s2 + $0x80] ss:$16 sps:$4 sm:$0xff]   ;;  %v5540_v16 = vld [vmem:[%s6763_s2 + $0x88] ss:$16 sps:$4 sm:$0xff]  }
 0x68e   :  { %1777 = vmatprep.subr.bf16.mxu0 %v5522_v27  ;;  %1818 = vmatprep.subr.bf16.mxu1 %v5528_v50  ;;  %7334 = vst [vmem:[#allocation8_spill] sm:$0xff] %v5534_v15  ;;  %7335 = vst [vmem:[#allocation12_spill] sm:$0xff] %v5540_v16  ;;  %v5546_v27 = vld [vmem:[%s6763_s2 + $0x64] ss:$16 sps:$4 sm:$0xff]   ;;  %v5552_v50 = vld [vmem:[%s6763_s2 + $0x6c] ss:$16 sps:$4 sm:$0xff]  }
 0x68f   :  { %7336 = vst [vmem:[#allocation9_spill] sm:$0xff] %v5546_v27  ;;  %7337 = vst [vmem:[#allocation13_spill] sm:$0xff] %v5552_v50 }
 0x691   :  { %1778 = vmatpush1.bf16.msra.mxu0 %v5534_v15  ;;  %1819 = vmatpush1.bf16.msra.mxu1 %v5540_v16  ;;  %v5558_v15 = vld [vmem:[%s6763_s2 + $0x60] ss:$16 sps:$4 sm:$0xff]   ;;  %v5564_v16 = vld [vmem:[%s6763_s2 + $0x68] ss:$16 sps:$4 sm:$0xff]  }
 0x692   :  { %1779 = vmatprep.subr.bf16.mxu0 %v5546_v27  ;;  %1820 = vmatprep.subr.bf16.mxu1 %v5552_v50  ;;  %7338 = vst [vmem:[#allocation10_spill] sm:$0xff] %v5558_v15  ;;  %7339 = vst [vmem:[#allocation16_spill] sm:$0xff] %v5564_v16  ;;  %v5570_v27 = vld [vmem:[%s6763_s2 + $0x44] ss:$16 sps:$4 sm:$0xff]   ;;  %v5576_v50 = vld [vmem:[%s6763_s2 + $0x4c] ss:$16 sps:$4 sm:$0xff]  }
 0x693   :  { %7340 = vst [vmem:[#allocation11_spill] sm:$0xff] %v5570_v27  ;;  %7341 = vst [vmem:[#allocation17_spill] sm:$0xff] %v5576_v50 }
 0x695   :  { %1780 = vmatpush1.bf16.msra.mxu0 %v5558_v15  ;;  %1821 = vmatpush1.bf16.msra.mxu1 %v5564_v16  ;;  %v5582_v15 = vld [vmem:[%s6763_s2 + $0x40] ss:$16 sps:$4 sm:$0xff]   ;;  %v5588_v16 = vld [vmem:[%s6763_s2 + $0x48] ss:$16 sps:$4 sm:$0xff]  }
 0x696   :  { %1781 = vmatprep.subr.bf16.mxu0 %v5570_v27  ;;  %1822 = vmatprep.subr.bf16.mxu1 %v5576_v50  ;;  %7342 = vst [vmem:[#allocation14_spill] sm:$0xff] %v5582_v15  ;;  %7343 = vst [vmem:[#allocation20_spill] sm:$0xff] %v5588_v16  ;;  %v5594_v27 = vld [vmem:[%s6763_s2 + $0x24] ss:$16 sps:$4 sm:$0xff]   ;;  %v5600_v50 = vld [vmem:[%s6763_s2 + $0x2c] ss:$16 sps:$4 sm:$0xff]  }
 0x697   :  { %7344 = vst [vmem:[#allocation15_spill] sm:$0xff] %v5594_v27  ;;  %7345 = vst [vmem:[#allocation21_spill] sm:$0xff] %v5600_v50 }
 0x699   :  { %1782 = vmatpush1.bf16.msra.mxu0 %v5582_v15  ;;  %1823 = vmatpush1.bf16.msra.mxu1 %v5588_v16  ;;  %v5606_v15 = vld [vmem:[%s6763_s2 + $0x20] ss:$16 sps:$4 sm:$0xff]   ;;  %v5612_v16 = vld [vmem:[%s6763_s2 + $0x28] ss:$16 sps:$4 sm:$0xff]  }
 0x69a   :  { %1783 = vmatprep.subr.bf16.mxu0 %v5594_v27  ;;  %1824 = vmatprep.subr.bf16.mxu1 %v5600_v50  ;;  %7346 = vst [vmem:[#allocation18_spill] sm:$0xff] %v5606_v15  ;;  %7347 = vst [vmem:[#allocation24_spill] sm:$0xff] %v5612_v16  ;;  %v5618_v27 = vld [vmem:[%s6763_s2 + $0x4] ss:$16 sps:$4 sm:$0xff]   ;;  %v5624_v50 = vld [vmem:[%s6763_s2 + $0xc] ss:$16 sps:$4 sm:$0xff]  }
 0x69b   :  { %7348 = vst [vmem:[#allocation19_spill] sm:$0xff] %v5618_v27  ;;  %7349 = vst [vmem:[#allocation25_spill] sm:$0xff] %v5624_v50 }
 0x69d   :  { %1784 = vmatpush1.bf16.msra.mxu0 %v5606_v15  ;;  %1825 = vmatpush1.bf16.msra.mxu1 %v5612_v16  ;;  %v5630_v15 = vld [vmem:[%s6763_s2] ss:$16 sps:$4 sm:$0xff]   ;;  %v5636_v16 = vld [vmem:[%s6763_s2 + $0x8] ss:$16 sps:$4 sm:$0xff]  }
 0x69e   :  { %1785 = vmatprep.subr.bf16.mxu0 %v5618_v27  ;;  %1826 = vmatprep.subr.bf16.mxu1 %v5624_v50  ;;  %7350 = vst [vmem:[#allocation64_spill] sm:$0xff] %v5630_v15  ;;  %7351 = vst [vmem:[#allocation65_spill] sm:$0xff] %v5636_v16 }
 0x6a1   :  { %1786 = vmatpush1.bf16.msra.mxu0 %v5630_v15  ;;  %1827 = vmatpush1.bf16.msra.mxu1 %v5636_v16  ;;  %v3384_v16 = vld [vmem:[%s6764_s0 + $0x60] sm:$0xff] }
 0x6a2   :  { %1882 = vmatprep.subr.bf16.mxu0 %v7277_v48  ;;  %1923 = vmatprep.subr.bf16.mxu1 %v5184_v47  ;;  %v3385_v47 = vld [vmem:[%s6764_s0 + $0x68] sm:$0xff] }
 0x724   :  { %v5641_v27 = vpop.f32.mrf.mxu0  ;;  %v5643_v50 = vpop.f32.mrf.mxu1 }
 0x726   :  { %v5645_v19 = vpop.f32.mrf.mxu0  ;;  %v5647_v25 = vpop.f32.mrf.mxu1 }
 0x728   :  { %v1611_v15 = vpop.f32.mrf.mxu0  ;;  %v1652_v59 = vpop.f32.mrf.mxu1 }
 0x72a   :  { %v1612_v23 = vpop.f32.mrf.mxu0  ;;  %v1653_v22 = vpop.f32.mrf.mxu1 }
 0x744   :  { %v1694_v13 = vpop.f32.mrf.mxu0  ;;  %v1735_v48 = vpop.f32.mrf.mxu1 }
 0x745   :  { %v1742_v11 = vadd.f32 %v3384_v16, %v1694_v13  ;;  %v3386_v13 = vld [vmem:[%s6764_s0 + $0x70] sm:$0xff] }
 0x746   :  { %v1696_v12 = vpop.f32.mrf.mxu0  ;;  %v1737_v14 = vpop.f32.mrf.mxu1 }
 0x747   :  { %v3388_v21 = vmul.f32 -1.442695, %v1742_v11  ;;  %v1743_v18 = vadd.f32 %v3385_v47, %v1696_v12  ;;  %v1745_v31 = vadd.f32 %v3387_v55, %v1737_v14  ;;  %v1744_v11 = vadd.f32 %v3386_v13, %v1735_v48 }
 0x748   :  { %v1698_v17 = vpop.f32.mrf.mxu0  ;;  %v1739_v15 = vpop.f32.mrf.mxu1 }
 0x749   :  { %3726 = vpow2.f32 %v3388_v21  ;;  %v3389_v23 = vmul.f32 -1.442695, %v1743_v18  ;;  %v3390_v16 = vmul.f32 -1.442695, %v1745_v31 }
 0x74a   :  { %v1699_v22 = vpop.f32.mrf.mxu0  ;;  %v1740_v59 = vpop.f32.mrf.mxu1 }
 0x74b   :  { %3728 = vpow2.f32 %v3389_v23 }
 0x74c   :  { %3730 = vpow2.f32 %v3390_v16 }
 0x756   :  { %v3727_v62 = vpop.eup %3726 }
 0x757   :  { %v1749_v47 = vadd.f32 1.0, %v3727_v62 }
 0x758   :  { %v3729_v17 = vpop.eup %3728 }
 0x759   :  { %3732 = vrcp.f32 %v1749_v47  ;;  %v1755_v18 = vadd.f32 1.0, %v3729_v17  ;;  %v3731_v21 = vpop.eup %3730 }
 0x75a   :  { %3734 = vtanh.f32 %v1744_v11  ;;  %v1762_v22 = vadd.f32 1.0, %v3731_v21 }
 0x75b   :  { %3736 = vrcp.f32 %v1755_v18 }
 0x75c   :  { %3738 = vrcp.f32 %v1762_v22 }
 0x766   :  { %v3733_v12 = vpop.eup %3732 }
 0x767   :  { %v3735_v15 = vpop.eup %3734 }
 0x768   :  { %v3737_v23 = vpop.eup %3736  ;;  %v1766_v55 = vmul.f32 %v3735_v15, %v3733_v12 }
 0x769   :  { %v1765_v14 = vmul.f32 %v3737_v23, %v5208_v1  ;;  %v3739_v62 = vpop.eup %3738  ;;  %v7358_v1 = vld [vmem:[#allocation63_spill] sm:$0xff] }
 0x76b   :  { %v5662_v59 = vadd.f32 %v1766_v55, %v1765_v14 }
 0x76d   :  { %3740 = vtanh.f32 %v5662_v59 }
 0x77a   :  { %v3741_v31 = vpop.eup %3740 }
 0x77b   :  { %v1769_v48 = vmul.f32 %v3741_v31, %v3739_v62  ;;  %v7366_v31 = vld [vmem:[#allocation36_spill] sm:$0xff] }
 0x77d   :  { %v5665_v13 = vpack.c.bf16 %v1769_v48, %v1769_v48  ;;  %v7368_v48 = vld [vmem:[#allocation38_spill] sm:$0xff] }
 0x77f   :  { %1804 = vmatmul.mubr.bf16.vlgmr.msra.gmra.mxu0 %v5665_v13  ;;  %1845 = vmatmul.mubr.bf16.vlgmr.msra.gmra.mxu1 %v5665_v13 }
 0x780   :  { %1883 = vmatpush1.bf16.msra.mxu0 %v4909_v61  ;;  %1924 = vmatpush1.bf16.msra.mxu1 %v4915_v42  ;;  %v7352_v61 = vld [vmem:[#allocation27_spill] sm:$0xff] }
 0x781   :  { %1884 = vmatprep.subr.bf16.mxu0 %v4921_v0  ;;  %1925 = vmatprep.subr.bf16.mxu1 %v4927_v56  ;;  %v7353_v42 = vld [vmem:[#allocation23_spill] sm:$0xff]  ;;  %v7354_v0 = vld [vmem:[#allocation28_spill] sm:$0xff]  ;;  %v7355_v56 = vld [vmem:[#allocation26_spill] sm:$0xff] }
 0x782   :  { %1914 = vmatprep.mubr.bf16.mxu0 %v7145_v58  ;;  %1955 = vmatprep.mubr.bf16.mxu1 %v7145_v58 }
 0x784   :  { %1885 = vmatpush1.bf16.msra.mxu0 %v4935_v6  ;;  %1926 = vmatpush1.bf16.msra.mxu1 %v4941_v37  ;;  %v7356_v6 = vld [vmem:[#allocation29_spill] sm:$0xff]  ;;  %v7357_v37 = vld [vmem:[#allocation62_spill] sm:$0xff] }
 0x785   :  { %1886 = vmatprep.subr.bf16.mxu0 %v4947_v51  ;;  %1927 = vmatprep.subr.bf16.mxu1 %v4953_v3  ;;  %v1608_v51 = vadd.f32 %v5641_v27, %v7357_v37 }
 0x788   :  { %1887 = vmatpush1.bf16.msra.mxu0 %v4959_v57  ;;  %1928 = vmatpush1.bf16.msra.mxu1 %v7279_v2  ;;  %v1610_v2 = vadd.f32 %v5645_v19, %v7358_v1 }
 0x789   :  { %1888 = vmatprep.subr.bf16.mxu0 %v7280_v32  ;;  %1929 = vmatprep.subr.bf16.mxu1 %v7281_v52 }
 0x78c   :  { %1889 = vmatpush1.bf16.msra.mxu0 %v7282_v49  ;;  %1930 = vmatpush1.bf16.msra.mxu1 %v7283_v8 }
 0x78d   :  { %1890 = vmatprep.subr.bf16.mxu0 %v7284_v63  ;;  %1931 = vmatprep.subr.bf16.mxu1 %v7285_v60 }
 0x790   :  { %1891 = vmatpush1.bf16.msra.mxu0 %v7286_v35  ;;  %1932 = vmatpush1.bf16.msra.mxu1 %v7287_v45 }
 0x791   :  { %1892 = vmatprep.subr.bf16.mxu0 %v7288_v33  ;;  %1933 = vmatprep.subr.bf16.mxu1 %v7289_v34 }
 0x794   :  { %1893 = vmatpush1.bf16.msra.mxu0 %v7290_v41  ;;  %1934 = vmatpush1.bf16.msra.mxu1 %v5241_v4  ;;  %v1651_v41 = vadd.f32 %v5647_v25, %v4792_v24 }
 0x795   :  { %1894 = vmatprep.subr.bf16.mxu0 %v7291_v5  ;;  %1935 = vmatprep.subr.bf16.mxu1 %v5248_v38 }
 0x798   :  { %1895 = vmatpush1.bf16.msra.mxu0 %v7292_v7  ;;  %1936 = vmatpush1.bf16.msra.mxu1 %v5255_v39  ;;  %v1649_v7 = vadd.f32 %v5643_v50, %v4794_v26 }
 0x799   :  { %1896 = vmatprep.subr.bf16.mxu0 %v7293_v10  ;;  %1937 = vmatprep.subr.bf16.mxu1 %v7352_v61 }
 0x79c   :  { %1897 = vmatpush1.bf16.msra.mxu0 %v7353_v42  ;;  %1938 = vmatpush1.bf16.msra.mxu1 %v7354_v0 }
 0x79d   :  { %1969 = vmatprep.subr.bf16.mxu0 %v7355_v56  ;;  %2010 = vmatprep.subr.bf16.mxu1 %v7356_v6 }
 0x83f   :  { %v1805_v3 = vpop.f32.mrf.mxu0  ;;  %v1846_v57 = vpop.f32.mrf.mxu1 }
 0x840   :  { %v1853_v32 = vadd.f32 %v1805_v3, %v1608_v51  ;;  %v1855_v10 = vadd.f32 %v1846_v57, %v1649_v7  ;;  %v7370_v51 = vld [vmem:[#allocation40_spill] sm:$0xff]  ;;  %v7371_v3 = vld [vmem:[#allocation41_spill] sm:$0xff]  ;;  %v7372_v57 = vld [vmem:[#allocation42_spill] sm:$0xff] }
 0x841   :  { %v1807_v52 = vpop.f32.mrf.mxu0  ;;  %v1848_v49 = vpop.f32.mrf.mxu1  ;;  %v7386_v7 = vld [vmem:[#allocation56_spill] sm:$0xff] }
 0x842   :  { %v3391_v8 = vmul.f32 -1.442695, %v1853_v32  ;;  %v1854_v63 = vadd.f32 %v1807_v52, %v1610_v2  ;;  %v1856_v5 = vadd.f32 %v1848_v49, %v1651_v41  ;;  %v7373_v2 = vld [vmem:[#allocation43_spill] sm:$0xff]  ;;  %v7374_v32 = vld [vmem:[#allocation44_spill] sm:$0xff]  ;;  %v7375_v52 = vld [vmem:[#allocation45_spill] sm:$0xff] }
 0x843   :  { %v1809_v60 = vpop.f32.mrf.mxu0  ;;  %v1850_v35 = vpop.f32.mrf.mxu1  ;;  %v7376_v49 = vld [vmem:[#allocation46_spill] sm:$0xff] }
 0x844   :  { %3742 = vpow2.f32 %v3391_v8  ;;  %v3392_v45 = vmul.f32 -1.442695, %v1854_v63  ;;  %v3393_v19 = vmul.f32 -1.442695, %v1856_v5  ;;  %v7377_v8 = vld [vmem:[#allocation47_spill] sm:$0xff]  ;;  %v7378_v63 = vld [vmem:[#allocation48_spill] sm:$0xff] }
 0x845   :  { %v1810_v33 = vpop.f32.mrf.mxu0  ;;  %v1851_v34 = vpop.f32.mrf.mxu1  ;;  %v7379_v60 = vld [vmem:[#allocation49_spill] sm:$0xff]  ;;  %v7380_v35 = vld [vmem:[#allocation50_spill] sm:$0xff]  ;;  %v7385_v5 = vld [vmem:[#allocation55_spill] sm:$0xff] }
 0x846   :  { %3744 = vpow2.f32 %v3392_v45  ;;  %v7381_v45 = vld [vmem:[#allocation51_spill] sm:$0xff]  ;;  %v7382_v33 = vld [vmem:[#allocation52_spill] sm:$0xff]  ;;  %v7383_v34 = vld [vmem:[#allocation53_spill] sm:$0xff] }
 0x847   :  { %3746 = vtanh.f32 %v1855_v10  ;;  %v7384_v41 = vld [vmem:[#allocation54_spill] sm:$0xff]  ;;  %v7387_v10 = vld [vmem:[#allocation57_spill] sm:$0xff] }
 0x848   :  { %3748 = vpow2.f32 %v3393_v19  ;;  %v7389_v19 = vld [vmem:[#allocation59_spill] sm:$0xff] }
 0x851   :  { %v3743_v27 = vpop.eup %3742 }
 0x852   :  { %v1860_v16 = vadd.f32 1.0, %v3743_v27  ;;  %v7390_v27 = vld [vmem:[#allocation60_spill] sm:$0xff] }
 0x853   :  { %v3745_v11 = vpop.eup %3744 }
 0x854   :  { %3750 = vrcp.f32 %v1860_v16  ;;  %v1866_v47 = vadd.f32 1.0, %v3745_v11  ;;  %v3747_v17 = vpop.eup %3746  ;;  %v7391_v16 = vld [vmem:[#allocation61_spill] sm:$0xff]  ;;  %v7392_v11 = vld [vmem:[#allocation8_spill] sm:$0xff] }
 0x855   :  { %v3749_v18 = vpop.eup %3748 }
 0x856   :  { %3752 = vrcp.f32 %v1866_v47  ;;  %v1873_v25 = vadd.f32 1.0, %v3749_v18  ;;  %v7393_v47 = vld [vmem:[#allocation12_spill] sm:$0xff]  ;;  %v7395_v18 = vld [vmem:[#allocation13_spill] sm:$0xff] }
 0x858   :  { %3754 = vrcp.f32 %v1873_v25  ;;  %v7399_v25 = vld [vmem:[#allocation17_spill] sm:$0xff] }
 0x861   :  { %v3751_v21 = vpop.eup %3750 }
 0x862   :  { %v1877_v12 = vmul.f32 %v3751_v21, %v3747_v17  ;;  %v7394_v17 = vld [vmem:[#allocation9_spill] sm:$0xff]  ;;  %v7396_v21 = vld [vmem:[#allocation10_spill] sm:$0xff] }
 0x863   :  { %v3753_v15 = vpop.eup %3752 }
 0x864   :  { %v1876_v23 = vmul.f32 %v3753_v15, %v5298_v43  ;;  %v7364_v43 = vld [vmem:[#allocation35_spill] sm:$0xff] }
 0x865   :  { %v3755_v50 = vpop.eup %3754  ;;  %v7398_v15 = vld [vmem:[#allocation11_spill] sm:$0xff] }
 0x866   :  { %v5712_v22 = vadd.f32 %v1877_v12, %v1876_v23  ;;  %v7397_v12 = vld [vmem:[#allocation16_spill] sm:$0xff]  ;;  %v7400_v23 = vld [vmem:[#allocation14_spill] sm:$0xff] }
 0x868   :  { %3756 = vtanh.f32 %v5712_v22 }
 0x875   :  { %v3757_v55 = vpop.eup %3756 }
 0x876   :  { %v1880_v14 = vmul.f32 %v3757_v55, %v3755_v50  ;;  %v7401_v50 = vld [vmem:[#allocation20_spill] sm:$0xff]  ;;  %v7402_v55 = vld [vmem:[#allocation15_spill] sm:$0xff] }
 0x878   :  { %v1881_v62 = vpack.c.bf16 %v1880_v14, %v1880_v14  ;;  %v7403_v14 = vld [vmem:[#allocation21_spill] sm:$0xff] }
 0x87a   :  { %1915 = vmatmul.mubr.bf16.vlgmr.msra.gmra.mxu0 %v1881_v62  ;;  %1956 = vmatmul.mubr.bf16.vlgmr.msra.gmra.mxu1 %v1881_v62  ;;  %v7404_v62 = vld [vmem:[#allocation18_spill] sm:$0xff] }
 0x87b   :  { %1970 = vmatpush1.bf16.msra.mxu0 %v5075_v9  ;;  %2011 = vmatpush1.bf16.msra.mxu1 %v5081_v53  ;;  %v7359_v9 = vld [vmem:[#allocation30_spill] sm:$0xff]  ;;  %v7360_v53 = vld [vmem:[#allocation31_spill] sm:$0xff] }
 0x87c   :  { %1971 = vmatprep.subr.bf16.mxu0 %v5087_v30  ;;  %2012 = vmatprep.subr.bf16.mxu1 %v5093_v36  ;;  %v7361_v30 = vld [vmem:[#allocation32_spill] sm:$0xff]  ;;  %v7362_v36 = vld [vmem:[#allocation33_spill] sm:$0xff] }
 0x87d   :  { %2001 = vmatprep.mubr.bf16.mxu0 %v7145_v58  ;;  %2042 = vmatprep.mubr.bf16.mxu1 %v7145_v58 }
 0x87f   :  { %1972 = vmatpush1.bf16.msra.mxu0 %v5101_v40  ;;  %2013 = vmatpush1.bf16.msra.mxu1 %v5311_v29  ;;  %v7363_v40 = vld [vmem:[#allocation34_spill] sm:$0xff] }
 0x880   :  { %1973 = vmatprep.subr.bf16.mxu0 %v5108_v54  ;;  %2014 = vmatprep.subr.bf16.mxu1 %v5318_v20  ;;  %v7365_v54 = vld [vmem:[#allocation7_spill] sm:$0xff] }
 0x883   :  { %1974 = vmatpush1.bf16.msra.mxu0 %v5115_v28  ;;  %2015 = vmatpush1.bf16.msra.mxu1 %v5325_v46  ;;  %v7367_v28 = vld [vmem:[#allocation37_spill] sm:$0xff] }
 0x884   :  { %1975 = vmatprep.subr.bf16.mxu0 %v5122_v44  ;;  %2016 = vmatprep.subr.bf16.mxu1 %v7359_v9  ;;  %v7369_v44 = vld [vmem:[#allocation39_spill] sm:$0xff] }
 0x887   :  { %1976 = vmatpush1.bf16.msra.mxu0 %v7360_v53  ;;  %2017 = vmatpush1.bf16.msra.mxu1 %v7361_v30 }
 0x888   :  { %1977 = vmatprep.subr.bf16.mxu0 %v7362_v36  ;;  %2018 = vmatprep.subr.bf16.mxu1 %v7363_v40 }
 0x88b   :  { %1978 = vmatpush1.bf16.msra.mxu0 %v7364_v43  ;;  %2019 = vmatpush1.bf16.msra.mxu1 %v7365_v54 }
 0x88c   :  { %1979 = vmatprep.subr.bf16.mxu0 %v7366_v31  ;;  %2020 = vmatprep.subr.bf16.mxu1 %v7367_v28 }
 0x88f   :  { %1980 = vmatpush1.bf16.msra.mxu0 %v7368_v48  ;;  %2021 = vmatpush1.bf16.msra.mxu1 %v7369_v44 }
 0x890   :  { %1981 = vmatprep.subr.bf16.mxu0 %v7370_v51  ;;  %2022 = vmatprep.subr.bf16.mxu1 %v7371_v3 }
 0x893   :  { %1982 = vmatpush1.bf16.msra.mxu0 %v7372_v57  ;;  %2023 = vmatpush1.bf16.msra.mxu1 %v7373_v2 }
 0x894   :  { %1983 = vmatprep.subr.bf16.mxu0 %v7374_v32  ;;  %2024 = vmatprep.subr.bf16.mxu1 %v7375_v52 }
 0x897   :  { %1984 = vmatpush1.bf16.msra.mxu0 %v7376_v49  ;;  %2025 = vmatpush1.bf16.msra.mxu1 %v7377_v8 }
 0x898   :  { %2080 = vmatprep.subr.bf16.mxu0 %v7378_v63  ;;  %2121 = vmatprep.subr.bf16.mxu1 %v7379_v60 }
 0x89a   :  { %2002 = vmatmul.mubr.bf16.vlgmr.msra.gmra.mxu0 %v5665_v13  ;;  %2043 = vmatmul.mubr.bf16.vlgmr.msra.gmra.mxu1 %v5665_v13  ;;  %v7388_v13 = vld [vmem:[#allocation58_spill] sm:$0xff] }
 0x89b   :  { %2081 = vmatpush1.bf16.msra.mxu0 %v7380_v35  ;;  %2122 = vmatpush1.bf16.msra.mxu1 %v7381_v45 }
 0x89c   :  { %2082 = vmatprep.subr.bf16.mxu0 %v7382_v33  ;;  %2123 = vmatprep.subr.bf16.mxu1 %v7383_v34 }
 0x89d   :  { %2112 = vmatprep.mubr.bf16.mxu0 %v7145_v58  ;;  %2153 = vmatprep.mubr.bf16.mxu1 %v7145_v58 }
 0x89f   :  { %2083 = vmatpush1.bf16.msra.mxu0 %v7384_v41  ;;  %2124 = vmatpush1.bf16.msra.mxu1 %v7385_v5 }
 0x8a0   :  { %2084 = vmatprep.subr.bf16.mxu0 %v7386_v7  ;;  %2125 = vmatprep.subr.bf16.mxu1 %v7387_v10  ;;  %v3397_v7 = vld [vmem:[%s6764_s0 + $0x98] sm:$0xff] }
 0x8a3   :  { %2085 = vmatpush1.bf16.msra.mxu0 %v7388_v13  ;;  %2126 = vmatpush1.bf16.msra.mxu1 %v7389_v19 }
 0x8a4   :  { %2086 = vmatprep.subr.bf16.mxu0 %v7390_v27  ;;  %2127 = vmatprep.subr.bf16.mxu1 %v7391_v16 }
 0x8a7   :  { %2087 = vmatpush1.bf16.msra.mxu0 %v7392_v11  ;;  %2128 = vmatpush1.bf16.msra.mxu1 %v7393_v47 }
 0x8a8   :  { %2088 = vmatprep.subr.bf16.mxu0 %v7394_v17  ;;  %2129 = vmatprep.subr.bf16.mxu1 %v7395_v18  ;;  %v7405_v17 = vld [vmem:[#allocation24_spill] sm:$0xff]  ;;  %v7406_v18 = vld [vmem:[#allocation19_spill] sm:$0xff] }
 0x8ab   :  { %2089 = vmatpush1.bf16.msra.mxu0 %v7396_v21  ;;  %2130 = vmatpush1.bf16.msra.mxu1 %v7397_v12  ;;  %v7407_v21 = vld [vmem:[#allocation25_spill] sm:$0xff]  ;;  %v7408_v12 = vld [vmem:[#allocation64_spill] sm:$0xff] }
 0x8ac   :  { %2090 = vmatprep.subr.bf16.mxu0 %v7398_v15  ;;  %2131 = vmatprep.subr.bf16.mxu1 %v7399_v25  ;;  %v7409_v15 = vld [vmem:[#allocation65_spill] sm:$0xff]  ;;  %v3394_v25 = vld [vmem:[%s6764_s0 + $0x80] sm:$0xff] }
 0x8af   :  { %2091 = vmatpush1.bf16.msra.mxu0 %v7400_v23  ;;  %2132 = vmatpush1.bf16.msra.mxu1 %v7401_v50  ;;  %v5786_v50 = vld [vmem:[%s6761_s3 + $0xe4] ss:$16 sps:$4 sm:$0xff]  }
 0x8b0   :  { %2092 = vmatprep.subr.bf16.mxu0 %v7402_v55  ;;  %2133 = vmatprep.subr.bf16.mxu1 %v7403_v14  ;;  %7410 = vst [vmem:[#allocation27_spill] sm:$0xff] %v5786_v50  ;;  %v7411_v14 = vld [vmem:[#allocation22_spill] sm:$0xff] }
 0x8b3   :  { %2093 = vmatpush1.bf16.msra.mxu0 %v7404_v62  ;;  %2134 = vmatpush1.bf16.msra.mxu1 %v7405_v17 }
 0x8b4   :  { %2094 = vmatprep.subr.bf16.mxu0 %v7406_v18  ;;  %2135 = vmatprep.subr.bf16.mxu1 %v7407_v21 }
 0x8b7   :  { %2095 = vmatpush1.bf16.msra.mxu0 %v7408_v12  ;;  %2136 = vmatpush1.bf16.msra.mxu1 %v7409_v15 }
 0x8b8   :  { %2191 = vmatprep.subr.bf16.mxu0 %v5786_v50  ;;  %2232 = vmatprep.subr.bf16.mxu1 %v7411_v14  ;;  %v3395_v14 = vld [vmem:[%s6764_s0 + $0x88] sm:$0xff] }
 0x93a   :  { %v5790_v62 = vpop.f32.mrf.mxu0  ;;  %v5792_v17 = vpop.f32.mrf.mxu1 }
 0x93c   :  { %v5794_v18 = vpop.f32.mrf.mxu0  ;;  %v5796_v21 = vpop.f32.mrf.mxu1 }
 0x93e   :  { %v1920_v12 = vpop.f32.mrf.mxu0  ;;  %v1961_v55 = vpop.f32.mrf.mxu1 }
 0x940   :  { %v1921_v15 = vpop.f32.mrf.mxu0  ;;  %v1962_v23 = vpop.f32.mrf.mxu1 }
 0x95a   :  { %v2003_v47 = vpop.f32.mrf.mxu0  ;;  %v2044_v50 = vpop.f32.mrf.mxu1 }
 0x95b   :  { %v2051_v11 = vadd.f32 %v3394_v25, %v2003_v47  ;;  %v3396_v47 = vld [vmem:[%s6764_s0 + $0x90] sm:$0xff] }
 0x95c   :  { %v2005_v16 = vpop.f32.mrf.mxu0  ;;  %v2046_v27 = vpop.f32.mrf.mxu1 }
 0x95d   :  { %v3398_v19 = vmul.f32 -1.442695, %v2051_v11  ;;  %v2052_v13 = vadd.f32 %v3395_v14, %v2005_v16  ;;  %v2054_v5 = vadd.f32 %v3397_v7, %v2046_v27  ;;  %v2053_v11 = vadd.f32 %v3396_v47, %v2044_v50 }
 0x95e   :  { %v2007_v10 = vpop.f32.mrf.mxu0  ;;  %v2048_v12 = vpop.f32.mrf.mxu1 }
 0x95f   :  { %3758 = vpow2.f32 %v3398_v19  ;;  %v3399_v15 = vmul.f32 -1.442695, %v2052_v13  ;;  %v3400_v25 = vmul.f32 -1.442695, %v2054_v5 }
 0x960   :  { %v2008_v23 = vpop.f32.mrf.mxu0  ;;  %v2049_v55 = vpop.f32.mrf.mxu1 }
 0x961   :  { %3760 = vpow2.f32 %v3399_v15 }
 0x962   :  { %3762 = vpow2.f32 %v3400_v25  ;;  %v5821_v25 = vld [vmem:[%s6761_s3 + $0xe0] ss:$16 sps:$4 sm:$0xff]  }
 0x96c   :  { %v3759_v41 = vpop.eup %3758 }
 0x96d   :  { %v2058_v16 = vadd.f32 1.0, %v3759_v41 }
 0x96e   :  { %v3761_v10 = vpop.eup %3760 }
 0x96f   :  { %3764 = vrcp.f32 %v2058_v16  ;;  %v2064_v13 = vadd.f32 1.0, %v3761_v10  ;;  %v3763_v19 = vpop.eup %3762  ;;  %v5839_v16 = vld [vmem:[%s6761_s3 + $0xcc] ss:$16 sps:$4 sm:$0xff]   ;;  %v5847_v10 = vld [vmem:[%s6761_s3 + $0xc0] ss:$16 sps:$4 sm:$0xff]  }
 0x970   :  { %3766 = vtanh.f32 %v2053_v11  ;;  %v2071_v23 = vadd.f32 1.0, %v3763_v19  ;;  %v5833_v11 = vld [vmem:[%s6761_s3 + $0xc4] ss:$16 sps:$4 sm:$0xff]  }
 0x971   :  { %3768 = vrcp.f32 %v2064_v13  ;;  %v5853_v13 = vld [vmem:[%s6761_s3 + $0xc8] ss:$16 sps:$4 sm:$0xff]   ;;  %v5859_v19 = vld [vmem:[%s6761_s3 + $0xa4] ss:$16 sps:$4 sm:$0xff]  }
 0x972   :  { %3770 = vrcp.f32 %v2071_v23  ;;  %v5883_v23 = vld [vmem:[%s6761_s3 + $0x84] ss:$16 sps:$4 sm:$0xff]  }
 0x973   :  { %7413 = vst [vmem:[#allocation28_spill] sm:$0xff] %v5883_v23 }
 0x97c   :  { %v3765_v14 = vpop.eup %3764 }
 0x97d   :  { %v3767_v12 = vpop.eup %3766 }
 0x97e   :  { %v3769_v15 = vpop.eup %3768  ;;  %v2075_v7 = vmul.f32 %v3767_v12, %v3765_v14  ;;  %v5865_v14 = vld [vmem:[%s6761_s3 + $0xac] ss:$16 sps:$4 sm:$0xff]   ;;  %v5871_v12 = vld [vmem:[%s6761_s3 + $0xa0] ss:$16 sps:$4 sm:$0xff]  }
 0x97f   :  { %v2074_v27 = vmul.f32 %v3769_v15, %v5662_v59  ;;  %v3771_v41 = vpop.eup %3770  ;;  %v5827_v59 = vld [vmem:[%s6761_s3 + $0xe8] ss:$16 sps:$4 sm:$0xff]  }
 0x980   :  { %v5877_v15 = vld [vmem:[%s6761_s3 + $0xa8] ss:$16 sps:$4 sm:$0xff]  }
 0x981   :  { %v5811_v55 = vadd.f32 %v2075_v7, %v2074_v27  ;;  %7412 = vst [vmem:[#allocation23_spill] sm:$0xff] %v5877_v15  ;;  %v5889_v7 = vld [vmem:[%s6761_s3 + $0x8c] ss:$16 sps:$4 sm:$0xff]   ;;  %v5895_v27 = vld [vmem:[%s6761_s3 + $0x80] ss:$16 sps:$4 sm:$0xff]  }
 0x982   :  { %7414 = vst [vmem:[#allocation26_spill] sm:$0xff] %v5889_v7  ;;  %7415 = vst [vmem:[#allocation29_spill] sm:$0xff] %v5895_v27 }
 0x983   :  { %3772 = vtanh.f32 %v5811_v55 }
 0x990   :  { %v3773_v5 = vpop.eup %3772 }
 0x991   :  { %v2078_v50 = vmul.f32 %v3773_v5, %v3771_v41  ;;  %v5901_v41 = vld [vmem:[%s6761_s3 + $0x88] ss:$16 sps:$4 sm:$0xff]   ;;  %v5907_v5 = vld [vmem:[%s6761_s3 + $0x64] ss:$16 sps:$4 sm:$0xff]  }
 0x992   :  { %7416 = vst [vmem:[#allocation30_spill] sm:$0xff] %v5901_v41  ;;  %7417 = vst [vmem:[#allocation31_spill] sm:$0xff] %v5907_v5 }
 0x993   :  { %v5814_v47 = vpack.c.bf16 %v2078_v50, %v2078_v50  ;;  %v5913_v50 = vld [vmem:[%s6761_s3 + $0x6c] ss:$16 sps:$4 sm:$0xff]  }
 0x994   :  { %7418 = vst [vmem:[#allocation32_spill] sm:$0xff] %v5913_v50 }
 0x995   :  { %2113 = vmatmul.mubr.bf16.vlgmr.msra.gmra.mxu0 %v5814_v47  ;;  %2154 = vmatmul.mubr.bf16.vlgmr.msra.gmra.mxu1 %v5814_v47 }
 0x996   :  { %2192 = vmatpush1.bf16.msra.mxu0 %v5821_v25  ;;  %2233 = vmatpush1.bf16.msra.mxu1 %v5827_v59 }
 0x997   :  { %2193 = vmatprep.subr.bf16.mxu0 %v5833_v11  ;;  %2234 = vmatprep.subr.bf16.mxu1 %v5839_v16 }
 0x998   :  { %2223 = vmatprep.mubr.bf16.mxu0 %v7145_v58  ;;  %2264 = vmatprep.mubr.bf16.mxu1 %v7145_v58 }
 0x99a   :  { %2194 = vmatpush1.bf16.msra.mxu0 %v5847_v10  ;;  %2235 = vmatpush1.bf16.msra.mxu1 %v5853_v13 }
 0x99b   :  { %2195 = vmatprep.subr.bf16.mxu0 %v5859_v19  ;;  %2236 = vmatprep.subr.bf16.mxu1 %v5865_v14 }
 0x99e   :  { %2196 = vmatpush1.bf16.msra.mxu0 %v5871_v12  ;;  %2237 = vmatpush1.bf16.msra.mxu1 %v5877_v15 }
 0x99f   :  { %2197 = vmatprep.subr.bf16.mxu0 %v5883_v23  ;;  %2238 = vmatprep.subr.bf16.mxu1 %v5889_v7 }
 0x9a2   :  { %2198 = vmatpush1.bf16.msra.mxu0 %v5895_v27  ;;  %2239 = vmatpush1.bf16.msra.mxu1 %v5901_v41  ;;  %v5919_v27 = vld [vmem:[%s6761_s3 + $0x60] ss:$16 sps:$4 sm:$0xff]   ;;  %v5925_v41 = vld [vmem:[%s6761_s3 + $0x68] ss:$16 sps:$4 sm:$0xff]  }
 0x9a3   :  { %2199 = vmatprep.subr.bf16.mxu0 %v5907_v5  ;;  %2240 = vmatprep.subr.bf16.mxu1 %v5913_v50  ;;  %7419 = vst [vmem:[#allocation33_spill] sm:$0xff] %v5919_v27  ;;  %7420 = vst [vmem:[#allocation34_spill] sm:$0xff] %v5925_v41  ;;  %v5931_v5 = vld [vmem:[%s6761_s3 + $0x44] ss:$16 sps:$4 sm:$0xff]   ;;  %v5937_v50 = vld [vmem:[%s6761_s3 + $0x4c] ss:$16 sps:$4 sm:$0xff]  }
 0x9a4   :  { %7421 = vst [vmem:[#allocation35_spill] sm:$0xff] %v5931_v5  ;;  %7422 = vst [vmem:[#allocation7_spill] sm:$0xff] %v5937_v50 }
 0x9a6   :  { %2200 = vmatpush1.bf16.msra.mxu0 %v5919_v27  ;;  %2241 = vmatpush1.bf16.msra.mxu1 %v5925_v41  ;;  %v5943_v27 = vld [vmem:[%s6761_s3 + $0x40] ss:$16 sps:$4 sm:$0xff]  }
 0x9a7   :  { %2201 = vmatprep.subr.bf16.mxu0 %v5931_v5  ;;  %2242 = vmatprep.subr.bf16.mxu1 %v5937_v50  ;;  %7423 = vst [vmem:[#allocation36_spill] sm:$0xff] %v5943_v27  ;;  %v5950_v5 = vld [vmem:[%s6761_s3 + $0x24] ss:$16 sps:$4 sm:$0xff]   ;;  %v5957_v50 = vld [vmem:[%s6761_s3 + $0x20] ss:$16 sps:$4 sm:$0xff]  }
 0x9a8   :  { %7424 = vst [vmem:[#allocation37_spill] sm:$0xff] %v5950_v5  ;;  %7425 = vst [vmem:[#allocation38_spill] sm:$0xff] %v5957_v50 }
 0x9aa   :  { %2202 = vmatpush1.bf16.msra.mxu0 %v5943_v27  ;;  %2243 = vmatpush1.bf16.msra.mxu1 %v5241_v4  ;;  %v5964_v4 = vld [vmem:[%s6761_s3 + $0x4] ss:$16 sps:$4 sm:$0xff]  }
 0x9ab   :  { %2203 = vmatprep.subr.bf16.mxu0 %v5950_v5  ;;  %2244 = vmatprep.subr.bf16.mxu1 %v5248_v38  ;;  %7426 = vst [vmem:[#allocation39_spill] sm:$0xff] %v5964_v4  ;;  %v1917_v38 = vadd.f32 %v5790_v62, %v7357_v37  ;;  %v1919_v5 = vadd.f32 %v5794_v18, %v7358_v1 }
 0x9ac   :  { %v1958_v37 = vadd.f32 %v5792_v17, %v4794_v26 }
 0x9ae   :  { %2204 = vmatpush1.bf16.msra.mxu0 %v5957_v50  ;;  %2245 = vmatpush1.bf16.msra.mxu1 %v5255_v39 }
 0x9af   :  { %2205 = vmatprep.subr.bf16.mxu0 %v5964_v4  ;;  %2246 = vmatprep.subr.bf16.mxu1 %v7352_v61 }
 0x9b2   :  { %2206 = vmatpush1.bf16.msra.mxu0 %v7353_v42  ;;  %2247 = vmatpush1.bf16.msra.mxu1 %v7354_v0 }
 0x9b3   :  { %2278 = vmatprep.subr.bf16.mxu0 %v7355_v56  ;;  %2319 = vmatprep.subr.bf16.mxu1 %v7356_v6  ;;  %v1960_v6 = vadd.f32 %v5796_v21, %v4792_v24 }
 0xa55   :  { %v2114_v39 = vpop.f32.mrf.mxu0  ;;  %v2155_v50 = vpop.f32.mrf.mxu1 }
 0xa56   :  { %v2162_v27 = vadd.f32 %v2114_v39, %v1917_v38  ;;  %v2164_v18 = vadd.f32 %v2155_v50, %v1958_v37 }
 0xa57   :  { %v2116_v4 = vpop.f32.mrf.mxu0  ;;  %v2157_v41 = vpop.f32.mrf.mxu1 }
 0xa58   :  { %v3401_v61 = vmul.f32 -1.442695, %v2162_v27  ;;  %v2163_v7 = vadd.f32 %v2116_v4, %v1919_v5  ;;  %v2165_v62 = vadd.f32 %v2157_v41, %v1960_v6  ;;  %v6005_v6 = vld [vmem:[%s6762_s1 + $0xcc] ss:$16 sps:$4 sm:$0xff]  }
 0xa59   :  { %v2118_v42 = vpop.f32.mrf.mxu0  ;;  %v2159_v23 = vpop.f32.mrf.mxu1 }
 0xa5a   :  { %3774 = vpow2.f32 %v3401_v61  ;;  %v3402_v0 = vmul.f32 -1.442695, %v2163_v7  ;;  %v3403_v38 = vmul.f32 -1.442695, %v2165_v62  ;;  %v6013_v62 = vld [vmem:[%s6762_s1 + $0xc0] ss:$16 sps:$4 sm:$0xff]  }
 0xa5b   :  { %v2119_v56 = vpop.f32.mrf.mxu0  ;;  %v2160_v15 = vpop.f32.mrf.mxu1 }
 0xa5c   :  { %3776 = vpow2.f32 %v3402_v0  ;;  %v5999_v56 = vld [vmem:[%s6762_s1 + $0xc4] ss:$16 sps:$4 sm:$0xff]  }
 0xa5d   :  { %3778 = vtanh.f32 %v2164_v18  ;;  %v6020_v18 = vld [vmem:[%s6762_s1 + $0xa4] ss:$16 sps:$4 sm:$0xff]  }
 0xa5e   :  { %3780 = vpow2.f32 %v3403_v38  ;;  %v6027_v38 = vld [vmem:[%s6762_s1 + $0xa0] ss:$16 sps:$4 sm:$0xff]  }
 0xa67   :  { %v3775_v39 = vpop.eup %3774 }
 0xa68   :  { %v2169_v1 = vadd.f32 1.0, %v3775_v39 }
 0xa69   :  { %v3777_v27 = vpop.eup %3776 }
 0xa6a   :  { %3782 = vrcp.f32 %v2169_v1  ;;  %v2175_v23 = vadd.f32 1.0, %v3777_v27  ;;  %v3779_v7 = vpop.eup %3778  ;;  %v5987_v1 = vld [vmem:[%s6762_s1 + $0xe0] ss:$16 sps:$4 sm:$0xff]  }
 0xa6b   :  { %v3781_v15 = vpop.eup %3780 }
 0xa6c   :  { %3784 = vrcp.f32 %v2175_v23  ;;  %v2182_v21 = vadd.f32 1.0, %v3781_v15 }
 0xa6e   :  { %3786 = vrcp.f32 %v2182_v21  ;;  %v3404_v21 = vld [vmem:[%s6764_s0 + $0xa0] sm:$0xff] }
 0xa77   :  { %v3783_v5 = vpop.eup %3782 }
 0xa78   :  { %v2186_v4 = vmul.f32 %v3783_v5, %v3779_v7 }
 0xa79   :  { %v3785_v61 = vpop.eup %3784 }
 0xa7a   :  { %v2185_v41 = vmul.f32 %v3785_v61, %v5712_v22  ;;  %v5993_v22 = vld [vmem:[%s6762_s1 + $0xe8] ss:$16 sps:$4 sm:$0xff]  }
 0xa7b   :  { %v3787_v37 = vpop.eup %3786 }
 0xa7c   :  { %v5981_v42 = vadd.f32 %v2186_v4, %v2185_v41 }
 0xa7e   :  { %3788 = vtanh.f32 %v5981_v42 }
 0xa8b   :  { %v3789_v17 = vpop.eup %3788 }
 0xa8c   :  { %v2189_v50 = vmul.f32 %v3789_v17, %v3787_v37  ;;  %v3405_v17 = vld [vmem:[%s6764_s0 + $0xa8] sm:$0xff] }
 0xa8e   :  { %v2190_v0 = vpack.c.bf16 %v2189_v50, %v2189_v50 }
 0xa90   :  { %2224 = vmatmul.mubr.bf16.vlgmr.msra.gmra.mxu0 %v2190_v0  ;;  %2265 = vmatmul.mubr.bf16.vlgmr.msra.gmra.mxu1 %v2190_v0 }
 0xa91   :  { %2279 = vmatpush1.bf16.msra.mxu0 %v5987_v1  ;;  %2320 = vmatpush1.bf16.msra.mxu1 %v5993_v22 }
 0xa92   :  { %2280 = vmatprep.subr.bf16.mxu0 %v5999_v56  ;;  %2321 = vmatprep.subr.bf16.mxu1 %v6005_v6 }
 0xa93   :  { %2310 = vmatprep.mubr.bf16.mxu0 %v7145_v58  ;;  %2351 = vmatprep.mubr.bf16.mxu1 %v7145_v58 }
 0xa95   :  { %2281 = vmatpush1.bf16.msra.mxu0 %v6013_v62  ;;  %2322 = vmatpush1.bf16.msra.mxu1 %v5311_v29  ;;  %v6034_v29 = vld [vmem:[%s6762_s1 + $0x84] ss:$16 sps:$4 sm:$0xff]  }
 0xa96   :  { %2282 = vmatprep.subr.bf16.mxu0 %v6020_v18  ;;  %2323 = vmatprep.subr.bf16.mxu1 %v5318_v20  ;;  %v7427_v20 = vld [vmem:[#allocation54_spill] sm:$0xff] }
 0xa99   :  { %2283 = vmatpush1.bf16.msra.mxu0 %v6027_v38  ;;  %2324 = vmatpush1.bf16.msra.mxu1 %v5325_v46  ;;  %v7428_v46 = vld [vmem:[#allocation55_spill] sm:$0xff] }
 0xa9a   :  { %2284 = vmatprep.subr.bf16.mxu0 %v6034_v29  ;;  %2325 = vmatprep.subr.bf16.mxu1 %v7359_v9  ;;  %v7429_v9 = vld [vmem:[#allocation56_spill] sm:$0xff] }
 0xa9d   :  { %2285 = vmatpush1.bf16.msra.mxu0 %v7360_v53  ;;  %2326 = vmatpush1.bf16.msra.mxu1 %v7361_v30  ;;  %v7430_v53 = vld [vmem:[#allocation57_spill] sm:$0xff]  ;;  %v7431_v30 = vld [vmem:[#allocation58_spill] sm:$0xff] }
 0xa9e   :  { %2286 = vmatprep.subr.bf16.mxu0 %v7362_v36  ;;  %2327 = vmatprep.subr.bf16.mxu1 %v7363_v40  ;;  %v7432_v36 = vld [vmem:[#allocation59_spill] sm:$0xff]  ;;  %v7433_v40 = vld [vmem:[#allocation60_spill] sm:$0xff] }
 0xaa1   :  { %2287 = vmatpush1.bf16.msra.mxu0 %v7364_v43  ;;  %2328 = vmatpush1.bf16.msra.mxu1 %v7365_v54  ;;  %v7434_v43 = vld [vmem:[#allocation61_spill] sm:$0xff]  ;;  %v7435_v54 = vld [vmem:[#allocation8_spill] sm:$0xff] }
 0xaa2   :  { %2288 = vmatprep.subr.bf16.mxu0 %v7366_v31  ;;  %2329 = vmatprep.subr.bf16.mxu1 %v7367_v28  ;;  %v7436_v31 = vld [vmem:[#allocation12_spill] sm:$0xff]  ;;  %v7437_v28 = vld [vmem:[#allocation9_spill] sm:$0xff] }
 0xaa5   :  { %2289 = vmatpush1.bf16.msra.mxu0 %v7368_v48  ;;  %2330 = vmatpush1.bf16.msra.mxu1 %v7369_v44  ;;  %v7438_v48 = vld [vmem:[#allocation13_spill] sm:$0xff]  ;;  %v7439_v44 = vld [vmem:[#allocation10_spill] sm:$0xff] }
 0xaa6   :  { %2290 = vmatprep.subr.bf16.mxu0 %v7370_v51  ;;  %2331 = vmatprep.subr.bf16.mxu1 %v7371_v3  ;;  %v7440_v51 = vld [vmem:[#allocation16_spill] sm:$0xff]  ;;  %v7441_v3 = vld [vmem:[#allocation11_spill] sm:$0xff] }
 0xaa9   :  { %2291 = vmatpush1.bf16.msra.mxu0 %v7372_v57  ;;  %2332 = vmatpush1.bf16.msra.mxu1 %v7373_v2  ;;  %v7442_v57 = vld [vmem:[#allocation17_spill] sm:$0xff]  ;;  %v7443_v2 = vld [vmem:[#allocation14_spill] sm:$0xff] }
 0xaaa   :  { %2292 = vmatprep.subr.bf16.mxu0 %v7374_v32  ;;  %2333 = vmatprep.subr.bf16.mxu1 %v7375_v52  ;;  %v7444_v32 = vld [vmem:[#allocation20_spill] sm:$0xff]  ;;  %v7445_v52 = vld [vmem:[#allocation15_spill] sm:$0xff] }
 0xaad   :  { %2293 = vmatpush1.bf16.msra.mxu0 %v7376_v49  ;;  %2334 = vmatpush1.bf16.msra.mxu1 %v7377_v8  ;;  %v7446_v49 = vld [vmem:[#allocation21_spill] sm:$0xff]  ;;  %v7447_v8 = vld [vmem:[#allocation18_spill] sm:$0xff] }
 0xaae   :  { %2389 = vmatprep.subr.bf16.mxu0 %v7378_v63  ;;  %2430 = vmatprep.subr.bf16.mxu1 %v7379_v60  ;;  %v7448_v63 = vld [vmem:[#allocation24_spill] sm:$0xff]  ;;  %v7449_v60 = vld [vmem:[#allocation19_spill] sm:$0xff] }
 0xab0   :  { %2311 = vmatmul.mubr.bf16.vlgmr.msra.gmra.mxu0 %v5814_v47  ;;  %2352 = vmatmul.mubr.bf16.vlgmr.msra.gmra.mxu1 %v5814_v47  ;;  %v6096_v47 = vld [vmem:[%s6761_s3 + $0xec] ss:$16 sps:$4 sm:$0xff]  }
 0xab1   :  { %2390 = vmatpush1.bf16.msra.mxu0 %v7380_v35  ;;  %2431 = vmatpush1.bf16.msra.mxu1 %v7381_v45  ;;  %v7450_v35 = vld [vmem:[#allocation25_spill] sm:$0xff]  ;;  %v7451_v45 = vld [vmem:[#allocation64_spill] sm:$0xff] }
 0xab2   :  { %2391 = vmatprep.subr.bf16.mxu0 %v7382_v33  ;;  %2432 = vmatprep.subr.bf16.mxu1 %v7383_v34  ;;  %v7452_v33 = vld [vmem:[#allocation65_spill] sm:$0xff]  ;;  %v7453_v34 = vld [vmem:[#allocation27_spill] sm:$0xff] }
 0xab3   :  { %2421 = vmatprep.mubr.bf16.mxu0 %v7145_v58  ;;  %2462 = vmatprep.mubr.bf16.mxu1 %v7145_v58 }
 0xab5   :  { %2392 = vmatpush1.bf16.msra.mxu0 %v7427_v20  ;;  %2433 = vmatpush1.bf16.msra.mxu1 %v7428_v46 }
 0xab6   :  { %2393 = vmatprep.subr.bf16.mxu0 %v7429_v9  ;;  %2434 = vmatprep.subr.bf16.mxu1 %v7430_v53 }
 0xab9   :  { %2394 = vmatpush1.bf16.msra.mxu0 %v7431_v30  ;;  %2435 = vmatpush1.bf16.msra.mxu1 %v7432_v36 }
 0xaba   :  { %2395 = vmatprep.subr.bf16.mxu0 %v7433_v40  ;;  %2436 = vmatprep.subr.bf16.mxu1 %v7434_v43 }
 0xabd   :  { %2396 = vmatpush1.bf16.msra.mxu0 %v7435_v54  ;;  %2437 = vmatpush1.bf16.msra.mxu1 %v7436_v31  ;;  %v3407_v54 = vld [vmem:[%s6764_s0 + $0xb8] sm:$0xff] }
 0xabe   :  { %2397 = vmatprep.subr.bf16.mxu0 %v7437_v28  ;;  %2438 = vmatprep.subr.bf16.mxu1 %v7438_v48  ;;  %v3406_v28 = vld [vmem:[%s6764_s0 + $0xb0] sm:$0xff] }
 0xac1   :  { %2398 = vmatpush1.bf16.msra.mxu0 %v7439_v44  ;;  %2439 = vmatpush1.bf16.msra.mxu1 %v7440_v51 }
 0xac2   :  { %2399 = vmatprep.subr.bf16.mxu0 %v7441_v3  ;;  %2440 = vmatprep.subr.bf16.mxu1 %v7442_v57 }
 0xac5   :  { %2400 = vmatpush1.bf16.msra.mxu0 %v7443_v2  ;;  %2441 = vmatpush1.bf16.msra.mxu1 %v7444_v32 }
 0xac6   :  { %2401 = vmatprep.subr.bf16.mxu0 %v7445_v52  ;;  %2442 = vmatprep.subr.bf16.mxu1 %v7446_v49 }
 0xac9   :  { %2402 = vmatpush1.bf16.msra.mxu0 %v7447_v8  ;;  %2443 = vmatpush1.bf16.msra.mxu1 %v7448_v63 }
 0xaca   :  { %2403 = vmatprep.subr.bf16.mxu0 %v7449_v60  ;;  %2444 = vmatprep.subr.bf16.mxu1 %v7450_v35 }
 0xacd   :  { %2404 = vmatpush1.bf16.msra.mxu0 %v7451_v45  ;;  %2445 = vmatpush1.bf16.msra.mxu1 %v7452_v33 }
 0xace   :  { %2500 = vmatprep.subr.bf16.mxu0 %v7453_v34  ;;  %2541 = vmatprep.subr.bf16.mxu1 %v6096_v47 }
 0xb50   :  { %v6099_v39 = vpop.f32.mrf.mxu0  ;;  %v6101_v27 = vpop.f32.mrf.mxu1 }
 0xb52   :  { %v6103_v23 = vpop.f32.mrf.mxu0  ;;  %v6105_v7 = vpop.f32.mrf.mxu1 }
 0xb54   :  { %v2229_v15 = vpop.f32.mrf.mxu0  ;;  %v2270_v5 = vpop.f32.mrf.mxu1 }
 0xb56   :  { %v2230_v4 = vpop.f32.mrf.mxu0  ;;  %v2271_v61 = vpop.f32.mrf.mxu1 }
 0xb57   :  { %v7455_v61 = vld [vmem:[#allocation28_spill] sm:$0xff] }
 0xb70   :  { %v2312_v41 = vpop.f32.mrf.mxu0  ;;  %v2353_v37 = vpop.f32.mrf.mxu1 }
 0xb71   :  { %v2360_v50 = vadd.f32 %v3404_v21, %v2312_v41  ;;  %v2362_v51 = vadd.f32 %v3406_v28, %v2353_v37  ;;  %v7456_v21 = vld [vmem:[#allocation26_spill] sm:$0xff]  ;;  %v7457_v41 = vld [vmem:[#allocation29_spill] sm:$0xff] }
 0xb72   :  { %v2314_v0 = vpop.f32.mrf.mxu0  ;;  %v2355_v20 = vpop.f32.mrf.mxu1  ;;  %v7458_v37 = vld [vmem:[#allocation30_spill] sm:$0xff] }
 0xb73   :  { %v3408_v46 = vmul.f32 -1.442695, %v2360_v50  ;;  %v2361_v9 = vadd.f32 %v3405_v17, %v2314_v0  ;;  %v2363_v31 = vadd.f32 %v3407_v54, %v2355_v20  ;;  %v7459_v17 = vld [vmem:[#allocation31_spill] sm:$0xff]  ;;  %v7460_v50 = vld [vmem:[#allocation32_spill] sm:$0xff]  ;;  %v7461_v0 = vld [vmem:[#allocation33_spill] sm:$0xff] }
 0xb74   :  { %v2316_v53 = vpop.f32.mrf.mxu0  ;;  %v2357_v30 = vpop.f32.mrf.mxu1  ;;  %v7462_v20 = vld [vmem:[#allocation34_spill] sm:$0xff] }
 0xb75   :  { %3790 = vpow2.f32 %v3408_v46  ;;  %v3409_v36 = vmul.f32 -1.442695, %v2361_v9  ;;  %v3410_v48 = vmul.f32 -1.442695, %v2363_v31  ;;  %v7463_v46 = vld [vmem:[#allocation35_spill] sm:$0xff]  ;;  %v7465_v53 = vld [vmem:[#allocation36_spill] sm:$0xff] }
 0xb76   :  { %v2317_v40 = vpop.f32.mrf.mxu0  ;;  %v2358_v43 = vpop.f32.mrf.mxu1  ;;  %v7464_v9 = vld [vmem:[#allocation7_spill] sm:$0xff]  ;;  %v6174_v28 = vld [vmem:[%s6761_s3 + $0xc] ss:$16 sps:$4 sm:$0xff]  }
 0xb77   :  { %3792 = vpow2.f32 %v3409_v36  ;;  %v6153_v30 = vld [vmem:[%s6761_s3 + $0x48] ss:$16 sps:$4 sm:$0xff]   ;;  %v6160_v40 = vld [vmem:[%s6761_s3 + $0x2c] ss:$16 sps:$4 sm:$0xff]   ;;  %7469 = vst [vmem:[#allocation40_spill] sm:$0xff] %v6174_v28 }
 0xb78   :  { %3794 = vpow2.f32 %v3410_v48  ;;  %v7466_v36 = vld [vmem:[#allocation37_spill] sm:$0xff]  ;;  %v7467_v43 = vld [vmem:[#allocation38_spill] sm:$0xff]  ;;  %v7468_v31 = vld [vmem:[#allocation39_spill] sm:$0xff] }
 0xb79   :  { %v6167_v54 = vld [vmem:[%s6761_s3 + $0x28] ss:$16 sps:$4 sm:$0xff]   ;;  %v6180_v48 = vld [vmem:[%s6761_s3] ss:$16 sps:$4 sm:$0xff]  }
 0xb7a   :  { %7470 = vst [vmem:[#allocation41_spill] sm:$0xff] %v6180_v48 }
 0xb82   :  { %v3791_v44 = vpop.eup %3790 }
 0xb83   :  { %v2367_v3 = vadd.f32 1.0, %v3791_v44  ;;  %v6186_v44 = vld [vmem:[%s6761_s3 + $0x8] ss:$16 sps:$4 sm:$0xff]  }
 0xb84   :  { %v3793_v57 = vpop.eup %3792  ;;  %7471 = vst [vmem:[#allocation42_spill] sm:$0xff] %v6186_v44 }
 0xb85   :  { %3796 = vrcp.f32 %v2367_v3  ;;  %v2373_v2 = vadd.f32 1.0, %v3793_v57  ;;  %v3795_v32 = vpop.eup %3794  ;;  %v6198_v3 = vld [vmem:[%s6762_s1 + $0xec] ss:$16 sps:$4 sm:$0xff]  }
 0xb86   :  { %3798 = vtanh.f32 %v2362_v51  ;;  %v2380_v63 = vadd.f32 1.0, %v3795_v32  ;;  %v6192_v51 = vld [vmem:[%s6762_s1 + $0xe4] ss:$16 sps:$4 sm:$0xff]   ;;  %7473 = vst [vmem:[#allocation44_spill] sm:$0xff] %v6198_v3  ;;  %v7474_v57 = vld [vmem:[#allocation62_spill] sm:$0xff] }
 0xb87   :  { %3800 = vrcp.f32 %v2373_v2  ;;  %7472 = vst [vmem:[#allocation43_spill] sm:$0xff] %v6192_v51  ;;  %v2226_v2 = vadd.f32 %v6099_v39, %v7474_v57  ;;  %v2269_v39 = vadd.f32 %v6105_v7, %v4792_v24 }
 0xb88   :  { %3802 = vrcp.f32 %v2380_v63 }
 0xb92   :  { %v3797_v52 = vpop.eup %3796 }
 0xb93   :  { %v3799_v49 = vpop.eup %3798 }
 0xb94   :  { %v3801_v8 = vpop.eup %3800  ;;  %v2384_v60 = vmul.f32 %v3799_v49, %v3797_v52  ;;  %v7475_v49 = vld [vmem:[#allocation63_spill] sm:$0xff] }
 0xb95   :  { %v2383_v35 = vmul.f32 %v3801_v8, %v5811_v55  ;;  %v3803_v33 = vpop.eup %3802  ;;  %v7454_v55 = vld [vmem:[#allocation23_spill] sm:$0xff]  ;;  %v2228_v8 = vadd.f32 %v6103_v23, %v7475_v49 }
 0xb97   :  { %v6120_v45 = vadd.f32 %v2384_v60, %v2383_v35 }
 0xb99   :  { %3804 = vtanh.f32 %v6120_v45 }
 0xba6   :  { %v3805_v15 = vpop.eup %3804 }
 0xba7   :  { %v2387_v5 = vmul.f32 %v3805_v15, %v3803_v33 }
 0xba9   :  { %v6123_v4 = vpack.c.bf16 %v2387_v5, %v2387_v5 }
 0xbab   :  { %2422 = vmatmul.mubr.bf16.vlgmr.msra.gmra.mxu0 %v6123_v4  ;;  %2463 = vmatmul.mubr.bf16.vlgmr.msra.gmra.mxu1 %v6123_v4 }
 0xbac   :  { %2501 = vmatpush1.bf16.msra.mxu0 %v5821_v25  ;;  %2542 = vmatpush1.bf16.msra.mxu1 %v5827_v59 }
 0xbad   :  { %2502 = vmatprep.subr.bf16.mxu0 %v5833_v11  ;;  %2543 = vmatprep.subr.bf16.mxu1 %v5839_v16 }
 0xbae   :  { %2532 = vmatprep.mubr.bf16.mxu0 %v7145_v58  ;;  %2573 = vmatprep.mubr.bf16.mxu1 %v7145_v58 }
 0xbb0   :  { %2503 = vmatpush1.bf16.msra.mxu0 %v5847_v10  ;;  %2544 = vmatpush1.bf16.msra.mxu1 %v5853_v13 }
 0xbb1   :  { %2504 = vmatprep.subr.bf16.mxu0 %v5859_v19  ;;  %2545 = vmatprep.subr.bf16.mxu1 %v5865_v14 }
 0xbb4   :  { %2505 = vmatpush1.bf16.msra.mxu0 %v5871_v12  ;;  %2546 = vmatpush1.bf16.msra.mxu1 %v7454_v55 }
 0xbb5   :  { %2506 = vmatprep.subr.bf16.mxu0 %v7455_v61  ;;  %2547 = vmatprep.subr.bf16.mxu1 %v7456_v21 }
 0xbb8   :  { %2507 = vmatpush1.bf16.msra.mxu0 %v7457_v41  ;;  %2548 = vmatpush1.bf16.msra.mxu1 %v7458_v37 }
 0xbb9   :  { %2508 = vmatprep.subr.bf16.mxu0 %v7459_v17  ;;  %2549 = vmatprep.subr.bf16.mxu1 %v7460_v50 }
 0xbbc   :  { %2509 = vmatpush1.bf16.msra.mxu0 %v7461_v0  ;;  %2550 = vmatpush1.bf16.msra.mxu1 %v7462_v20 }
 0xbbd   :  { %2510 = vmatprep.subr.bf16.mxu0 %v7463_v46  ;;  %2551 = vmatprep.subr.bf16.mxu1 %v7464_v9 }
 0xbc0   :  { %2511 = vmatpush1.bf16.msra.mxu0 %v7465_v53  ;;  %2552 = vmatpush1.bf16.msra.mxu1 %v6153_v30 }
 0xbc1   :  { %2512 = vmatprep.subr.bf16.mxu0 %v7466_v36  ;;  %2553 = vmatprep.subr.bf16.mxu1 %v6160_v40 }
 0xbc4   :  { %2513 = vmatpush1.bf16.msra.mxu0 %v7467_v43  ;;  %2554 = vmatpush1.bf16.msra.mxu1 %v6167_v54 }
 0xbc5   :  { %2514 = vmatprep.subr.bf16.mxu0 %v7468_v31  ;;  %2555 = vmatprep.subr.bf16.mxu1 %v6174_v28 }
 0xbc8   :  { %2515 = vmatpush1.bf16.msra.mxu0 %v6180_v48  ;;  %2556 = vmatpush1.bf16.msra.mxu1 %v6186_v44 }
 0xbc9   :  { %2587 = vmatprep.subr.bf16.mxu0 %v6192_v51  ;;  %2628 = vmatprep.subr.bf16.mxu1 %v6198_v3  ;;  %v2267_v3 = vadd.f32 %v6101_v27, %v4794_v26 }
 0xc6b   :  { %v2423_v32 = vpop.f32.mrf.mxu0  ;;  %v2464_v52 = vpop.f32.mrf.mxu1 }
 0xc6c   :  { %v2471_v63 = vadd.f32 %v2423_v32, %v2226_v2  ;;  %v2473_v23 = vadd.f32 %v2464_v52, %v2267_v3 }
 0xc6d   :  { %v2425_v60 = vpop.f32.mrf.mxu0  ;;  %v2466_v35 = vpop.f32.mrf.mxu1 }
 0xc6e   :  { %v3411_v33 = vmul.f32 -1.442695, %v2471_v63  ;;  %v2472_v15 = vadd.f32 %v2425_v60, %v2228_v8  ;;  %v2474_v57 = vadd.f32 %v2466_v35, %v2269_v39  ;;  %v6250_v39 = vld [vmem:[%s6762_s1 + $0x80] ss:$16 sps:$4 sm:$0xff]  }
 0xc6f   :  { %v2427_v5 = vpop.f32.mrf.mxu0  ;;  %v2468_v51 = vpop.f32.mrf.mxu1  ;;  %7477 = vst [vmem:[#allocation46_spill] sm:$0xff] %v6250_v39 }
 0xc70   :  { %3806 = vpow2.f32 %v3411_v33  ;;  %v3412_v44 = vmul.f32 -1.442695, %v2472_v15  ;;  %v3413_v2 = vmul.f32 -1.442695, %v2474_v57  ;;  %v6237_v15 = vld [vmem:[%s6762_s1 + $0xa8] ss:$16 sps:$4 sm:$0xff]  }
 0xc71   :  { %v2428_v48 = vpop.f32.mrf.mxu0  ;;  %v2469_v28 = vpop.f32.mrf.mxu1  ;;  %v6244_v5 = vld [vmem:[%s6762_s1 + $0x8c] ss:$16 sps:$4 sm:$0xff]  }
 0xc72   :  { %3808 = vpow2.f32 %v3412_v44  ;;  %7476 = vst [vmem:[#allocation45_spill] sm:$0xff] %v6244_v5 }
 0xc73   :  { %3810 = vtanh.f32 %v2473_v23  ;;  %v6256_v23 = vld [vmem:[%s6762_s1 + $0x88] ss:$16 sps:$4 sm:$0xff]  }
 0xc74   :  { %3812 = vpow2.f32 %v3413_v2  ;;  %7478 = vst [vmem:[#allocation47_spill] sm:$0xff] %v6256_v23  ;;  %v6262_v2 = vld [vmem:[%s6762_s1 + $0x64] ss:$16 sps:$4 sm:$0xff]  }
 0xc75   :  { %7479 = vst [vmem:[#allocation48_spill] sm:$0xff] %v6262_v2 }
 0xc7d   :  { %v3807_v32 = vpop.eup %3806 }
 0xc7e   :  { %v2478_v49 = vadd.f32 1.0, %v3807_v32  ;;  %v6268_v32 = vld [vmem:[%s6762_s1 + $0x6c] ss:$16 sps:$4 sm:$0xff]  }
 0xc7f   :  { %v3809_v8 = vpop.eup %3808  ;;  %7480 = vst [vmem:[#allocation49_spill] sm:$0xff] %v6268_v32 }
 0xc80   :  { %3814 = vrcp.f32 %v2478_v49  ;;  %v2484_v51 = vadd.f32 1.0, %v3809_v8  ;;  %v3811_v48 = vpop.eup %3810  ;;  %v6230_v49 = vld [vmem:[%s6762_s1 + $0xac] ss:$16 sps:$4 sm:$0xff]   ;;  %v6274_v8 = vld [vmem:[%s6762_s1 + $0x60] ss:$16 sps:$4 sm:$0xff]  }
 0xc81   :  { %v3813_v28 = vpop.eup %3812  ;;  %7481 = vst [vmem:[#allocation50_spill] sm:$0xff] %v6274_v8 }
 0xc82   :  { %3816 = vrcp.f32 %v2484_v51  ;;  %v2491_v7 = vadd.f32 1.0, %v3813_v28  ;;  %v6280_v51 = vld [vmem:[%s6762_s1 + $0x68] ss:$16 sps:$4 sm:$0xff]   ;;  %v6292_v28 = vld [vmem:[%s6762_s1 + $0x4c] ss:$16 sps:$4 sm:$0xff]  }
 0xc83   :  { %7482 = vst [vmem:[#allocation51_spill] sm:$0xff] %v6280_v51  ;;  %7484 = vst [vmem:[#allocation53_spill] sm:$0xff] %v6292_v28 }
 0xc84   :  { %3818 = vrcp.f32 %v2491_v7  ;;  %v6316_v7 = vld [vmem:[%s6762_s1 + $0x2c] ss:$16 sps:$4 sm:$0xff]  }
 0xc85   :  { %7488 = vst [vmem:[#allocation56_spill] sm:$0xff] %v6316_v7 }
 0xc8d   :  { %v3815_v44 = vpop.eup %3814 }
 0xc8e   :  { %v2495_v63 = vmul.f32 %v3815_v44, %v3811_v48  ;;  %v6286_v48 = vld [vmem:[%s6762_s1 + $0x44] ss:$16 sps:$4 sm:$0xff]   ;;  %v6298_v44 = vld [vmem:[%s6762_s1 + $0x40] ss:$16 sps:$4 sm:$0xff]  }
 0xc8f   :  { %v3817_v60 = vpop.eup %3816  ;;  %7483 = vst [vmem:[#allocation52_spill] sm:$0xff] %v6286_v48  ;;  %7485 = vst [vmem:[#allocation22_spill] sm:$0xff] %v6298_v44 }
 0xc90   :  { %v2494_v35 = vmul.f32 %v3817_v60, %v5981_v42  ;;  %v6223_v42 = vld [vmem:[%s6762_s1 + $0xc8] ss:$16 sps:$4 sm:$0xff]   ;;  %v6310_v60 = vld [vmem:[%s6762_s1 + $0x24] ss:$16 sps:$4 sm:$0xff]  }
 0xc91   :  { %v3819_v27 = vpop.eup %3818  ;;  %7487 = vst [vmem:[#allocation55_spill] sm:$0xff] %v6310_v60 }
 0xc92   :  { %v6210_v33 = vadd.f32 %v2495_v63, %v2494_v35  ;;  %v6304_v63 = vld [vmem:[%s6762_s1 + $0x48] ss:$16 sps:$4 sm:$0xff]   ;;  %v6322_v35 = vld [vmem:[%s6762_s1 + $0x20] ss:$16 sps:$4 sm:$0xff]  }
 0xc93   :  { %7486 = vst [vmem:[#allocation54_spill] sm:$0xff] %v6304_v63  ;;  %7489 = vst [vmem:[#allocation57_spill] sm:$0xff] %v6322_v35 }
 0xc94   :  { %3820 = vtanh.f32 %v6210_v33 }
 0xca1   :  { %v3821_v3 = vpop.eup %3820 }
 0xca2   :  { %v2498_v57 = vmul.f32 %v3821_v3, %v3819_v27  ;;  %v6328_v27 = vld [vmem:[%s6762_s1 + $0x28] ss:$16 sps:$4 sm:$0xff]   ;;  %v6334_v3 = vld [vmem:[%s6762_s1 + $0x4] ss:$16 sps:$4 sm:$0xff]  }
 0xca3   :  { %7490 = vst [vmem:[#allocation58_spill] sm:$0xff] %v6328_v27  ;;  %7491 = vst [vmem:[#allocation59_spill] sm:$0xff] %v6334_v3 }
 0xca4   :  { %v2499_v52 = vpack.c.bf16 %v2498_v57, %v2498_v57  ;;  %v6340_v57 = vld [vmem:[%s6762_s1 + $0xc] ss:$16 sps:$4 sm:$0xff]  }
 0xca5   :  { %7492 = vst [vmem:[#allocation60_spill] sm:$0xff] %v6340_v57 }
 0xca6   :  { %2533 = vmatmul.mubr.bf16.vlgmr.msra.gmra.mxu0 %v2499_v52  ;;  %2574 = vmatmul.mubr.bf16.vlgmr.msra.gmra.mxu1 %v2499_v52  ;;  %v6346_v52 = vld [vmem:[%s6762_s1] ss:$16 sps:$4 sm:$0xff]  }
 0xca7   :  { %2588 = vmatpush1.bf16.msra.mxu0 %v5987_v1  ;;  %2629 = vmatpush1.bf16.msra.mxu1 %v5993_v22  ;;  %7493 = vst [vmem:[#allocation61_spill] sm:$0xff] %v6346_v52 }
 0xca8   :  { %2589 = vmatprep.subr.bf16.mxu0 %v5999_v56  ;;  %2630 = vmatprep.subr.bf16.mxu1 %v6005_v6 }
 0xca9   :  { %2619 = vmatprep.mubr.bf16.mxu0 %v7145_v58  ;;  %2660 = vmatprep.mubr.bf16.mxu1 %v7145_v58 }
 0xcab   :  { %2590 = vmatpush1.bf16.msra.mxu0 %v6013_v62  ;;  %2631 = vmatpush1.bf16.msra.mxu1 %v6223_v42 }
 0xcac   :  { %2591 = vmatprep.subr.bf16.mxu0 %v6020_v18  ;;  %2632 = vmatprep.subr.bf16.mxu1 %v6230_v49 }
 0xcaf   :  { %2592 = vmatpush1.bf16.msra.mxu0 %v6027_v38  ;;  %2633 = vmatpush1.bf16.msra.mxu1 %v6237_v15 }
 0xcb0   :  { %2593 = vmatprep.subr.bf16.mxu0 %v6034_v29  ;;  %2634 = vmatprep.subr.bf16.mxu1 %v6244_v5 }
 0xcb3   :  { %2594 = vmatpush1.bf16.msra.mxu0 %v6250_v39  ;;  %2635 = vmatpush1.bf16.msra.mxu1 %v6256_v23  ;;  %v3417_v23 = vld [vmem:[%s6764_s0 + $0xd8] sm:$0xff] }
 0xcb4   :  { %2595 = vmatprep.subr.bf16.mxu0 %v6262_v2  ;;  %2636 = vmatprep.subr.bf16.mxu1 %v6268_v32 }
 0xcb7   :  { %2596 = vmatpush1.bf16.msra.mxu0 %v6274_v8  ;;  %2637 = vmatpush1.bf16.msra.mxu1 %v6280_v51 }
 0xcb8   :  { %2597 = vmatprep.subr.bf16.mxu0 %v6286_v48  ;;  %2638 = vmatprep.subr.bf16.mxu1 %v6292_v28 }
 0xcbb   :  { %2598 = vmatpush1.bf16.msra.mxu0 %v6298_v44  ;;  %2639 = vmatpush1.bf16.msra.mxu1 %v6304_v63 }
 0xcbc   :  { %2599 = vmatprep.subr.bf16.mxu0 %v6310_v60  ;;  %2640 = vmatprep.subr.bf16.mxu1 %v6316_v7 }
 0xcbf   :  { %2600 = vmatpush1.bf16.msra.mxu0 %v6322_v35  ;;  %2641 = vmatpush1.bf16.msra.mxu1 %v6328_v27  ;;  %v6352_v27 = vld [vmem:[%s6762_s1 + $0x8] ss:$16 sps:$4 sm:$0xff]  }
 0xcc0   :  { %2601 = vmatprep.subr.bf16.mxu0 %v6334_v3  ;;  %2642 = vmatprep.subr.bf16.mxu1 %v6340_v57  ;;  %7494 = vst [vmem:[#allocation8_spill] sm:$0xff] %v6352_v27  ;;  %v6358_v3 = vld [vmem:[%s6763_s2 + $0xe4] ss:$16 sps:$4 sm:$0xff]   ;;  %v6364_v57 = vld [vmem:[%s6763_s2 + $0xec] ss:$16 sps:$4 sm:$0xff]  }
 0xcc1   :  { %7495 = vst [vmem:[#allocation12_spill] sm:$0xff] %v6358_v3  ;;  %7496 = vst [vmem:[#allocation9_spill] sm:$0xff] %v6364_v57 }
 0xcc3   :  { %2602 = vmatpush1.bf16.msra.mxu0 %v6346_v52  ;;  %2643 = vmatpush1.bf16.msra.mxu1 %v6352_v27  ;;  %v6372_v27 = vld [vmem:[%s6763_s2 + $0xe0] ss:$16 sps:$4 sm:$0xff]  }
 0xcc4   :  { %2698 = vmatprep.subr.bf16.mxu0 %v6358_v3  ;;  %2739 = vmatprep.subr.bf16.mxu1 %v6364_v57  ;;  %7497 = vst [vmem:[#allocation13_spill] sm:$0xff] %v6372_v27  ;;  %v6378_v3 = vld [vmem:[%s6763_s2 + $0xe8] ss:$16 sps:$4 sm:$0xff]   ;;  %v6384_v57 = vld [vmem:[%s6763_s2 + $0xc4] ss:$16 sps:$4 sm:$0xff]  }
 0xcc5   :  { %7498 = vst [vmem:[#allocation10_spill] sm:$0xff] %v6378_v3  ;;  %7499 = vst [vmem:[#allocation16_spill] sm:$0xff] %v6384_v57 }
 0xcc6   :  { %2620 = vmatmul.mubr.bf16.vlgmr.msra.gmra.mxu0 %v6123_v4  ;;  %2661 = vmatmul.mubr.bf16.vlgmr.msra.gmra.mxu1 %v6123_v4  ;;  %v6390_v4 = vld [vmem:[%s6763_s2 + $0xcc] ss:$16 sps:$4 sm:$0xff]  }
 0xcc7   :  { %2699 = vmatpush1.bf16.msra.mxu0 %v6372_v27  ;;  %2740 = vmatpush1.bf16.msra.mxu1 %v6378_v3  ;;  %7500 = vst [vmem:[#allocation11_spill] sm:$0xff] %v6390_v4  ;;  %v6398_v3 = vld [vmem:[%s6763_s2 + $0xc0] ss:$16 sps:$4 sm:$0xff]   ;;  %v6416_v27 = vld [vmem:[%s6763_s2 + $0xac] ss:$16 sps:$4 sm:$0xff]  }
 0xcc8   :  { %2700 = vmatprep.subr.bf16.mxu0 %v6384_v57  ;;  %2741 = vmatprep.subr.bf16.mxu1 %v6390_v4  ;;  %7501 = vst [vmem:[#allocation17_spill] sm:$0xff] %v6398_v3  ;;  %v6404_v57 = vld [vmem:[%s6763_s2 + $0xc8] ss:$16 sps:$4 sm:$0xff]   ;;  %v6410_v4 = vld [vmem:[%s6763_s2 + $0xa4] ss:$16 sps:$4 sm:$0xff]   ;;  %7504 = vst [vmem:[#allocation15_spill] sm:$0xff] %v6416_v27 }
 0xcc9   :  { %2730 = vmatprep.mubr.bf16.mxu0 %v7145_v58  ;;  %2771 = vmatprep.mubr.bf16.mxu1 %v7145_v58  ;;  %7502 = vst [vmem:[#allocation14_spill] sm:$0xff] %v6404_v57  ;;  %7503 = vst [vmem:[#allocation20_spill] sm:$0xff] %v6410_v4 }
 0xccb   :  { %2701 = vmatpush1.bf16.msra.mxu0 %v6398_v3  ;;  %2742 = vmatpush1.bf16.msra.mxu1 %v6404_v57  ;;  %v6422_v3 = vld [vmem:[%s6763_s2 + $0xa0] ss:$16 sps:$4 sm:$0xff]   ;;  %v6428_v57 = vld [vmem:[%s6763_s2 + $0xa8] ss:$16 sps:$4 sm:$0xff]  }
 0xccc   :  { %2702 = vmatprep.subr.bf16.mxu0 %v6410_v4  ;;  %2743 = vmatprep.subr.bf16.mxu1 %v6416_v27  ;;  %7505 = vst [vmem:[#allocation21_spill] sm:$0xff] %v6422_v3  ;;  %7506 = vst [vmem:[#allocation18_spill] sm:$0xff] %v6428_v57  ;;  %v6434_v4 = vld [vmem:[%s6763_s2 + $0x84] ss:$16 sps:$4 sm:$0xff]   ;;  %v6440_v27 = vld [vmem:[%s6763_s2 + $0x8c] ss:$16 sps:$4 sm:$0xff]  }
 0xccd   :  { %7507 = vst [vmem:[#allocation24_spill] sm:$0xff] %v6434_v4  ;;  %7508 = vst [vmem:[#allocation19_spill] sm:$0xff] %v6440_v27 }
 0xccf   :  { %2703 = vmatpush1.bf16.msra.mxu0 %v6422_v3  ;;  %2744 = vmatpush1.bf16.msra.mxu1 %v6428_v57  ;;  %v6446_v3 = vld [vmem:[%s6763_s2 + $0x80] ss:$16 sps:$4 sm:$0xff]   ;;  %v6452_v57 = vld [vmem:[%s6763_s2 + $0x88] ss:$16 sps:$4 sm:$0xff]  }
 0xcd0   :  { %2704 = vmatprep.subr.bf16.mxu0 %v6434_v4  ;;  %2745 = vmatprep.subr.bf16.mxu1 %v6440_v27  ;;  %7509 = vst [vmem:[#allocation25_spill] sm:$0xff] %v6446_v3  ;;  %7510 = vst [vmem:[#allocation64_spill] sm:$0xff] %v6452_v57  ;;  %v6458_v4 = vld [vmem:[%s6763_s2 + $0x64] ss:$16 sps:$4 sm:$0xff]   ;;  %v6464_v27 = vld [vmem:[%s6763_s2 + $0x6c] ss:$16 sps:$4 sm:$0xff]  }
 0xcd1   :  { %7511 = vst [vmem:[#allocation65_spill] sm:$0xff] %v6458_v4  ;;  %7512 = vst [vmem:[#allocation27_spill] sm:$0xff] %v6464_v27 }
 0xcd3   :  { %2705 = vmatpush1.bf16.msra.mxu0 %v6446_v3  ;;  %2746 = vmatpush1.bf16.msra.mxu1 %v6452_v57  ;;  %v6470_v3 = vld [vmem:[%s6763_s2 + $0x60] ss:$16 sps:$4 sm:$0xff]   ;;  %v6476_v57 = vld [vmem:[%s6763_s2 + $0x68] ss:$16 sps:$4 sm:$0xff]  }
 0xcd4   :  { %2706 = vmatprep.subr.bf16.mxu0 %v6458_v4  ;;  %2747 = vmatprep.subr.bf16.mxu1 %v6464_v27  ;;  %7513 = vst [vmem:[#allocation23_spill] sm:$0xff] %v6470_v3  ;;  %7514 = vst [vmem:[#allocation28_spill] sm:$0xff] %v6476_v57  ;;  %v6482_v4 = vld [vmem:[%s6763_s2 + $0x44] ss:$16 sps:$4 sm:$0xff]   ;;  %v6488_v27 = vld [vmem:[%s6763_s2 + $0x4c] ss:$16 sps:$4 sm:$0xff]  }
 0xcd5   :  { %7515 = vst [vmem:[#allocation26_spill] sm:$0xff] %v6482_v4  ;;  %7516 = vst [vmem:[#allocation29_spill] sm:$0xff] %v6488_v27 }
 0xcd7   :  { %2707 = vmatpush1.bf16.msra.mxu0 %v6470_v3  ;;  %2748 = vmatpush1.bf16.msra.mxu1 %v6476_v57  ;;  %v6494_v3 = vld [vmem:[%s6763_s2 + $0x40] ss:$16 sps:$4 sm:$0xff]   ;;  %v6500_v57 = vld [vmem:[%s6763_s2 + $0x48] ss:$16 sps:$4 sm:$0xff]  }
 0xcd8   :  { %2708 = vmatprep.subr.bf16.mxu0 %v6482_v4  ;;  %2749 = vmatprep.subr.bf16.mxu1 %v6488_v27  ;;  %7517 = vst [vmem:[#allocation30_spill] sm:$0xff] %v6494_v3  ;;  %7518 = vst [vmem:[#allocation31_spill] sm:$0xff] %v6500_v57  ;;  %v6506_v4 = vld [vmem:[%s6763_s2 + $0x24] ss:$16 sps:$4 sm:$0xff]   ;;  %v6512_v27 = vld [vmem:[%s6763_s2 + $0x2c] ss:$16 sps:$4 sm:$0xff]  }
 0xcd9   :  { %7519 = vst [vmem:[#allocation32_spill] sm:$0xff] %v6506_v4  ;;  %7520 = vst [vmem:[#allocation33_spill] sm:$0xff] %v6512_v27 }
 0xcdb   :  { %2709 = vmatpush1.bf16.msra.mxu0 %v6494_v3  ;;  %2750 = vmatpush1.bf16.msra.mxu1 %v6500_v57  ;;  %v6518_v3 = vld [vmem:[%s6763_s2 + $0x20] ss:$16 sps:$4 sm:$0xff]   ;;  %v6524_v57 = vld [vmem:[%s6763_s2 + $0x28] ss:$16 sps:$4 sm:$0xff]  }
 0xcdc   :  { %2710 = vmatprep.subr.bf16.mxu0 %v6506_v4  ;;  %2751 = vmatprep.subr.bf16.mxu1 %v6512_v27  ;;  %7521 = vst [vmem:[#allocation34_spill] sm:$0xff] %v6518_v3  ;;  %7522 = vst [vmem:[#allocation35_spill] sm:$0xff] %v6524_v57  ;;  %v6530_v4 = vld [vmem:[%s6763_s2 + $0x4] ss:$16 sps:$4 sm:$0xff]   ;;  %v6536_v27 = vld [vmem:[%s6763_s2 + $0xc] ss:$16 sps:$4 sm:$0xff]  }
 0xcdd   :  { %7523 = vst [vmem:[#allocation7_spill] sm:$0xff] %v6530_v4  ;;  %7524 = vst [vmem:[#allocation36_spill] sm:$0xff] %v6536_v27 }
 0xcdf   :  { %2711 = vmatpush1.bf16.msra.mxu0 %v6518_v3  ;;  %2752 = vmatpush1.bf16.msra.mxu1 %v6524_v57  ;;  %v6542_v3 = vld [vmem:[%s6763_s2] ss:$16 sps:$4 sm:$0xff]   ;;  %v6548_v57 = vld [vmem:[%s6763_s2 + $0x8] ss:$16 sps:$4 sm:$0xff]  }
 0xce0   :  { %2712 = vmatprep.subr.bf16.mxu0 %v6530_v4  ;;  %2753 = vmatprep.subr.bf16.mxu1 %v6536_v27  ;;  %7525 = vst [vmem:[#allocation37_spill] sm:$0xff] %v6542_v3  ;;  %7526 = vst [vmem:[#allocation38_spill] sm:$0xff] %v6548_v57 }
 0xce3   :  { %2713 = vmatpush1.bf16.msra.mxu0 %v6542_v3  ;;  %2754 = vmatpush1.bf16.msra.mxu1 %v6548_v57  ;;  %v3414_v57 = vld [vmem:[%s6764_s0 + $0xc0] sm:$0xff] }
 0xce4   :  { %2809 = vmatprep.subr.bf16.mxu0 %v7453_v34  ;;  %2850 = vmatprep.subr.bf16.mxu1 %v6096_v47  ;;  %v3415_v47 = vld [vmem:[%s6764_s0 + $0xc8] sm:$0xff] }
 0xd66   :  { %v6553_v4 = vpop.f32.mrf.mxu0  ;;  %v6555_v27 = vpop.f32.mrf.mxu1 }
 0xd68   :  { %v6557_v52 = vpop.f32.mrf.mxu0  ;;  %v6559_v35 = vpop.f32.mrf.mxu1 }
 0xd6a   :  { %v2538_v3 = vpop.f32.mrf.mxu0  ;;  %v2579_v7 = vpop.f32.mrf.mxu1 }
 0xd6c   :  { %v2539_v60 = vpop.f32.mrf.mxu0  ;;  %v2580_v63 = vpop.f32.mrf.mxu1 }
 0xd86   :  { %v2621_v44 = vpop.f32.mrf.mxu0  ;;  %v2662_v34 = vpop.f32.mrf.mxu1 }
 0xd87   :  { %v2669_v28 = vadd.f32 %v3414_v57, %v2621_v44  ;;  %v3416_v44 = vld [vmem:[%s6764_s0 + $0xd0] sm:$0xff] }
 0xd88   :  { %v2623_v48 = vpop.f32.mrf.mxu0  ;;  %v2664_v51 = vpop.f32.mrf.mxu1 }
 0xd89   :  { %v3418_v8 = vmul.f32 -1.442695, %v2669_v28  ;;  %v2670_v32 = vadd.f32 %v3415_v47, %v2623_v48  ;;  %v2672_v39 = vadd.f32 %v3417_v23, %v2664_v51  ;;  %v2671_v28 = vadd.f32 %v3416_v44, %v2662_v34 }
 0xd8a   :  { %v2625_v2 = vpop.f32.mrf.mxu0  ;;  %v2666_v3 = vpop.f32.mrf.mxu1 }
 0xd8b   :  { %3822 = vpow2.f32 %v3418_v8  ;;  %v3419_v60 = vmul.f32 -1.442695, %v2670_v32  ;;  %v3420_v57 = vmul.f32 -1.442695, %v2672_v39 }
 0xd8c   :  { %v2626_v63 = vpop.f32.mrf.mxu0  ;;  %v2667_v7 = vpop.f32.mrf.mxu1 }
 0xd8d   :  { %3824 = vpow2.f32 %v3419_v60 }
 0xd8e   :  { %3826 = vpow2.f32 %v3420_v57 }
 0xd98   :  { %v3823_v5 = vpop.eup %3822 }
 0xd99   :  { %v2676_v48 = vadd.f32 1.0, %v3823_v5 }
 0xd9a   :  { %v3825_v2 = vpop.eup %3824 }
 0xd9b   :  { %3828 = vrcp.f32 %v2676_v48  ;;  %v2682_v32 = vadd.f32 1.0, %v3825_v2  ;;  %v3827_v8 = vpop.eup %3826 }
 0xd9c   :  { %3830 = vtanh.f32 %v2671_v28  ;;  %v2689_v63 = vadd.f32 1.0, %v3827_v8 }
 0xd9d   :  { %3832 = vrcp.f32 %v2682_v32 }
 0xd9e   :  { %3834 = vrcp.f32 %v2689_v63 }
 0xda8   :  { %v3829_v47 = vpop.eup %3828 }
 0xda9   :  { %v3831_v3 = vpop.eup %3830 }
 0xdaa   :  { %v3833_v60 = vpop.eup %3832  ;;  %v2693_v23 = vmul.f32 %v3831_v3, %v3829_v47 }
 0xdab   :  { %v2692_v51 = vmul.f32 %v3833_v60, %v6120_v45  ;;  %v3835_v5 = vpop.eup %3834  ;;  %v7533_v45 = vld [vmem:[#allocation63_spill] sm:$0xff] }
 0xdad   :  { %v6574_v7 = vadd.f32 %v2693_v23, %v2692_v51  ;;  %v7546_v23 = vld [vmem:[#allocation56_spill] sm:$0xff]  ;;  %v7547_v51 = vld [vmem:[#allocation57_spill] sm:$0xff] }
 0xdaf   :  { %3836 = vtanh.f32 %v6574_v7 }
 0xdbc   :  { %v3837_v39 = vpop.eup %3836 }
 0xdbd   :  { %v2696_v34 = vmul.f32 %v3837_v39, %v3835_v5  ;;  %v7548_v5 = vld [vmem:[#allocation58_spill] sm:$0xff]  ;;  %v7549_v39 = vld [vmem:[#allocation59_spill] sm:$0xff] }
 0xdbf   :  { %v6577_v44 = vpack.c.bf16 %v2696_v34, %v2696_v34  ;;  %v7550_v34 = vld [vmem:[#allocation60_spill] sm:$0xff] }
 0xdc1   :  { %2731 = vmatmul.mubr.bf16.vlgmr.msra.gmra.mxu0 %v6577_v44  ;;  %2772 = vmatmul.mubr.bf16.vlgmr.msra.gmra.mxu1 %v6577_v44 }
 0xdc2   :  { %2810 = vmatpush1.bf16.msra.mxu0 %v5821_v25  ;;  %2851 = vmatpush1.bf16.msra.mxu1 %v5827_v59  ;;  %v7527_v25 = vld [vmem:[#allocation40_spill] sm:$0xff]  ;;  %v7528_v59 = vld [vmem:[#allocation41_spill] sm:$0xff] }
 0xdc3   :  { %2811 = vmatprep.subr.bf16.mxu0 %v5833_v11  ;;  %2852 = vmatprep.subr.bf16.mxu1 %v5839_v16  ;;  %v7529_v11 = vld [vmem:[#allocation42_spill] sm:$0xff]  ;;  %v7530_v16 = vld [vmem:[#allocation43_spill] sm:$0xff] }
 0xdc4   :  { %2841 = vmatprep.mubr.bf16.mxu0 %v7145_v58  ;;  %2882 = vmatprep.mubr.bf16.mxu1 %v7145_v58 }
 0xdc6   :  { %2812 = vmatpush1.bf16.msra.mxu0 %v5847_v10  ;;  %2853 = vmatpush1.bf16.msra.mxu1 %v5853_v13  ;;  %v7531_v10 = vld [vmem:[#allocation44_spill] sm:$0xff]  ;;  %v7532_v13 = vld [vmem:[#allocation62_spill] sm:$0xff] }
 0xdc7   :  { %2813 = vmatprep.subr.bf16.mxu0 %v5859_v19  ;;  %2854 = vmatprep.subr.bf16.mxu1 %v5865_v14  ;;  %v2535_v19 = vadd.f32 %v6553_v4, %v7532_v13 }
 0xdca   :  { %2814 = vmatpush1.bf16.msra.mxu0 %v5871_v12  ;;  %2855 = vmatpush1.bf16.msra.mxu1 %v7454_v55  ;;  %v2537_v55 = vadd.f32 %v6557_v52, %v7533_v45 }
 0xdcb   :  { %2815 = vmatprep.subr.bf16.mxu0 %v7455_v61  ;;  %2856 = vmatprep.subr.bf16.mxu1 %v7456_v21 }
 0xdce   :  { %2816 = vmatpush1.bf16.msra.mxu0 %v7457_v41  ;;  %2857 = vmatpush1.bf16.msra.mxu1 %v7458_v37 }
 0xdcf   :  { %2817 = vmatprep.subr.bf16.mxu0 %v7459_v17  ;;  %2858 = vmatprep.subr.bf16.mxu1 %v7460_v50 }
 0xdd2   :  { %2818 = vmatpush1.bf16.msra.mxu0 %v7461_v0  ;;  %2859 = vmatpush1.bf16.msra.mxu1 %v7462_v20 }
 0xdd3   :  { %2819 = vmatprep.subr.bf16.mxu0 %v7463_v46  ;;  %2860 = vmatprep.subr.bf16.mxu1 %v7464_v9 }
 0xdd6   :  { %2820 = vmatpush1.bf16.msra.mxu0 %v7465_v53  ;;  %2861 = vmatpush1.bf16.msra.mxu1 %v6153_v30  ;;  %v2578_v53 = vadd.f32 %v6559_v35, %v4792_v24 }
 0xdd7   :  { %2821 = vmatprep.subr.bf16.mxu0 %v7466_v36  ;;  %2862 = vmatprep.subr.bf16.mxu1 %v6160_v40  ;;  %v2576_v36 = vadd.f32 %v6555_v27, %v4794_v26 }
 0xdda   :  { %2822 = vmatpush1.bf16.msra.mxu0 %v7467_v43  ;;  %2863 = vmatpush1.bf16.msra.mxu1 %v6167_v54 }
 0xddb   :  { %2823 = vmatprep.subr.bf16.mxu0 %v7468_v31  ;;  %2864 = vmatprep.subr.bf16.mxu1 %v7527_v25  ;;  %v7551_v25 = vld [vmem:[#allocation61_spill] sm:$0xff] }
 0xdde   :  { %2824 = vmatpush1.bf16.msra.mxu0 %v7528_v59  ;;  %2865 = vmatpush1.bf16.msra.mxu1 %v7529_v11  ;;  %v7552_v59 = vld [vmem:[#allocation8_spill] sm:$0xff] }
 0xddf   :  { %2896 = vmatprep.subr.bf16.mxu0 %v7530_v16  ;;  %2937 = vmatprep.subr.bf16.mxu1 %v7531_v10  ;;  %v7553_v11 = vld [vmem:[#allocation12_spill] sm:$0xff]  ;;  %v7554_v16 = vld [vmem:[#allocation9_spill] sm:$0xff] }
 0xde0   :  { %v7555_v10 = vld [vmem:[#allocation13_spill] sm:$0xff] }
 0xe81   :  { %v2732_v14 = vpop.f32.mrf.mxu0  ;;  %v2773_v12 = vpop.f32.mrf.mxu1 }
 0xe82   :  { %v2780_v61 = vadd.f32 %v2732_v14, %v2535_v19  ;;  %v2782_v40 = vadd.f32 %v2773_v12, %v2576_v36  ;;  %v7556_v19 = vld [vmem:[#allocation10_spill] sm:$0xff]  ;;  %v7557_v14 = vld [vmem:[#allocation16_spill] sm:$0xff]  ;;  %v7558_v12 = vld [vmem:[#allocation11_spill] sm:$0xff] }
 0xe83   :  { %v2734_v21 = vpop.f32.mrf.mxu0  ;;  %v2775_v41 = vpop.f32.mrf.mxu1  ;;  %v7574_v36 = vld [vmem:[#allocation29_spill] sm:$0xff] }
 0xe84   :  { %v3421_v37 = vmul.f32 -1.442695, %v2780_v61  ;;  %v2781_v17 = vadd.f32 %v2734_v21, %v2537_v55  ;;  %v2783_v30 = vadd.f32 %v2775_v41, %v2578_v53  ;;  %v7559_v55 = vld [vmem:[#allocation17_spill] sm:$0xff]  ;;  %v7560_v61 = vld [vmem:[#allocation14_spill] sm:$0xff]  ;;  %v7561_v21 = vld [vmem:[#allocation20_spill] sm:$0xff] }
 0xe85   :  { %v2736_v50 = vpop.f32.mrf.mxu0  ;;  %v2777_v0 = vpop.f32.mrf.mxu1  ;;  %v7562_v41 = vld [vmem:[#allocation15_spill] sm:$0xff]  ;;  %v7572_v53 = vld [vmem:[#allocation28_spill] sm:$0xff] }
 0xe86   :  { %3838 = vpow2.f32 %v3421_v37  ;;  %v3422_v20 = vmul.f32 -1.442695, %v2781_v17  ;;  %v3423_v43 = vmul.f32 -1.442695, %v2783_v30  ;;  %v7564_v37 = vld [vmem:[#allocation18_spill] sm:$0xff]  ;;  %v7565_v17 = vld [vmem:[#allocation24_spill] sm:$0xff] }
 0xe87   :  { %v2737_v46 = vpop.f32.mrf.mxu0  ;;  %v2778_v9 = vpop.f32.mrf.mxu1  ;;  %v7566_v50 = vld [vmem:[#allocation19_spill] sm:$0xff]  ;;  %v7567_v0 = vld [vmem:[#allocation25_spill] sm:$0xff]  ;;  %v7573_v30 = vld [vmem:[#allocation26_spill] sm:$0xff] }
 0xe88   :  { %3840 = vpow2.f32 %v3422_v20  ;;  %v7568_v20 = vld [vmem:[#allocation64_spill] sm:$0xff]  ;;  %v7570_v46 = vld [vmem:[#allocation27_spill] sm:$0xff] }
 0xe89   :  { %3842 = vtanh.f32 %v2782_v40  ;;  %v7571_v9 = vld [vmem:[#allocation23_spill] sm:$0xff]  ;;  %v7575_v40 = vld [vmem:[#allocation30_spill] sm:$0xff] }
 0xe8a   :  { %3844 = vpow2.f32 %v3423_v43  ;;  %v7576_v43 = vld [vmem:[#allocation31_spill] sm:$0xff] }
 0xe93   :  { %v3839_v54 = vpop.eup %3838 }
 0xe94   :  { %v2787_v31 = vadd.f32 1.0, %v3839_v54  ;;  %v7577_v54 = vld [vmem:[#allocation32_spill] sm:$0xff] }
 0xe95   :  { %v3841_v52 = vpop.eup %3840 }
 0xe96   :  { %3846 = vrcp.f32 %v2787_v31  ;;  %v2793_v4 = vadd.f32 1.0, %v3841_v52  ;;  %v3843_v57 = vpop.eup %3842  ;;  %v7578_v31 = vld [vmem:[#allocation33_spill] sm:$0xff]  ;;  %v7579_v52 = vld [vmem:[#allocation34_spill] sm:$0xff] }
 0xe97   :  { %v3845_v28 = vpop.eup %3844 }
 0xe98   :  { %3848 = vrcp.f32 %v2793_v4  ;;  %v2800_v35 = vadd.f32 1.0, %v3845_v28  ;;  %v7580_v4 = vld [vmem:[#allocation35_spill] sm:$0xff]  ;;  %v7582_v28 = vld [vmem:[#allocation36_spill] sm:$0xff] }
 0xe9a   :  { %3850 = vrcp.f32 %v2800_v35 }
 0xea3   :  { %v3847_v48 = vpop.eup %3846 }
 0xea4   :  { %v2804_v2 = vmul.f32 %v3847_v48, %v3843_v57  ;;  %v7581_v57 = vld [vmem:[#allocation7_spill] sm:$0xff]  ;;  %v7583_v48 = vld [vmem:[#allocation37_spill] sm:$0xff] }
 0xea5   :  { %v3849_v32 = vpop.eup %3848 }
 0xea6   :  { %v2803_v8 = vmul.f32 %v3849_v32, %v6210_v33  ;;  %v7539_v33 = vld [vmem:[#allocation50_spill] sm:$0xff] }
 0xea7   :  { %v3851_v27 = vpop.eup %3850 }
 0xea8   :  { %v6624_v47 = vadd.f32 %v2804_v2, %v2803_v8  ;;  %v7584_v2 = vld [vmem:[#allocation38_spill] sm:$0xff] }
 0xeaa   :  { %3852 = vtanh.f32 %v6624_v47 }
 0xeb7   :  { %v3853_v3 = vpop.eup %3852 }
 0xeb8   :  { %v2807_v60 = vmul.f32 %v3853_v3, %v3851_v27 }
 0xeba   :  { %v2808_v63 = vpack.c.bf16 %v2807_v60, %v2807_v60 }
 0xebc   :  { %2842 = vmatmul.mubr.bf16.vlgmr.msra.gmra.mxu0 %v2808_v63  ;;  %2883 = vmatmul.mubr.bf16.vlgmr.msra.gmra.mxu1 %v2808_v63 }
 0xebd   :  { %2897 = vmatpush1.bf16.msra.mxu0 %v5987_v1  ;;  %2938 = vmatpush1.bf16.msra.mxu1 %v5993_v22  ;;  %v7534_v1 = vld [vmem:[#allocation45_spill] sm:$0xff]  ;;  %v7535_v22 = vld [vmem:[#allocation46_spill] sm:$0xff] }
 0xebe   :  { %2898 = vmatprep.subr.bf16.mxu0 %v5999_v56  ;;  %2939 = vmatprep.subr.bf16.mxu1 %v6005_v6  ;;  %v7536_v56 = vld [vmem:[#allocation47_spill] sm:$0xff]  ;;  %v7537_v6 = vld [vmem:[#allocation48_spill] sm:$0xff] }
 0xebf   :  { %2928 = vmatprep.mubr.bf16.mxu0 %v7145_v58  ;;  %2969 = vmatprep.mubr.bf16.mxu1 %v7145_v58 }
 0xec1   :  { %2899 = vmatpush1.bf16.msra.mxu0 %v6013_v62  ;;  %2940 = vmatpush1.bf16.msra.mxu1 %v6223_v42  ;;  %v7538_v62 = vld [vmem:[#allocation49_spill] sm:$0xff]  ;;  %v7541_v42 = vld [vmem:[#allocation52_spill] sm:$0xff] }
 0xec2   :  { %2900 = vmatprep.subr.bf16.mxu0 %v6020_v18  ;;  %2941 = vmatprep.subr.bf16.mxu1 %v6230_v49  ;;  %v7540_v18 = vld [vmem:[#allocation51_spill] sm:$0xff]  ;;  %v7543_v49 = vld [vmem:[#allocation22_spill] sm:$0xff] }
 0xec5   :  { %2901 = vmatpush1.bf16.msra.mxu0 %v6027_v38  ;;  %2942 = vmatpush1.bf16.msra.mxu1 %v6237_v15  ;;  %v7542_v38 = vld [vmem:[#allocation53_spill] sm:$0xff]  ;;  %v7545_v15 = vld [vmem:[#allocation55_spill] sm:$0xff] }
 0xec6   :  { %2902 = vmatprep.subr.bf16.mxu0 %v6034_v29  ;;  %2943 = vmatprep.subr.bf16.mxu1 %v7534_v1  ;;  %v7544_v29 = vld [vmem:[#allocation54_spill] sm:$0xff] }
 0xec9   :  { %2903 = vmatpush1.bf16.msra.mxu0 %v7535_v22  ;;  %2944 = vmatpush1.bf16.msra.mxu1 %v7536_v56  ;;  %v3424_v22 = vld [vmem:[%s6764_s0 + $0xe0] sm:$0xff] }
 0xeca   :  { %2904 = vmatprep.subr.bf16.mxu0 %v7537_v6  ;;  %2945 = vmatprep.subr.bf16.mxu1 %v7538_v62  ;;  %v3425_v62 = vld [vmem:[%s6764_s0 + $0xe8] sm:$0xff] }
 0xecd   :  { %2905 = vmatpush1.bf16.msra.mxu0 %v7539_v33  ;;  %2946 = vmatpush1.bf16.msra.mxu1 %v7540_v18 }
 0xece   :  { %2906 = vmatprep.subr.bf16.mxu0 %v7541_v42  ;;  %2947 = vmatprep.subr.bf16.mxu1 %v7542_v38 }
 0xed1   :  { %2907 = vmatpush1.bf16.msra.mxu0 %v7543_v49  ;;  %2948 = vmatpush1.bf16.msra.mxu1 %v7544_v29 }
 0xed2   :  { %2908 = vmatprep.subr.bf16.mxu0 %v7545_v15  ;;  %2949 = vmatprep.subr.bf16.mxu1 %v7546_v23 }
 0xed5   :  { %2909 = vmatpush1.bf16.msra.mxu0 %v7547_v51  ;;  %2950 = vmatpush1.bf16.msra.mxu1 %v7548_v5 }
 0xed6   :  { %2910 = vmatprep.subr.bf16.mxu0 %v7549_v39  ;;  %2951 = vmatprep.subr.bf16.mxu1 %v7550_v34  ;;  %v3427_v39 = vld [vmem:[%s6764_s0 + $0xf8] sm:$0xff] }
 0xed9   :  { %2911 = vmatpush1.bf16.msra.mxu0 %v7551_v25  ;;  %2952 = vmatpush1.bf16.msra.mxu1 %v7552_v59  ;;  %v3426_v25 = vld [vmem:[%s6764_s0 + $0xf0] sm:$0xff] }
 0xeda   :  { %3007 = vmatprep.subr.bf16.mxu0 %v7553_v11  ;;  %3048 = vmatprep.subr.bf16.mxu1 %v7554_v16 }
 0xedc   :  { %2929 = vmatmul.mubr.bf16.vlgmr.msra.gmra.mxu0 %v6577_v44  ;;  %2970 = vmatmul.mubr.bf16.vlgmr.msra.gmra.mxu1 %v6577_v44  ;;  %v7563_v44 = vld [vmem:[#allocation21_spill] sm:$0xff] }
 0xedd   :  { %3008 = vmatpush1.bf16.msra.mxu0 %v7555_v10  ;;  %3049 = vmatpush1.bf16.msra.mxu1 %v7556_v19 }
 0xede   :  { %3009 = vmatprep.subr.bf16.mxu0 %v7557_v14  ;;  %3050 = vmatprep.subr.bf16.mxu1 %v7558_v12 }
 0xedf   :  { %3039 = vmatprep.mubr.bf16.mxu0 %v7145_v58  ;;  %3080 = vmatprep.mubr.bf16.mxu1 %v7145_v58  ;;  %v7569_v58 = vld [vmem:[#allocation65_spill] sm:$0xff] }
 0xee1   :  { %3010 = vmatpush1.bf16.msra.mxu0 %v7559_v55  ;;  %3051 = vmatpush1.bf16.msra.mxu1 %v7560_v61 }
 0xee2   :  { %3011 = vmatprep.subr.bf16.mxu0 %v7561_v21  ;;  %3052 = vmatprep.subr.bf16.mxu1 %v7562_v41 }
 0xee5   :  { %3012 = vmatpush1.bf16.msra.mxu0 %v7563_v44  ;;  %3053 = vmatpush1.bf16.msra.mxu1 %v7564_v37 }
 0xee6   :  { %3013 = vmatprep.subr.bf16.mxu0 %v7565_v17  ;;  %3054 = vmatprep.subr.bf16.mxu1 %v7566_v50 }
 0xee9   :  { %3014 = vmatpush1.bf16.msra.mxu0 %v7567_v0  ;;  %3055 = vmatpush1.bf16.msra.mxu1 %v7568_v20 }
 0xeea   :  { %3015 = vmatprep.subr.bf16.mxu0 %v7569_v58  ;;  %3056 = vmatprep.subr.bf16.mxu1 %v7570_v46  ;;  %v3622_v46 = vld [vmem:[%s6766_s5 + $0x38] sm:$0xff]  }
 0xeed   :  { %3016 = vmatpush1.bf16.msra.mxu0 %v7571_v9  ;;  %3057 = vmatpush1.bf16.msra.mxu1 %v7572_v53  ;;  %v4080_v9 = vmov 0.0   ;;  %v3624_v53 = vld [vmem:[%s6766_s5 + $0x28] sm:$0xff]  }
 0xeee   :  { %3017 = vmatprep.subr.bf16.mxu0 %v7573_v30  ;;  %3058 = vmatprep.subr.bf16.mxu1 %v7574_v36  ;;  %v3625_v30 = vld [vmem:[%s6766_s5 + $0x20] sm:$0xff]   ;;  %v3626_v36 = vld [vmem:[%s6766_s5 + $0x18] sm:$0xff]  }
 0xef1   :  { %3018 = vmatpush1.bf16.msra.mxu0 %v7575_v40  ;;  %3059 = vmatpush1.bf16.msra.mxu1 %v7576_v43  ;;  %v3627_v40 = vld [vmem:[%s6766_s5 + $0x10] sm:$0xff]   ;;  %v3628_v43 = vld [vmem:[%s6766_s5 + $0x8] sm:$0xff]  }
 0xef2   :  { %3019 = vmatprep.subr.bf16.mxu0 %v7577_v54  ;;  %3060 = vmatprep.subr.bf16.mxu1 %v7578_v31  ;;  %v3629_v54 = vld [vmem:[%s6766_s5] sm:$0xff]  }
 0xef5   :  { %3020 = vmatpush1.bf16.msra.mxu0 %v7579_v52  ;;  %3061 = vmatpush1.bf16.msra.mxu1 %v7580_v4 }
 0xef6   :  { %3021 = vmatprep.subr.bf16.mxu0 %v7581_v57  ;;  %3062 = vmatprep.subr.bf16.mxu1 %v7582_v28 }
 0xef9   :  { %3022 = vmatpush1.bf16.msra.mxu0 %v7583_v48  ;;  %3063 = vmatpush1.bf16.msra.mxu1 %v7584_v2 }
 0xefa   :  { %3454 = vmatprep.subr.bf16.mxu0 %v4080_v9 }
 0xf7c   :  { %v6695_v32 = vpop.f32.mrf.mxu0  ;;  %v6697_v35 = vpop.f32.mrf.mxu1 }
 0xf7d   :  { %v2844_v31 = vadd.f32 %v6695_v32, %v7532_v13 }
 0xf7e   :  { %v6699_v8 = vpop.f32.mrf.mxu0  ;;  %v6701_v27 = vpop.f32.mrf.mxu1 }
 0xf7f   :  { %v2846_v57 = vadd.f32 %v6699_v8, %v7533_v45  ;;  %v2887_v13 = vadd.f32 %v6701_v27, %v4792_v24 }
 0xf80   :  { %v2847_v3 = vpop.f32.mrf.mxu0  ;;  %v2888_v60 = vpop.f32.mrf.mxu1 }
 0xf82   :  { %v2848_v63 = vpop.f32.mrf.mxu0  ;;  %v2889_v1 = vpop.f32.mrf.mxu1 }
 0xf9c   :  { %v2930_v56 = vpop.f32.mrf.mxu0  ;;  %v2971_v6 = vpop.f32.mrf.mxu1 }
 0xf9d   :  { %v2978_v33 = vadd.f32 %v3424_v22, %v2930_v56  ;;  %v2980_v16 = vadd.f32 %v3426_v25, %v2971_v6  ;;  %v14_v25 = vstv %s6767_s8 }
 0xf9e   :  { %v2932_v18 = vpop.f32.mrf.mxu0  ;;  %v2973_v42 = vpop.f32.mrf.mxu1  ;;  %15 = vst [vmem:[#allocation6] sm:$0x1] %v14_v25 }
 0xf9f   :  { %v3428_v38 = vmul.f32 -1.442695, %v2978_v33  ;;  %v2979_v49 = vadd.f32 %v3425_v62, %v2932_v18  ;;  %v2981_v34 = vadd.f32 %v3427_v39, %v2973_v42  ;;  %v2885_v62 = vadd.f32 %v6697_v35, %v4794_v26 }
 0xfa0   :  { %v2934_v29 = vpop.f32.mrf.mxu0  ;;  %v2975_v15 = vpop.f32.mrf.mxu1 }
 0xfa1   :  { %3854 = vpow2.f32 %v3428_v38  ;;  %v3429_v23 = vmul.f32 -1.442695, %v2979_v49  ;;  %v3430_v59 = vmul.f32 -1.442695, %v2981_v34 }
 0xfa2   :  { %v2935_v51 = vpop.f32.mrf.mxu0  ;;  %v2976_v5 = vpop.f32.mrf.mxu1 }
 0xfa3   :  { %3856 = vpow2.f32 %v3429_v23 }
 0xfa4   :  { %3858 = vpow2.f32 %v3430_v59  ;;  %v3434_v59 = vld [vmem:[%s6768_s6] ss:$0 sm:$0xff] }
 0xfae   :  { %v3855_v11 = vpop.eup %3854 }
 0xfaf   :  { %v2985_v10 = vadd.f32 1.0, %v3855_v11 }
 0xfb0   :  { %v3857_v19 = vpop.eup %3856 }
 0xfb1   :  { %3860 = vrcp.f32 %v2985_v10  ;;  %v2991_v14 = vadd.f32 1.0, %v3857_v19  ;;  %v3859_v12 = vpop.eup %3858  ;;  %v3443_v10 = vld [vmem:[%s6769_s7] ss:$0 sm:$0xff] }
 0xfb2   :  { %3862 = vtanh.f32 %v2980_v16  ;;  %v2998_v41 = vadd.f32 1.0, %v3859_v12 }
 0xfb3   :  { %3864 = vrcp.f32 %v2991_v14 }
 0xfb4   :  { %3866 = vrcp.f32 %v2998_v41 }
 0xfbe   :  { %v3861_v55 = vpop.eup %3860 }
 0xfbf   :  { %v3863_v61 = vpop.eup %3862 }
 0xfc0   :  { %v3865_v21 = vpop.eup %3864  ;;  %v3002_v44 = vmul.f32 %v3863_v61, %v3861_v55  ;;  %v3444_v61 = vld [vmem:[#allocation6] ss:$0 sm:$0xff] }
 0xfc1   :  { %v3001_v37 = vmul.f32 %v3865_v21, %v6574_v7  ;;  %v3867_v50 = vpop.eup %3866  ;;  %v3623_v7 = vld [vmem:[%s6766_s5 + $0x30] sm:$0xff]  }
 0xfc3   :  { %v3003_v17 = vadd.f32 %v3002_v44, %v3001_v37 }
 0xfc5   :  { %3868 = vtanh.f32 %v3003_v17 }
 0xfd2   :  { %v3869_v0 = vpop.eup %3868 }
 0xfd3   :  { %v3005_v20 = vmul.f32 %v3869_v0, %v3867_v50 }
 0xfd5   :  { %v3006_v58 = vpack.c.bf16 %v3005_v20, %v3005_v20 }
 0xfd7   :  { %3040 = vmatmul.mubr.bf16.vlgmr.msra.gmra.mxu0 %v3006_v58  ;;  %3081 = vmatmul.mubr.bf16.vlgmr.msra.gmra.mxu1 %v3006_v58 }
 0xfd8   :  { %3455 = vmatpush3.bf16.msra.mxu0 %v3622_v46  ;;  %3470 = vmatprep.mubr.msk.bf16.mxu0 %vm4081_vm0, %v4080_v9 }
 0xfd9   :  { %3456 = vmatprep.subr.bf16.mxu0 %v4080_v9 }
 0xfdc   :  { %3457 = vmatpush3.bf16.msra.mxu0 %v3623_v7 }
 0xfdd   :  { %3458 = vmatprep.subr.bf16.mxu0 %v4080_v9 }
 0xfe0   :  { %3459 = vmatpush3.bf16.msra.mxu0 %v3624_v53 }
 0xfe1   :  { %3460 = vmatprep.subr.bf16.mxu0 %v4080_v9 }
 0xfe4   :  { %3461 = vmatpush3.bf16.msra.mxu0 %v3625_v30 }
 0xfe5   :  { %3462 = vmatprep.subr.bf16.mxu0 %v4080_v9 }
 0xfe8   :  { %3463 = vmatpush3.bf16.msra.mxu0 %v3626_v36 }
 0xfe9   :  { %3464 = vmatprep.subr.bf16.mxu0 %v4080_v9 }
 0xfec   :  { %3465 = vmatpush3.bf16.msra.mxu0 %v3627_v40 }
 0xfed   :  { %3466 = vmatprep.subr.bf16.mxu0 %v4080_v9 }
 0xff0   :  { %3467 = vmatpush3.bf16.msra.mxu0 %v3628_v43 }
 0xff1   :  { %3468 = vmatprep.subr.bf16.mxu0 %v4080_v9 }
 0xff4   :  { %3469 = vmatpush3.bf16.msra.mxu0 %v3629_v54 }
0x1097   :  { %v3041_v52 = vpop.f32.mrf.mxu0  ;;  %v3082_v4 = vpop.f32.mrf.mxu1 }
0x1098   :  { %v3089_v28 = vadd.f32 %v3041_v52, %v2844_v31  ;;  %v3091_v45 = vadd.f32 %v3082_v4, %v2885_v62 }
0x1099   :  { %v3043_v48 = vpop.f32.mrf.mxu0  ;;  %v3084_v2 = vpop.f32.mrf.mxu1 }
0x109a   :  { %v3431_v3 = vmul.f32 -1.442695, %v3089_v28  ;;  %v3090_v60 = vadd.f32 %v3043_v48, %v2846_v57  ;;  %v3092_v32 = vadd.f32 %v3084_v2, %v2887_v13 }
0x109b   :  { %v3045_v63 = vpop.f32.mrf.mxu0  ;;  %v3086_v1 = vpop.f32.mrf.mxu1 }
0x109c   :  { %3870 = vpow2.f32 %v3431_v3  ;;  %v3432_v22 = vmul.f32 -1.442695, %v3090_v60  ;;  %v3433_v8 = vmul.f32 -1.442695, %v3092_v32 }
0x109d   :  { %v3046_v56 = vpop.f32.mrf.mxu0  ;;  %v3087_v6 = vpop.f32.mrf.mxu1 }
0x109e   :  { %3872 = vpow2.f32 %v3432_v22 }
0x109f   :  { %3874 = vtanh.f32 %v3091_v45 }
0x10a0   :  { %3876 = vpow2.f32 %v3433_v8 }
0x10a9   :  { %v3871_v33 = vpop.eup %3870 }
0x10aa   :  { %v3096_v18 = vadd.f32 1.0, %v3871_v33 }
0x10ab   :  { %v3873_v42 = vpop.eup %3872 }
0x10ac   :  { %3878 = vrcp.f32 %v3096_v18  ;;  %v3102_v38 = vadd.f32 1.0, %v3873_v42  ;;  %v3875_v49 = vpop.eup %3874 }
0x10ad   :  { %v3877_v29 = vpop.eup %3876 }
0x10ae   :  { %3880 = vrcp.f32 %v3102_v38  ;;  %v3109_v24 = vadd.f32 1.0, %v3877_v29 }
0x10b0   :  { %3882 = vrcp.f32 %v3109_v24 }
0x10b9   :  { %v3879_v15 = vpop.eup %3878 }
0x10ba   :  { %v3113_v23 = vmul.f32 %v3879_v15, %v3875_v49 }
0x10bb   :  { %v3881_v51 = vpop.eup %3880 }
0x10bc   :  { %v3112_v27 = vmul.f32 %v3881_v51, %v6624_v47 }
0x10bd   :  { %v3883_v26 = vpop.eup %3882 }
0x10be   :  { %v3114_v5 = vadd.f32 %v3113_v23, %v3112_v27 }
0x10c0   :  { %3884 = vtanh.f32 %v3114_v5 }
0x10cd   :  { %v3885_v35 = vpop.eup %3884 }
0x10ce   :  { %v3116_v39 = vmul.f32 %v3885_v35, %v3883_v26 }
0x10d0   :  { %v3125_v34 = vpack.c.bf16 %v3116_v39, %v3116_v39 }
0x10d2   :  { %3471 = vmatmul.mubr.bf16.vlgmr.msra.gmra.mxu0 %v3125_v34 }
0x1192   :  { %v3231_v11 = vpop.f32.mrf.mxu0 }
0x1193   :  { %v3232_v16 = vadd.f32 %v3434_v59, %v3231_v11 }
0x1194   :  { %v3472_v47 = vpop.f32.mrf.mxu0 }
0x1195   :  { %v3237_v19 = vmax.f32 %v3232_v16, 0.0 }
0x1196   :  { %v3234_v14 = vpop.f32.mrf.mxu0 }
0x1197   :  { %v3245_v12 = vmul.f32 %v3443_v10, %v3237_v19 }
0x1198   :  { %v3473_v55 = vpop.f32.mrf.mxu0 }
0x1199   :  { %3246 = vadd.xlane.f32.xlu0 %v3245_v12 }
0x1222   :  { %v3247_v21 = vpop.xlane.xlu0 %3246 }
0x1223   :  { %v3255_v41 = vadd.f32 %v3444_v61, %v3247_v21 }
0x1225   :  { %3257 = vst.msk [vmem:[%s6770_s9] sm:$0xff] %vm3256_vm1, %v3255_v41 }

</bundles_post_ra>
